<compile_context>
chip_gen: v7x
topology: tpu7x:2x2x1
jax: 0.10.0
libtpu: 0.0.40
codegen_flags: <defaults>
</compile_context>

<pallas_src>
import functools

import numpy as np
import jax
import jax.numpy as jnp
from jax.experimental import pallas as pl
from jax.experimental.pallas import tpu as pltpu

_NEG = -1e30   # stands in for -inf padding of F.max_pool2d
_POS = 1e30    # stands in for +inf padding of the erosion


def _round_up(v, m):
    return (v + m - 1) // m * m


def _gaussian_weights_5():
    # torchvision gaussian_blur default sigma for kernel_size=5:
    # 0.3*((5-1)*0.5-1)+0.8 = 1.1
    sigma = 0.3 * ((5 - 1) * 0.5 - 1) + 0.8
    xs = np.arange(5, dtype=np.float64) - 2.0
    pdf = np.exp(-0.5 * (xs / sigma) ** 2)
    return tuple(float(v) for v in (pdf / pdf.sum()))


# ---------------- roll availability / convention probe -----------------------

@functools.lru_cache(maxsize=None)
def _roll_signs():
    """Per-axis sign s.t. pltpu.roll(x, s*k, axis) == jnp.roll(x, k, axis).

    Returns 0 for an axis if pltpu.roll is unusable there (falls back to
    concat-based shifts for that axis only).
    """
    def probe(axis):
        try:
            ht, wt = 16, 256
            xv = np.arange(ht * wt, dtype=np.float32).reshape(ht, wt)

            def kern(x_ref, o_ref):
                o_ref[...] = pltpu.roll(x_ref[...], 3, axis)

            out = pl.pallas_call(
                kern, out_shape=jax.ShapeDtypeStruct((ht, wt), jnp.float32)
            )(jnp.asarray(xv))
            out = np.asarray(jax.device_get(out))
            if np.array_equal(out, np.roll(xv, 3, axis=axis)):
                return 1
            if np.array_equal(out, np.roll(xv, -3, axis=axis)):
                return -1
            return 0
        except Exception:   # any lowering/runtime issue -> concat fallback
            return 0

    return (probe(0), probe(1))


# ---------------- in-kernel helpers (static shapes, fully unrolled) ----------

def _make_shifter(ridx, cidx, roll_sign):
    """Returns shift(x, d, axis, fill): y[i] = x[i+d] inside the canvas, else fill."""

    def shift(x, d, axis, fill):
        if d == 0:
            return x
        n = x.shape[axis]
        if abs(d) >= n:
            return jnp.full(x.shape, fill, dtype=x.dtype)
        sign = roll_sign[axis]
        if sign != 0:
            idx = ridx if axis == 0 else cidx
            rolled = pltpu.roll(x, (-d * sign) % n, axis)
            if d > 0:
                return jnp.where(idx >= n - d, fill, rolled)
            return jnp.where(idx < -d, fill, rolled)
        # Fallback: slice + fill strip + concat (roll unusable on this axis).
        strip_shape = list(x.shape)
        strip_shape[axis] = abs(d)
        strip = jnp.full(tuple(strip_shape), fill, dtype=x.dtype)
        if axis == 0:
            if d > 0:
                return jnp.concatenate([x[d:, :], strip], axis=0)
            return jnp.concatenate([strip, x[:n + d, :]], axis=0)
        if d > 0:
            return jnp.concatenate([x[:, d:], strip], axis=1)
        return jnp.concatenate([strip, x[:, :n + d]], axis=1)

    return shift


def _ce(v, i, j):
    """Compare-exchange of two planes in a python list (min -> i, max -> j)."""
    a, b = v[i], v[j]
    v[i] = jnp.minimum(a, b)
    v[j] = jnp.maximum(a, b)


def _minmax_to_ends(w):
    """CE network routing the minimum to w[0] and the maximum to w[-1]."""
    s = len(w)
    for a in range(0, s - 1, 2):          # adjacent pairs
        _ce(w, a, a + 1)
    for a in range(2, s, 2):              # min tournament into slot 0
        _ce(w, 0, a)
    maxs = list(range(1, s, 2))           # max tournament into slot s-1
    if s % 2 == 1:
        maxs.append(s - 1)
    for a, b in zip(maxs[:-1], maxs[1:]):
        _ce(w, a, b)


def _pool_1d(x, k, axis, fill, op, shift, slack_ok):
    """Centered width-k sliding `op` (max/min) along `axis`, `fill` outside."""
    half = k // 2
    if half == 0:
        return x
    if slack_ok:
        # Backward running extreme over offsets {-(k-1)..0} via log doubling,
        # then one recentring shift (+half).  Valid because the canvas extends
        # at least `half` rows/cols past the real image on the high side.
        m = x
        cov = 1
        while cov < k:
            s = min(cov, k - cov)
            m = op(m, shift(m, -s, axis, fill))
            cov += s
        return shift(m, half, axis, fill)
    # Symmetric forward/backward trees (no canvas slack on this axis).
    f = x
    cov = 1
    while cov < half + 1:
        s = min(cov, half + 1 - cov)
        f = op(f, shift(f, s, axis, fill))
        cov += s
    b = x
    cov = 1
    while cov < half + 1:
        s = min(cov, half + 1 - cov)
        b = op(b, shift(b, -s, axis, fill))
        cov += s
    return op(f, b)


def _pool2d(x, k, halo, fill, op, shift, col_slack):
    """Stride-1 k x k max/min pool with `fill` padding at the real image border."""
    if halo is not None:
        x = jnp.where(halo, fill, x)
    x = _pool_1d(x, k, 0, fill, op, shift, True)            # rows always have slack
    return _pool_1d(x, k, 1, fill, op, shift, col_slack >= k // 2)


def _median5(x, halo, shift):
    """5x5 median with zero padding (== conv2d(eye) + torch.median, index 12)."""
    if halo is not None:
        x = jnp.where(halo, 0.0, x)

    # Vertical taps, fully sorted pointwise: v[0] <= ... <= v[4].
    v = [shift(x, -2, 0, 0.0), shift(x, -1, 0, 0.0), x,
         shift(x, 1, 0, 0.0), shift(x, 2, 0, 0.0)]
    for p in range(4):
        for j in range(4 - p):
            _ce(v, j, j + 1)

    # For each (column-sorted) row, keep only the elements that can be the
    # median of the doubly-sorted 5x5 window: 13 candidates total, streamed.
    keep_slots = ((3, 4), (2, 3, 4), (1, 2, 3), (0, 1, 2), (0, 1))

    def candidates():
        for i in range(5):
            h = [shift(v[i], -2, 1, 0.0), shift(v[i], -1, 1, 0.0), v[i],
                 shift(v[i], 1, 1, 0.0), shift(v[i], 2, 1, 0.0)]
            if i in (0, 3):            # push the two largest to slots 3, 4
                for j in range(4):
                    _ce(h, j, j + 1)
                for j in range(3):
                    _ce(h, j, j + 1)
            elif i in (1, 4):          # push the two smallest to slots 0, 1
                for j in range(3, -1, -1):
                    _ce(h, j, j + 1)
                for j in range(3, 0, -1):
                    _ce(h, j, j + 1)
            else:                      # i == 2: min -> slot 0, max -> slot 4
                _ce(h, 0, 1); _ce(h, 2, 3); _ce(h, 0, 2)
                _ce(h, 0, 4); _ce(h, 1, 3); _ce(h, 3, 4)
            for s in keep_slots[i]:
                yield h[s]

    # Forgetful selection of the 7th smallest of the 13 streamed candidates:
    # fill to 8, then 5x {drop min & max, add one}, finish with median-of-3.
    # 36 CEs vs 63 for the old partial bubble, and far fewer live planes.
    work = []
    for idx, cand in enumerate(candidates()):
        work.append(cand)
        if 7 <= idx <= 11:
            _minmax_to_ends(work)
            work = work[1:-1]
    assert len(work) == 3
    a, b, c = work
    return jnp.maximum(jnp.minimum(a, b), jnp.minimum(jnp.maximum(a, b), c))


def _gaussian5(x, w, H, W, halo, ridx, cidx, shift):
    """Separable 5x5 gaussian with reflect padding at the real image border.

    The reflect handling is folded into per-row / per-column tap weights so no
    full-plane boundary corrections are needed.
    """
    if halo is not None:
        x = jnp.where(halo, 0.0, x)

    def pass_axis(u, axis, idx, n):
        cm2 = w[0] + jnp.where(idx == n - 1, w[4], 0.0)
        cm1 = w[1] + jnp.where(idx == n - 1, w[3], 0.0)
        c0 = (w[2] + jnp.where(idx == 1, w[0], 0.0)
              + jnp.where(idx == n - 2, w[4], 0.0))
        cp1 = w[3] + jnp.where(idx == 0, w[1], 0.0)
        cp2 = w[4] + jnp.where(idx == 0, w[0], 0.0)
        return (cm2 * shift(u, -2, axis, 0.0)
                + cm1 * shift(u, -1, axis, 0.0)
                + c0 * u
                + cp1 * shift(u, 1, axis, 0.0)
                + cp2 * shift(u, 2, axis, 0.0))

    y = pass_axis(x, 0, ridx, H)
    return pass_axis(y, 1, cidx, W)


# ---------------- the Pallas kernel ------------------------------------------

def _ip_basic_kernel(x_ref, o_ref, *, H, W, max_depth, min_depth, kernel_size,
                     gauss_w, roll_sign):
    x = x_ref[0]                      # (Hp, Wp) f32; real image in [0:H, 0:W]
    Hp, Wp = x.shape

    # Hoisted index vectors / halo mask, reused by every stage.
    ridx = jax.lax.broadcasted_iota(jnp.int32, (Hp, 1), 0)
    cidx = jax.lax.broadcasted_iota(jnp.int32, (1, Wp), 1)
    shift = _make_shifter(ridx, cidx, roll_sign)
    if Hp > H or Wp > W:
        halo = (ridx >= H) | (cidx >= W)
    else:
        halo = None
    col_slack = Wp - W

    # 1) invert valid depths
    d = jnp.where(x > min_depth, max_depth - x, x)
    # 2+3a) custom dilation fused with the closing's dilation:
    #       maxpool(k) o maxpool(5) == maxpool(k+4) with -inf border padding.
    d = _pool2d(d, kernel_size + 4, halo, _NEG, jnp.maximum, shift, col_slack)
    # 3b) closing's erosion as a direct min-pool (+inf border padding).
    d = _pool2d(d, 5, halo, _POS, jnp.minimum, shift, col_slack)
    # 4) fill remaining empty pixels from a 7x7 dilation
    d = jnp.where(d < min_depth,
                  _pool2d(d, 7, halo, _NEG, jnp.maximum, shift, col_slack), d)
    # TODO(synk): `extrapolate=True` branch raises NotImplementedError upstream; not implemented.
    # 5) 5x5 median blur
    d = _median5(d, halo, shift)
    # 6) gaussian blur, blended only onto valid pixels
    # TODO(synk): BLUR_TYPE.BILATERAL_FILTER branch raises NotImplementedError upstream; only gaussian implemented.
    blurred = _gaussian5(d, gauss_w, H, W, halo, ridx, cidx, shift)
    d = jnp.where(d > min_depth, blurred, d)
    # 7) un-invert
    d = jnp.where(d > min_depth, max_depth - d, d)

    o_ref[0] = d


# ---------------- wrapper -----------------------------------------------------

def ip_basic_forward(in_depth, *, max_depth=100.0, kernel_size=5, min_depth=0.1):
    """in_depth: (B, C, H, W) depth map (NCHW, like the PyTorch module)."""
    assert kernel_size % 2 == 1, '"kernel_size" must be odd.'
    B, C, H, W = in_depth.shape
    assert H >= 3 and W >= 3, "image must be at least 3x3"
    N = B * C

    # Pad rows by the largest pool radius so the fast (recentred) sliding
    # max/min can always be used along rows; columns only align to 128 lanes.
    P = max((kernel_size + 4) // 2, 3)
    Hp = _round_up(H + P, 8)
    Wp = _round_up(W, 128)

    x = in_depth.reshape(N, H, W).astype(jnp.float32)
    if (Hp, Wp) != (H, W):
        x = jnp.pad(x, ((0, 0), (0, Hp - H), (0, Wp - W)))

    roll_sign = _roll_signs()

    kernel = functools.partial(
        _ip_basic_kernel,
        H=H, W=W,
        max_depth=float(max_depth),
        min_depth=float(min_depth),
        kernel_size=int(kernel_size),
        gauss_w=_gaussian_weights_5(),
        roll_sign=roll_sign,
    )

    # ~14 live planes at peak (median stage) + double-buffered in/out blocks.
    # Capped at 56 MiB so we never request v7x's entire 64 MiB physical VMEM.
    plane_bytes = Hp * Wp * 4
    vmem_limit = int(min(56 * 2**20, max(24 * 2**20, 22 * plane_bytes)))

    # Note: one grid step per (H, W) plane; with N >= 2 the "parallel" axis lets
    # megacore chips shard images across cores.  For v7x with N == 1 a further
    # row-band grid axis (with a ~16-row halo) would be needed to occupy both
    # TensorCores; kept whole-image here for simplicity.
    out = pl.pallas_call(
        kernel,
        out_shape=jax.ShapeDtypeStruct((N, Hp, Wp), jnp.float32),
        grid=(N,),
        in_specs=[pl.BlockSpec((1, Hp, Wp), lambda i: (i, 0, 0))],
        out_specs=pl.BlockSpec((1, Hp, Wp), lambda i: (i, 0, 0)),
        compiler_params=pltpu.CompilerParams(
            dimension_semantics=("parallel",),
            vmem_limit_bytes=vmem_limit),
    )(x)

    out = out[:, :H, :W].reshape(B, C, H, W)
    return out.astype(in_depth.dtype)


# ---------------- pure-JAX reference (for in-script validation) ---------------

def _reference_forward(in_depth, *, max_depth=100.0, kernel_size=5, min_depth=0.1):
    B, C, H, W = in_depth.shape
    x = in_depth.reshape(B * C, H, W).astype(jnp.float32)
    w = _gaussian_weights_5()

    def window_stack(img, k, fill):
        p = k // 2
        xp = jnp.pad(img, ((p, p), (p, p)), constant_values=fill)
        return jnp.stack([xp[dy:dy + H, dx:dx + W]
                          for dy in range(k) for dx in range(k)], axis=0)

    def maxpool(img, k):
        return jnp.max(window_stack(img, k, _NEG), axis=0)

    def gauss(img):
        yp = jnp.concatenate([img[2:3], img[1:2], img,
                              img[H - 2:H - 1], img[H - 3:H - 2]], axis=0)
        y = sum(w[i] * yp[i:i + H] for i in range(5))
        zp = jnp.concatenate([y[:, 2:3], y[:, 1:2], y,
                              y[:, W - 2:W - 1], y[:, W - 3:W - 2]], axis=1)
        return sum(w[i] * zp[:, i:i + W] for i in range(5))

    def one(img):
        d = jnp.where(img > min_depth, max_depth - img, img)
        d = maxpool(d, kernel_size)
        d = -maxpool(-maxpool(d, 5), 5)
        d = jnp.where(d < min_depth, maxpool(d, 7), d)
        d = jnp.sort(window_stack(d, 5, 0.0), axis=0)[12]
        bl = gauss(d)
        d = jnp.where(d > min_depth, bl, d)
        d = jnp.where(d > min_depth, max_depth - d, d)
        return d

    return jax.vmap(one)(x).reshape(B, C, H, W)


if __name__ == "__main__":
    key = jax.random.PRNGKey(0)
    B, C, H, W = 2, 1, 36, 48
    k1, k2 = jax.random.split(key)
    dense = jax.random.uniform(k1, (B, C, H, W), jnp.float32, minval=1.0, maxval=80.0)
    valid = jax.random.uniform(k2, (B, C, H, W)) < 0.3   # sparse lidar-like depth
    in_depth = jnp.where(valid, dense, 0.0)

    out = ip_basic_forward(in_depth, max_depth=100.0, kernel_size=5, min_depth=0.1)
    out = jax.block_until_ready(out)

    assert out.shape == (B, C, H, W)
    assert bool(jnp.all(jnp.isfinite(out)))

    ref = _reference_forward(in_depth, max_depth=100.0, kernel_size=5, min_depth=0.1)
    err = float(jnp.max(jnp.abs(out.astype(jnp.float32) - ref)))
    assert err < 1e-3, f"kernel/reference mismatch: {err}"

    print("KERNEL_OK")
</pallas_src>

<mosaic_0001>
module attributes {stable_mosaic.version = 11 : i64} {
  func.func @kern(%arg0: memref<16x256xf32, #tpu.memory_space<vmem>>, %arg1: memref<16x256xf32, #tpu.memory_space<vmem>>) attributes {dimension_semantics = [], scalar_prefetch = 0 : i64, scratch_operands = 0 : i64, tpu.core_type = #tpu.core_type<tc>} {
    %c0 = arith.constant 0 : index
    %c0_0 = arith.constant 0 : index
    %0 = vector.load %arg0[%c0, %c0_0] : memref<16x256xf32, #tpu.memory_space<vmem>>, vector<16x256xf32>
    %c3_i32 = arith.constant 3 : i32
    %1 = tpu.dynamic_rotate %0 by %c3_i32 dim 0 : vector<16x256xf32>, i32 -> vector<16x256xf32>
    %c0_1 = arith.constant 0 : index
    %c0_2 = arith.constant 0 : index
    %2 = vector.load %arg1[%c0_1, %c0_2] : memref<16x256xf32, #tpu.memory_space<vmem>>, vector<16x256xf32>
    tpu.vector_store %arg1[%c0_1, %c0_2], %1 {strides = array<i32>} : memref<16x256xf32, #tpu.memory_space<vmem>>, vector<16x256xf32>,
    return
  }
}

module attributes {stable_mosaic.version = 11 : i64} {
  func.func @kern(%arg0: memref<16x256xf32, #tpu.memory_space<vmem>>, %arg1: memref<16x256xf32, #tpu.memory_space<vmem>>) attributes {dimension_semantics = [], scalar_prefetch = 0 : i64, scratch_operands = 0 : i64, tpu.core_type = #tpu.core_type<tc>} {
    %c0 = arith.constant 0 : index
    %c0_0 = arith.constant 0 : index
    %0 = vector.load %arg0[%c0, %c0_0] : memref<16x256xf32, #tpu.memory_space<vmem>>, vector<16x256xf32>
    %c3_i32 = arith.constant 3 : i32
    %1 = tpu.dynamic_rotate %0 by %c3_i32 dim 1 : vector<16x256xf32>, i32 -> vector<16x256xf32>
    %c0_1 = arith.constant 0 : index
    %c0_2 = arith.constant 0 : index
    %2 = vector.load %arg1[%c0_1, %c0_2] : memref<16x256xf32, #tpu.memory_space<vmem>>, vector<16x256xf32>
    tpu.vector_store %arg1[%c0_1, %c0_2], %1 {strides = array<i32>} : memref<16x256xf32, #tpu.memory_space<vmem>>, vector<16x256xf32>,
    return
  }
}

module attributes {stable_mosaic.version = 11 : i64} {
  func.func @_ip_basic_kernel(%arg0: i32, %arg1: memref<1x40x128xf32, #tpu.memory_space<vmem>>, %arg2: memref<1x40x128xf32, #tpu.memory_space<vmem>>) attributes {dimension_semantics = [#tpu.dimension_semantics<parallel>], iteration_bounds = array<i64: 2>, scalar_prefetch = 0 : i64, scratch_operands = 0 : i64, tpu.core_type = #tpu.core_type<tc>, window_params = [{transform_indices = @transform_0, window_bounds = array<i64: 1, 40, 128>}, {transform_indices = @transform_1, window_bounds = array<i64: 1, 40, 128>}]} {
    %c0 = arith.constant 0 : index
    %c0_0 = arith.constant 0 : index
    %c0_1 = arith.constant 0 : index
    %0 = vector.load %arg1[%c0, %c0_0, %c0_1] : memref<1x40x128xf32, #tpu.memory_space<vmem>>, vector<1x40x128xf32>
    %1 = vector.shape_cast %0 : vector<1x40x128xf32> to vector<40x128xf32>
    %2 = tpu.iota {dimensions = array<i32: 0>} : vector<40x1xi32>
    %3 = tpu.iota {dimensions = array<i32: 1>} : vector<1x128xi32>
    %c36_i32 = arith.constant 36 : i32
    %4 = vector.broadcast %c36_i32 : i32 to vector<40x1xi32>
    %5 = arith.cmpi sge, %2, %4 : vector<40x1xi32>
    %c48_i32 = arith.constant 48 : i32
    %6 = vector.broadcast %c48_i32 : i32 to vector<1x128xi32>
    %7 = arith.cmpi sge, %3, %6 : vector<1x128xi32>
    %8 = vector.broadcast %5 : vector<40x1xi1> to vector<40x128xi1>
    %9 = vector.broadcast %7 : vector<1x128xi1> to vector<40x128xi1>
    %10 = arith.ori %8, %9 : vector<40x128xi1>
    %cst = arith.constant 1.000000e-01 : f32
    %11 = vector.broadcast %cst : f32 to vector<40x128xf32>
    %12 = arith.cmpf ogt, %1, %11 : vector<40x128xf32>
    %cst_2 = arith.constant 1.000000e+02 : f32
    %13 = vector.broadcast %cst_2 : f32 to vector<40x128xf32>
    %14 = arith.subf %13, %1 : vector<40x128xf32>
    %15 = arith.select %12, %14, %1 : vector<40x128xi1>, vector<40x128xf32>
    %cst_3 = arith.constant -1.000000e+30 : f32
    %16 = vector.broadcast %cst_3 : f32 to vector<40x128xf32>
    %17 = arith.select %10, %16, %15 : vector<40x128xi1>, vector<40x128xf32>
    %cst_4 = arith.constant -1.000000e+30 : f32
    %18 = vector.broadcast %cst_4 : f32 to vector<1x128xf32>
    %19 = vector.extract_strided_slice %17 {offsets = [0, 0], sizes = [39, 128], strides = [1, 1]} : vector<40x128xf32> to vector<39x128xf32>
    %20 = tpu.concatenate %18, %19 in 0 : vector<1x128xf32>, vector<39x128xf32> -> vector<40x128xf32>
    %21 = arith.maximumf %17, %20 : vector<40x128xf32>
    %cst_5 = arith.constant -1.000000e+30 : f32
    %22 = vector.broadcast %cst_5 : f32 to vector<2x128xf32>
    %23 = vector.extract_strided_slice %21 {offsets = [0, 0], sizes = [38, 128], strides = [1, 1]} : vector<40x128xf32> to vector<38x128xf32>
    %24 = tpu.concatenate %22, %23 in 0 : vector<2x128xf32>, vector<38x128xf32> -> vector<40x128xf32>
    %25 = arith.maximumf %21, %24 : vector<40x128xf32>
    %cst_6 = arith.constant -1.000000e+30 : f32
    %26 = vector.broadcast %cst_6 : f32 to vector<4x128xf32>
    %27 = vector.extract_strided_slice %25 {offsets = [0, 0], sizes = [36, 128], strides = [1, 1]} : vector<40x128xf32> to vector<36x128xf32>
    %28 = tpu.concatenate %26, %27 in 0 : vector<4x128xf32>, vector<36x128xf32> -> vector<40x128xf32>
    %29 = arith.maximumf %25, %28 : vector<40x128xf32>
    %cst_7 = arith.constant -1.000000e+30 : f32
    %30 = vector.broadcast %cst_7 : f32 to vector<1x128xf32>
    %31 = vector.extract_strided_slice %29 {offsets = [0, 0], sizes = [39, 128], strides = [1, 1]} : vector<40x128xf32> to vector<39x128xf32>
    %32 = tpu.concatenate %30, %31 in 0 : vector<1x128xf32>, vector<39x128xf32> -> vector<40x128xf32>
    %33 = arith.maximumf %29, %32 : vector<40x128xf32>
    %cst_8 = arith.constant -1.000000e+30 : f32
    %34 = vector.broadcast %cst_8 : f32 to vector<4x128xf32>
    %35 = vector.extract_strided_slice %33 {offsets = [4, 0], sizes = [36, 128], strides = [1, 1]} : vector<40x128xf32> to vector<36x128xf32>
    %36 = tpu.concatenate %35, %34 in 0 : vector<36x128xf32>, vector<4x128xf32> -> vector<40x128xf32>
    %cst_9 = arith.constant -1.000000e+30 : f32
    %37 = vector.broadcast %cst_9 : f32 to vector<40x1xf32>
    %38 = vector.extract_strided_slice %36 {offsets = [0, 0], sizes = [40, 127], strides = [1, 1]} : vector<40x128xf32> to vector<40x127xf32>
    %39 = tpu.concatenate %37, %38 in 1 : vector<40x1xf32>, vector<40x127xf32> -> vector<40x128xf32>
    %40 = arith.maximumf %36, %39 : vector<40x128xf32>
    %cst_10 = arith.constant -1.000000e+30 : f32
    %41 = vector.broadcast %cst_10 : f32 to vector<40x2xf32>
    %42 = vector.extract_strided_slice %40 {offsets = [0, 0], sizes = [40, 126], strides = [1, 1]} : vector<40x128xf32> to vector<40x126xf32>
    %43 = tpu.concatenate %41, %42 in 1 : vector<40x2xf32>, vector<40x126xf32> -> vector<40x128xf32>
    %44 = arith.maximumf %40, %43 : vector<40x128xf32>
    %cst_11 = arith.constant -1.000000e+30 : f32
    %45 = vector.broadcast %cst_11 : f32 to vector<40x4xf32>
    %46 = vector.extract_strided_slice %44 {offsets = [0, 0], sizes = [40, 124], strides = [1, 1]} : vector<40x128xf32> to vector<40x124xf32>
    %47 = tpu.concatenate %45, %46 in 1 : vector<40x4xf32>, vector<40x124xf32> -> vector<40x128xf32>
    %48 = arith.maximumf %44, %47 : vector<40x128xf32>
    %cst_12 = arith.constant -1.000000e+30 : f32
    %49 = vector.broadcast %cst_12 : f32 to vector<40x1xf32>
    %50 = vector.extract_strided_slice %48 {offsets = [0, 0], sizes = [40, 127], strides = [1, 1]} : vector<40x128xf32> to vector<40x127xf32>
    %51 = tpu.concatenate %49, %50 in 1 : vector<40x1xf32>, vector<40x127xf32> -> vector<40x128xf32>
    %52 = arith.maximumf %48, %51 : vector<40x128xf32>
    %cst_13 = arith.constant -1.000000e+30 : f32
    %53 = vector.broadcast %cst_13 : f32 to vector<40x4xf32>
    %54 = vector.extract_strided_slice %52 {offsets = [0, 4], sizes = [40, 124], strides = [1, 1]} : vector<40x128xf32> to vector<40x124xf32>
    %55 = tpu.concatenate %54, %53 in 1 : vector<40x124xf32>, vector<40x4xf32> -> vector<40x128xf32>
    %cst_14 = arith.constant 1.000000e+30 : f32
    %56 = vector.broadcast %cst_14 : f32 to vector<40x128xf32>
    %57 = arith.select %10, %56, %55 : vector<40x128xi1>, vector<40x128xf32>
    %cst_15 = arith.constant 1.000000e+30 : f32
    %58 = vector.broadcast %cst_15 : f32 to vector<1x128xf32>
    %59 = vector.extract_strided_slice %57 {offsets = [0, 0], sizes = [39, 128], strides = [1, 1]} : vector<40x128xf32> to vector<39x128xf32>
    %60 = tpu.concatenate %58, %59 in 0 : vector<1x128xf32>, vector<39x128xf32> -> vector<40x128xf32>
    %61 = arith.minimumf %57, %60 : vector<40x128xf32>
    %cst_16 = arith.constant 1.000000e+30 : f32
    %62 = vector.broadcast %cst_16 : f32 to vector<2x128xf32>
    %63 = vector.extract_strided_slice %61 {offsets = [0, 0], sizes = [38, 128], strides = [1, 1]} : vector<40x128xf32> to vector<38x128xf32>
    %64 = tpu.concatenate %62, %63 in 0 : vector<2x128xf32>, vector<38x128xf32> -> vector<40x128xf32>
    %65 = arith.minimumf %61, %64 : vector<40x128xf32>
    %cst_17 = arith.constant 1.000000e+30 : f32
    %66 = vector.broadcast %cst_17 : f32 to vector<1x128xf32>
    %67 = vector.extract_strided_slice %65 {offsets = [0, 0], sizes = [39, 128], strides = [1, 1]} : vector<40x128xf32> to vector<39x128xf32>
    %68 = tpu.concatenate %66, %67 in 0 : vector<1x128xf32>, vector<39x128xf32> -> vector<40x128xf32>
    %69 = arith.minimumf %65, %68 : vector<40x128xf32>
    %cst_18 = arith.constant 1.000000e+30 : f32
    %70 = vector.broadcast %cst_18 : f32 to vector<2x128xf32>
    %71 = vector.extract_strided_slice %69 {offsets = [2, 0], sizes = [38, 128], strides = [1, 1]} : vector<40x128xf32> to vector<38x128xf32>
    %72 = tpu.concatenate %71, %70 in 0 : vector<38x128xf32>, vector<2x128xf32> -> vector<40x128xf32>
    %cst_19 = arith.constant 1.000000e+30 : f32
    %73 = vector.broadcast %cst_19 : f32 to vector<40x1xf32>
    %74 = vector.extract_strided_slice %72 {offsets = [0, 0], sizes = [40, 127], strides = [1, 1]} : vector<40x128xf32> to vector<40x127xf32>
    %75 = tpu.concatenate %73, %74 in 1 : vector<40x1xf32>, vector<40x127xf32> -> vector<40x128xf32>
    %76 = arith.minimumf %72, %75 : vector<40x128xf32>
    %cst_20 = arith.constant 1.000000e+30 : f32
    %77 = vector.broadcast %cst_20 : f32 to vector<40x2xf32>
    %78 = vector.extract_strided_slice %76 {offsets = [0, 0], sizes = [40, 126], strides = [1, 1]} : vector<40x128xf32> to vector<40x126xf32>
    %79 = tpu.concatenate %77, %78 in 1 : vector<40x2xf32>, vector<40x126xf32> -> vector<40x128xf32>
    %80 = arith.minimumf %76, %79 : vector<40x128xf32>
    %cst_21 = arith.constant 1.000000e+30 : f32
    %81 = vector.broadcast %cst_21 : f32 to vector<40x1xf32>
    %82 = vector.extract_strided_slice %80 {offsets = [0, 0], sizes = [40, 127], strides = [1, 1]} : vector<40x128xf32> to vector<40x127xf32>
    %83 = tpu.concatenate %81, %82 in 1 : vector<40x1xf32>, vector<40x127xf32> -> vector<40x128xf32>
    %84 = arith.minimumf %80, %83 : vector<40x128xf32>
    %cst_22 = arith.constant 1.000000e+30 : f32
    %85 = vector.broadcast %cst_22 : f32 to vector<40x2xf32>
    %86 = vector.extract_strided_slice %84 {offsets = [0, 2], sizes = [40, 126], strides = [1, 1]} : vector<40x128xf32> to vector<40x126xf32>
    %87 = tpu.concatenate %86, %85 in 1 : vector<40x126xf32>, vector<40x2xf32> -> vector<40x128xf32>
    %cst_23 = arith.constant 1.000000e-01 : f32
    %88 = vector.broadcast %cst_23 : f32 to vector<40x128xf32>
    %89 = arith.cmpf olt, %87, %88 : vector<40x128xf32>
    %cst_24 = arith.constant -1.000000e+30 : f32
    %90 = vector.broadcast %cst_24 : f32 to vector<40x128xf32>
    %91 = arith.select %10, %90, %87 : vector<40x128xi1>, vector<40x128xf32>
    %cst_25 = arith.constant -1.000000e+30 : f32
    %92 = vector.broadcast %cst_25 : f32 to vector<1x128xf32>
    %93 = vector.extract_strided_slice %91 {offsets = [0, 0], sizes = [39, 128], strides = [1, 1]} : vector<40x128xf32> to vector<39x128xf32>
    %94 = tpu.concatenate %92, %93 in 0 : vector<1x128xf32>, vector<39x128xf32> -> vector<40x128xf32>
    %95 = arith.maximumf %91, %94 : vector<40x128xf32>
    %cst_26 = arith.constant -1.000000e+30 : f32
    %96 = vector.broadcast %cst_26 : f32 to vector<2x128xf32>
    %97 = vector.extract_strided_slice %95 {offsets = [0, 0], sizes = [38, 128], strides = [1, 1]} : vector<40x128xf32> to vector<38x128xf32>
    %98 = tpu.concatenate %96, %97 in 0 : vector<2x128xf32>, vector<38x128xf32> -> vector<40x128xf32>
    %99 = arith.maximumf %95, %98 : vector<40x128xf32>
    %cst_27 = arith.constant -1.000000e+30 : f32
    %100 = vector.broadcast %cst_27 : f32 to vector<3x128xf32>
    %101 = vector.extract_strided_slice %99 {offsets = [0, 0], sizes = [37, 128], strides = [1, 1]} : vector<40x128xf32> to vector<37x128xf32>
    %102 = tpu.concatenate %100, %101 in 0 : vector<3x128xf32>, vector<37x128xf32> -> vector<40x128xf32>
    %103 = arith.maximumf %99, %102 : vector<40x128xf32>
    %cst_28 = arith.constant -1.000000e+30 : f32
    %104 = vector.broadcast %cst_28 : f32 to vector<3x128xf32>
    %105 = vector.extract_strided_slice %103 {offsets = [3, 0], sizes = [37, 128], strides = [1, 1]} : vector<40x128xf32> to vector<37x128xf32>
    %106 = tpu.concatenate %105, %104 in 0 : vector<37x128xf32>, vector<3x128xf32> -> vector<40x128xf32>
    %cst_29 = arith.constant -1.000000e+30 : f32
    %107 = vector.broadcast %cst_29 : f32 to vector<40x1xf32>
    %108 = vector.extract_strided_slice %106 {offsets = [0, 0], sizes = [40, 127], strides = [1, 1]} : vector<40x128xf32> to vector<40x127xf32>
    %109 = tpu.concatenate %107, %108 in 1 : vector<40x1xf32>, vector<40x127xf32> -> vector<40x128xf32>
    %110 = arith.maximumf %106, %109 : vector<40x128xf32>
    %cst_30 = arith.constant -1.000000e+30 : f32
    %111 = vector.broadcast %cst_30 : f32 to vector<40x2xf32>
    %112 = vector.extract_strided_slice %110 {offsets = [0, 0], sizes = [40, 126], strides = [1, 1]} : vector<40x128xf32> to vector<40x126xf32>
    %113 = tpu.concatenate %111, %112 in 1 : vector<40x2xf32>, vector<40x126xf32> -> vector<40x128xf32>
    %114 = arith.maximumf %110, %113 : vector<40x128xf32>
    %cst_31 = arith.constant -1.000000e+30 : f32
    %115 = vector.broadcast %cst_31 : f32 to vector<40x3xf32>
    %116 = vector.extract_strided_slice %114 {offsets = [0, 0], sizes = [40, 125], strides = [1, 1]} : vector<40x128xf32> to vector<40x125xf32>
    %117 = tpu.concatenate %115, %116 in 1 : vector<40x3xf32>, vector<40x125xf32> -> vector<40x128xf32>
    %118 = arith.maximumf %114, %117 : vector<40x128xf32>
    %cst_32 = arith.constant -1.000000e+30 : f32
    %119 = vector.broadcast %cst_32 : f32 to vector<40x3xf32>
    %120 = vector.extract_strided_slice %118 {offsets = [0, 3], sizes = [40, 125], strides = [1, 1]} : vector<40x128xf32> to vector<40x125xf32>
    %121 = tpu.concatenate %120, %119 in 1 : vector<40x125xf32>, vector<40x3xf32> -> vector<40x128xf32>
    %122 = arith.select %89, %121, %87 : vector<40x128xi1>, vector<40x128xf32>
    %cst_33 = arith.constant 0.000000e+00 : f32
    %123 = vector.broadcast %cst_33 : f32 to vector<40x128xf32>
    %124 = arith.select %10, %123, %122 : vector<40x128xi1>, vector<40x128xf32>
    %cst_34 = arith.constant 0.000000e+00 : f32
    %125 = vector.broadcast %cst_34 : f32 to vector<2x128xf32>
    %126 = vector.extract_strided_slice %124 {offsets = [0, 0], sizes = [38, 128], strides = [1, 1]} : vector<40x128xf32> to vector<38x128xf32>
    %127 = tpu.concatenate %125, %126 in 0 : vector<2x128xf32>, vector<38x128xf32> -> vector<40x128xf32>
    %cst_35 = arith.constant 0.000000e+00 : f32
    %128 = vector.broadcast %cst_35 : f32 to vector<1x128xf32>
    %129 = vector.extract_strided_slice %124 {offsets = [0, 0], sizes = [39, 128], strides = [1, 1]} : vector<40x128xf32> to vector<39x128xf32>
    %130 = tpu.concatenate %128, %129 in 0 : vector<1x128xf32>, vector<39x128xf32> -> vector<40x128xf32>
    %cst_36 = arith.constant 0.000000e+00 : f32
    %131 = vector.broadcast %cst_36 : f32 to vector<1x128xf32>
    %132 = vector.extract_strided_slice %124 {offsets = [1, 0], sizes = [39, 128], strides = [1, 1]} : vector<40x128xf32> to vector<39x128xf32>
    %133 = tpu.concatenate %132, %131 in 0 : vector<39x128xf32>, vector<1x128xf32> -> vector<40x128xf32>
    %cst_37 = arith.constant 0.000000e+00 : f32
    %134 = vector.broadcast %cst_37 : f32 to vector<2x128xf32>
    %135 = vector.extract_strided_slice %124 {offsets = [2, 0], sizes = [38, 128], strides = [1, 1]} : vector<40x128xf32> to vector<38x128xf32>
    %136 = tpu.concatenate %135, %134 in 0 : vector<38x128xf32>, vector<2x128xf32> -> vector<40x128xf32>
    %137 = arith.minimumf %127, %130 : vector<40x128xf32>
    %138 = arith.maximumf %127, %130 : vector<40x128xf32>
    %139 = arith.minimumf %138, %124 : vector<40x128xf32>
    %140 = arith.maximumf %138, %124 : vector<40x128xf32>
    %141 = arith.minimumf %140, %133 : vector<40x128xf32>
    %142 = arith.maximumf %140, %133 : vector<40x128xf32>
    %143 = arith.minimumf %142, %136 : vector<40x128xf32>
    %144 = arith.maximumf %142, %136 : vector<40x128xf32>
    %145 = arith.minimumf %137, %139 : vector<40x128xf32>
    %146 = arith.maximumf %137, %139 : vector<40x128xf32>
    %147 = arith.minimumf %146, %141 : vector<40x128xf32>
    %148 = arith.maximumf %146, %141 : vector<40x128xf32>
    %149 = arith.minimumf %148, %143 : vector<40x128xf32>
    %150 = arith.maximumf %148, %143 : vector<40x128xf32>
    %151 = arith.minimumf %145, %147 : vector<40x128xf32>
    %152 = arith.maximumf %145, %147 : vector<40x128xf32>
    %153 = arith.minimumf %152, %149 : vector<40x128xf32>
    %154 = arith.maximumf %152, %149 : vector<40x128xf32>
    %155 = arith.minimumf %151, %153 : vector<40x128xf32>
    %156 = arith.maximumf %151, %153 : vector<40x128xf32>
    %cst_38 = arith.constant 0.000000e+00 : f32
    %157 = vector.broadcast %cst_38 : f32 to vector<40x2xf32>
    %158 = vector.extract_strided_slice %155 {offsets = [0, 0], sizes = [40, 126], strides = [1, 1]} : vector<40x128xf32> to vector<40x126xf32>
    %159 = tpu.concatenate %157, %158 in 1 : vector<40x2xf32>, vector<40x126xf32> -> vector<40x128xf32>
    %cst_39 = arith.constant 0.000000e+00 : f32
    %160 = vector.broadcast %cst_39 : f32 to vector<40x1xf32>
    %161 = vector.extract_strided_slice %155 {offsets = [0, 0], sizes = [40, 127], strides = [1, 1]} : vector<40x128xf32> to vector<40x127xf32>
    %162 = tpu.concatenate %160, %161 in 1 : vector<40x1xf32>, vector<40x127xf32> -> vector<40x128xf32>
    %cst_40 = arith.constant 0.000000e+00 : f32
    %163 = vector.broadcast %cst_40 : f32 to vector<40x1xf32>
    %164 = vector.extract_strided_slice %155 {offsets = [0, 1], sizes = [40, 127], strides = [1, 1]} : vector<40x128xf32> to vector<40x127xf32>
    %165 = tpu.concatenate %164, %163 in 1 : vector<40x127xf32>, vector<40x1xf32> -> vector<40x128xf32>
    %cst_41 = arith.constant 0.000000e+00 : f32
    %166 = vector.broadcast %cst_41 : f32 to vector<40x2xf32>
    %167 = vector.extract_strided_slice %155 {offsets = [0, 2], sizes = [40, 126], strides = [1, 1]} : vector<40x128xf32> to vector<40x126xf32>
    %168 = tpu.concatenate %167, %166 in 1 : vector<40x126xf32>, vector<40x2xf32> -> vector<40x128xf32>
    %169 = arith.minimumf %159, %162 : vector<40x128xf32>
    %170 = arith.maximumf %159, %162 : vector<40x128xf32>
    %171 = arith.minimumf %170, %155 : vector<40x128xf32>
    %172 = arith.maximumf %170, %155 : vector<40x128xf32>
    %173 = arith.minimumf %172, %165 : vector<40x128xf32>
    %174 = arith.maximumf %172, %165 : vector<40x128xf32>
    %175 = arith.minimumf %174, %168 : vector<40x128xf32>
    %176 = arith.maximumf %174, %168 : vector<40x128xf32>
    %177 = arith.maximumf %169, %171 : vector<40x128xf32>
    %178 = arith.maximumf %177, %173 : vector<40x128xf32>
    %179 = arith.maximumf %178, %175 : vector<40x128xf32>
    %cst_42 = arith.constant 0.000000e+00 : f32
    %180 = vector.broadcast %cst_42 : f32 to vector<40x2xf32>
    %181 = vector.extract_strided_slice %156 {offsets = [0, 0], sizes = [40, 126], strides = [1, 1]} : vector<40x128xf32> to vector<40x126xf32>
    %182 = tpu.concatenate %180, %181 in 1 : vector<40x2xf32>, vector<40x126xf32> -> vector<40x128xf32>
    %cst_43 = arith.constant 0.000000e+00 : f32
    %183 = vector.broadcast %cst_43 : f32 to vector<40x1xf32>
    %184 = vector.extract_strided_slice %156 {offsets = [0, 0], sizes = [40, 127], strides = [1, 1]} : vector<40x128xf32> to vector<40x127xf32>
    %185 = tpu.concatenate %183, %184 in 1 : vector<40x1xf32>, vector<40x127xf32> -> vector<40x128xf32>
    %cst_44 = arith.constant 0.000000e+00 : f32
    %186 = vector.broadcast %cst_44 : f32 to vector<40x1xf32>
    %187 = vector.extract_strided_slice %156 {offsets = [0, 1], sizes = [40, 127], strides = [1, 1]} : vector<40x128xf32> to vector<40x127xf32>
    %188 = tpu.concatenate %187, %186 in 1 : vector<40x127xf32>, vector<40x1xf32> -> vector<40x128xf32>
    %cst_45 = arith.constant 0.000000e+00 : f32
    %189 = vector.broadcast %cst_45 : f32 to vector<40x2xf32>
    %190 = vector.extract_strided_slice %156 {offsets = [0, 2], sizes = [40, 126], strides = [1, 1]} : vector<40x128xf32> to vector<40x126xf32>
    %191 = tpu.concatenate %190, %189 in 1 : vector<40x126xf32>, vector<40x2xf32> -> vector<40x128xf32>
    %192 = arith.minimumf %188, %191 : vector<40x128xf32>
    %193 = arith.maximumf %188, %191 : vector<40x128xf32>
    %194 = arith.minimumf %156, %192 : vector<40x128xf32>
    %195 = arith.maximumf %156, %192 : vector<40x128xf32>
    %196 = arith.minimumf %185, %194 : vector<40x128xf32>
    %197 = arith.maximumf %185, %194 : vector<40x128xf32>
    %198 = arith.maximumf %182, %196 : vector<40x128xf32>
    %199 = arith.minimumf %195, %193 : vector<40x128xf32>
    %200 = arith.maximumf %195, %193 : vector<40x128xf32>
    %201 = arith.minimumf %197, %199 : vector<40x128xf32>
    %202 = arith.maximumf %197, %199 : vector<40x128xf32>
    %203 = arith.maximumf %198, %201 : vector<40x128xf32>
    %cst_46 = arith.constant 0.000000e+00 : f32
    %204 = vector.broadcast %cst_46 : f32 to vector<40x2xf32>
    %205 = vector.extract_strided_slice %154 {offsets = [0, 0], sizes = [40, 126], strides = [1, 1]} : vector<40x128xf32> to vector<40x126xf32>
    %206 = tpu.concatenate %204, %205 in 1 : vector<40x2xf32>, vector<40x126xf32> -> vector<40x128xf32>
    %cst_47 = arith.constant 0.000000e+00 : f32
    %207 = vector.broadcast %cst_47 : f32 to vector<40x1xf32>
    %208 = vector.extract_strided_slice %154 {offsets = [0, 0], sizes = [40, 127], strides = [1, 1]} : vector<40x128xf32> to vector<40x127xf32>
    %209 = tpu.concatenate %207, %208 in 1 : vector<40x1xf32>, vector<40x127xf32> -> vector<40x128xf32>
    %cst_48 = arith.constant 0.000000e+00 : f32
    %210 = vector.broadcast %cst_48 : f32 to vector<40x1xf32>
    %211 = vector.extract_strided_slice %154 {offsets = [0, 1], sizes = [40, 127], strides = [1, 1]} : vector<40x128xf32> to vector<40x127xf32>
    %212 = tpu.concatenate %211, %210 in 1 : vector<40x127xf32>, vector<40x1xf32> -> vector<40x128xf32>
    %cst_49 = arith.constant 0.000000e+00 : f32
    %213 = vector.broadcast %cst_49 : f32 to vector<40x2xf32>
    %214 = vector.extract_strided_slice %154 {offsets = [0, 2], sizes = [40, 126], strides = [1, 1]} : vector<40x128xf32> to vector<40x126xf32>
    %215 = tpu.concatenate %214, %213 in 1 : vector<40x126xf32>, vector<40x2xf32> -> vector<40x128xf32>
    %216 = arith.minimumf %206, %209 : vector<40x128xf32>
    %217 = arith.maximumf %206, %209 : vector<40x128xf32>
    %218 = arith.minimumf %154, %212 : vector<40x128xf32>
    %219 = arith.maximumf %154, %212 : vector<40x128xf32>
    %220 = arith.minimumf %216, %218 : vector<40x128xf32>
    %221 = arith.maximumf %216, %218 : vector<40x128xf32>
    %222 = arith.maximumf %220, %215 : vector<40x128xf32>
    %223 = arith.minimumf %217, %219 : vector<40x128xf32>
    %224 = arith.maximumf %217, %219 : vector<40x128xf32>
    %225 = arith.minimumf %224, %222 : vector<40x128xf32>
    %226 = arith.minimumf %179, %176 : vector<40x128xf32>
    %227 = arith.maximumf %179, %176 : vector<40x128xf32>
    %228 = arith.minimumf %203, %202 : vector<40x128xf32>
    %229 = arith.maximumf %203, %202 : vector<40x128xf32>
    %230 = arith.minimumf %200, %223 : vector<40x128xf32>
    %231 = arith.maximumf %200, %223 : vector<40x128xf32>
    %232 = arith.minimumf %221, %225 : vector<40x128xf32>
    %233 = arith.maximumf %221, %225 : vector<40x128xf32>
    %234 = arith.minimumf %226, %228 : vector<40x128xf32>
    %235 = arith.maximumf %226, %228 : vector<40x128xf32>
    %236 = arith.minimumf %234, %230 : vector<40x128xf32>
    %237 = arith.maximumf %234, %230 : vector<40x128xf32>
    %238 = arith.maximumf %236, %232 : vector<40x128xf32>
    %239 = arith.minimumf %227, %229 : vector<40x128xf32>
    %240 = arith.maximumf %227, %229 : vector<40x128xf32>
    %241 = arith.minimumf %240, %231 : vector<40x128xf32>
    %242 = arith.maximumf %240, %231 : vector<40x128xf32>
    %243 = arith.minimumf %242, %233 : vector<40x128xf32>
    %cst_50 = arith.constant 0.000000e+00 : f32
    %244 = vector.broadcast %cst_50 : f32 to vector<40x2xf32>
    %245 = vector.extract_strided_slice %150 {offsets = [0, 0], sizes = [40, 126], strides = [1, 1]} : vector<40x128xf32> to vector<40x126xf32>
    %246 = tpu.concatenate %244, %245 in 1 : vector<40x2xf32>, vector<40x126xf32> -> vector<40x128xf32>
    %cst_51 = arith.constant 0.000000e+00 : f32
    %247 = vector.broadcast %cst_51 : f32 to vector<40x1xf32>
    %248 = vector.extract_strided_slice %150 {offsets = [0, 0], sizes = [40, 127], strides = [1, 1]} : vector<40x128xf32> to vector<40x127xf32>
    %249 = tpu.concatenate %247, %248 in 1 : vector<40x1xf32>, vector<40x127xf32> -> vector<40x128xf32>
    %cst_52 = arith.constant 0.000000e+00 : f32
    %250 = vector.broadcast %cst_52 : f32 to vector<40x1xf32>
    %251 = vector.extract_strided_slice %150 {offsets = [0, 1], sizes = [40, 127], strides = [1, 1]} : vector<40x128xf32> to vector<40x127xf32>
    %252 = tpu.concatenate %251, %250 in 1 : vector<40x127xf32>, vector<40x1xf32> -> vector<40x128xf32>
    %cst_53 = arith.constant 0.000000e+00 : f32
    %253 = vector.broadcast %cst_53 : f32 to vector<40x2xf32>
    %254 = vector.extract_strided_slice %150 {offsets = [0, 2], sizes = [40, 126], strides = [1, 1]} : vector<40x128xf32> to vector<40x126xf32>
    %255 = tpu.concatenate %254, %253 in 1 : vector<40x126xf32>, vector<40x2xf32> -> vector<40x128xf32>
    %256 = arith.minimumf %246, %249 : vector<40x128xf32>
    %257 = arith.maximumf %246, %249 : vector<40x128xf32>
    %258 = arith.minimumf %257, %150 : vector<40x128xf32>
    %259 = arith.maximumf %257, %150 : vector<40x128xf32>
    %260 = arith.minimumf %259, %252 : vector<40x128xf32>
    %261 = arith.maximumf %259, %252 : vector<40x128xf32>
    %262 = arith.minimumf %261, %255 : vector<40x128xf32>
    %263 = arith.minimumf %256, %258 : vector<40x128xf32>
    %264 = arith.maximumf %256, %258 : vector<40x128xf32>
    %265 = arith.minimumf %264, %260 : vector<40x128xf32>
    %266 = arith.maximumf %264, %260 : vector<40x128xf32>
    %267 = arith.minimumf %266, %262 : vector<40x128xf32>
    %268 = arith.minimumf %239, %235 : vector<40x128xf32>
    %269 = arith.maximumf %239, %235 : vector<40x128xf32>
    %270 = arith.minimumf %241, %237 : vector<40x128xf32>
    %271 = arith.maximumf %241, %237 : vector<40x128xf32>
    %272 = arith.minimumf %243, %238 : vector<40x128xf32>
    %273 = arith.maximumf %243, %238 : vector<40x128xf32>
    %274 = arith.minimumf %268, %270 : vector<40x128xf32>
    %275 = arith.maximumf %268, %270 : vector<40x128xf32>
    %276 = arith.minimumf %274, %272 : vector<40x128xf32>
    %277 = arith.maximumf %274, %272 : vector<40x128xf32>
    %278 = arith.maximumf %276, %263 : vector<40x128xf32>
    %279 = arith.minimumf %269, %271 : vector<40x128xf32>
    %280 = arith.maximumf %269, %271 : vector<40x128xf32>
    %281 = arith.minimumf %280, %273 : vector<40x128xf32>
    %282 = arith.maximumf %280, %273 : vector<40x128xf32>
    %283 = arith.minimumf %282, %278 : vector<40x128xf32>
    %284 = arith.minimumf %279, %275 : vector<40x128xf32>
    %285 = arith.maximumf %279, %275 : vector<40x128xf32>
    %286 = arith.minimumf %281, %277 : vector<40x128xf32>
    %287 = arith.maximumf %281, %277 : vector<40x128xf32>
    %288 = arith.minimumf %283, %265 : vector<40x128xf32>
    %289 = arith.maximumf %283, %265 : vector<40x128xf32>
    %290 = arith.minimumf %284, %286 : vector<40x128xf32>
    %291 = arith.maximumf %284, %286 : vector<40x128xf32>
    %292 = arith.maximumf %290, %288 : vector<40x128xf32>
    %293 = arith.minimumf %285, %287 : vector<40x128xf32>
    %294 = arith.maximumf %285, %287 : vector<40x128xf32>
    %295 = arith.minimumf %294, %289 : vector<40x128xf32>
    %296 = arith.minimumf %293, %291 : vector<40x128xf32>
    %297 = arith.maximumf %293, %291 : vector<40x128xf32>
    %298 = arith.minimumf %295, %292 : vector<40x128xf32>
    %299 = arith.maximumf %295, %292 : vector<40x128xf32>
    %300 = arith.minimumf %296, %298 : vector<40x128xf32>
    %301 = arith.maximumf %296, %298 : vector<40x128xf32>
    %302 = arith.maximumf %300, %267 : vector<40x128xf32>
    %303 = arith.minimumf %297, %299 : vector<40x128xf32>
    %304 = arith.maximumf %297, %299 : vector<40x128xf32>
    %305 = arith.minimumf %304, %302 : vector<40x128xf32>
    %cst_54 = arith.constant 0.000000e+00 : f32
    %306 = vector.broadcast %cst_54 : f32 to vector<40x2xf32>
    %307 = vector.extract_strided_slice %144 {offsets = [0, 0], sizes = [40, 126], strides = [1, 1]} : vector<40x128xf32> to vector<40x126xf32>
    %308 = tpu.concatenate %306, %307 in 1 : vector<40x2xf32>, vector<40x126xf32> -> vector<40x128xf32>
    %cst_55 = arith.constant 0.000000e+00 : f32
    %309 = vector.broadcast %cst_55 : f32 to vector<40x1xf32>
    %310 = vector.extract_strided_slice %144 {offsets = [0, 0], sizes = [40, 127], strides = [1, 1]} : vector<40x128xf32> to vector<40x127xf32>
    %311 = tpu.concatenate %309, %310 in 1 : vector<40x1xf32>, vector<40x127xf32> -> vector<40x128xf32>
    %cst_56 = arith.constant 0.000000e+00 : f32
    %312 = vector.broadcast %cst_56 : f32 to vector<40x1xf32>
    %313 = vector.extract_strided_slice %144 {offsets = [0, 1], sizes = [40, 127], strides = [1, 1]} : vector<40x128xf32> to vector<40x127xf32>
    %314 = tpu.concatenate %313, %312 in 1 : vector<40x127xf32>, vector<40x1xf32> -> vector<40x128xf32>
    %cst_57 = arith.constant 0.000000e+00 : f32
    %315 = vector.broadcast %cst_57 : f32 to vector<40x2xf32>
    %316 = vector.extract_strided_slice %144 {offsets = [0, 2], sizes = [40, 126], strides = [1, 1]} : vector<40x128xf32> to vector<40x126xf32>
    %317 = tpu.concatenate %316, %315 in 1 : vector<40x126xf32>, vector<40x2xf32> -> vector<40x128xf32>
    %318 = arith.minimumf %314, %317 : vector<40x128xf32>
    %319 = arith.maximumf %314, %317 : vector<40x128xf32>
    %320 = arith.minimumf %144, %318 : vector<40x128xf32>
    %321 = arith.maximumf %144, %318 : vector<40x128xf32>
    %322 = arith.minimumf %311, %320 : vector<40x128xf32>
    %323 = arith.maximumf %311, %320 : vector<40x128xf32>
    %324 = arith.minimumf %308, %322 : vector<40x128xf32>
    %325 = arith.maximumf %308, %322 : vector<40x128xf32>
    %326 = arith.minimumf %321, %319 : vector<40x128xf32>
    %327 = arith.minimumf %323, %326 : vector<40x128xf32>
    %328 = arith.minimumf %325, %327 : vector<40x128xf32>
    %329 = arith.minimumf %303, %301 : vector<40x128xf32>
    %330 = arith.maximumf %303, %301 : vector<40x128xf32>
    %331 = arith.minimumf %305, %324 : vector<40x128xf32>
    %332 = arith.maximumf %305, %324 : vector<40x128xf32>
    %333 = arith.maximumf %329, %331 : vector<40x128xf32>
    %334 = arith.minimumf %330, %332 : vector<40x128xf32>
    %335 = arith.minimumf %334, %333 : vector<40x128xf32>
    %336 = arith.maximumf %334, %333 : vector<40x128xf32>
    %337 = arith.minimumf %336, %328 : vector<40x128xf32>
    %338 = arith.maximumf %335, %337 : vector<40x128xf32>
    %cst_58 = arith.constant 0.000000e+00 : f32
    %339 = vector.broadcast %cst_58 : f32 to vector<40x128xf32>
    %340 = arith.select %10, %339, %338 : vector<40x128xi1>, vector<40x128xf32>
    %c35_i32 = arith.constant 35 : i32
    %341 = vector.broadcast %c35_i32 : i32 to vector<40x1xi32>
    %342 = arith.cmpi eq, %2, %341 : vector<40x1xi32>
    %cst_59 = arith.constant 0.0707663745 : f32
    %cst_60 = arith.constant 0.000000e+00 : f32
    %343 = vector.broadcast %cst_59 : f32 to vector<40x1xf32>
    %344 = vector.broadcast %cst_60 : f32 to vector<40x1xf32>
    %345 = arith.select %342, %343, %344 : vector<40x1xi1>, vector<40x1xf32>
    %cst_61 = arith.constant 0.0707663745 : f32
    %346 = vector.broadcast %cst_61 : f32 to vector<40x1xf32>
    %347 = arith.addf %346, %345 : vector<40x1xf32>
    %c35_i32_62 = arith.constant 35 : i32
    %348 = vector.broadcast %c35_i32_62 : i32 to vector<40x1xi32>
    %349 = arith.cmpi eq, %2, %348 : vector<40x1xi32>
    %cst_63 = arith.constant 0.244460404 : f32
    %cst_64 = arith.constant 0.000000e+00 : f32
    %350 = vector.broadcast %cst_63 : f32 to vector<40x1xf32>
    %351 = vector.broadcast %cst_64 : f32 to vector<40x1xf32>
    %352 = arith.select %349, %350, %351 : vector<40x1xi1>, vector<40x1xf32>
    %cst_65 = arith.constant 0.244460404 : f32
    %353 = vector.broadcast %cst_65 : f32 to vector<40x1xf32>
    %354 = arith.addf %353, %352 : vector<40x1xf32>
    %c1_i32 = arith.constant 1 : i32
    %355 = vector.broadcast %c1_i32 : i32 to vector<40x1xi32>
    %356 = arith.cmpi eq, %2, %355 : vector<40x1xi32>
    %cst_66 = arith.constant 0.0707663745 : f32
    %cst_67 = arith.constant 0.000000e+00 : f32
    %357 = vector.broadcast %cst_66 : f32 to vector<40x1xf32>
    %358 = vector.broadcast %cst_67 : f32 to vector<40x1xf32>
    %359 = arith.select %356, %357, %358 : vector<40x1xi1>, vector<40x1xf32>
    %cst_68 = arith.constant 0.369546473 : f32
    %360 = vector.broadcast %cst_68 : f32 to vector<40x1xf32>
    %361 = arith.addf %360, %359 : vector<40x1xf32>
    %c34_i32 = arith.constant 34 : i32
    %362 = vector.broadcast %c34_i32 : i32 to vector<40x1xi32>
    %363 = arith.cmpi eq, %2, %362 : vector<40x1xi32>
    %cst_69 = arith.constant 0.0707663745 : f32
    %cst_70 = arith.constant 0.000000e+00 : f32
    %364 = vector.broadcast %cst_69 : f32 to vector<40x1xf32>
    %365 = vector.broadcast %cst_70 : f32 to vector<40x1xf32>
    %366 = arith.select %363, %364, %365 : vector<40x1xi1>, vector<40x1xf32>
    %367 = arith.addf %361, %366 : vector<40x1xf32>
    %c0_i32 = arith.constant 0 : i32
    %368 = vector.broadcast %c0_i32 : i32 to vector<40x1xi32>
    %369 = arith.cmpi eq, %2, %368 : vector<40x1xi32>
    %cst_71 = arith.constant 0.244460404 : f32
    %cst_72 = arith.constant 0.000000e+00 : f32
    %370 = vector.broadcast %cst_71 : f32 to vector<40x1xf32>
    %371 = vector.broadcast %cst_72 : f32 to vector<40x1xf32>
    %372 = arith.select %369, %370, %371 : vector<40x1xi1>, vector<40x1xf32>
    %cst_73 = arith.constant 0.244460404 : f32
    %373 = vector.broadcast %cst_73 : f32 to vector<40x1xf32>
    %374 = arith.addf %373, %372 : vector<40x1xf32>
    %c0_i32_74 = arith.constant 0 : i32
    %375 = vector.broadcast %c0_i32_74 : i32 to vector<40x1xi32>
    %376 = arith.cmpi eq, %2, %375 : vector<40x1xi32>
    %cst_75 = arith.constant 0.0707663745 : f32
    %cst_76 = arith.constant 0.000000e+00 : f32
    %377 = vector.broadcast %cst_75 : f32 to vector<40x1xf32>
    %378 = vector.broadcast %cst_76 : f32 to vector<40x1xf32>
    %379 = arith.select %376, %377, %378 : vector<40x1xi1>, vector<40x1xf32>
    %cst_77 = arith.constant 0.0707663745 : f32
    %380 = vector.broadcast %cst_77 : f32 to vector<40x1xf32>
    %381 = arith.addf %380, %379 : vector<40x1xf32>
    %cst_78 = arith.constant 0.000000e+00 : f32
    %382 = vector.broadcast %cst_78 : f32 to vector<2x128xf32>
    %383 = vector.extract_strided_slice %340 {offsets = [0, 0], sizes = [38, 128], strides = [1, 1]} : vector<40x128xf32> to vector<38x128xf32>
    %384 = tpu.concatenate %382, %383 in 0 : vector<2x128xf32>, vector<38x128xf32> -> vector<40x128xf32>
    %385 = vector.broadcast %347 : vector<40x1xf32> to vector<40x128xf32>
    %386 = arith.mulf %385, %384 : vector<40x128xf32>
    %cst_79 = arith.constant 0.000000e+00 : f32
    %387 = vector.broadcast %cst_79 : f32 to vector<1x128xf32>
    %388 = vector.extract_strided_slice %340 {offsets = [0, 0], sizes = [39, 128], strides = [1, 1]} : vector<40x128xf32> to vector<39x128xf32>
    %389 = tpu.concatenate %387, %388 in 0 : vector<1x128xf32>, vector<39x128xf32> -> vector<40x128xf32>
    %390 = vector.broadcast %354 : vector<40x1xf32> to vector<40x128xf32>
    %391 = arith.mulf %390, %389 : vector<40x128xf32>
    %392 = arith.addf %386, %391 : vector<40x128xf32>
    %393 = vector.broadcast %367 : vector<40x1xf32> to vector<40x128xf32>
    %394 = arith.mulf %393, %340 : vector<40x128xf32>
    %395 = arith.addf %392, %394 : vector<40x128xf32>
    %cst_80 = arith.constant 0.000000e+00 : f32
    %396 = vector.broadcast %cst_80 : f32 to vector<1x128xf32>
    %397 = vector.extract_strided_slice %340 {offsets = [1, 0], sizes = [39, 128], strides = [1, 1]} : vector<40x128xf32> to vector<39x128xf32>
    %398 = tpu.concatenate %397, %396 in 0 : vector<39x128xf32>, vector<1x128xf32> -> vector<40x128xf32>
    %399 = vector.broadcast %374 : vector<40x1xf32> to vector<40x128xf32>
    %400 = arith.mulf %399, %398 : vector<40x128xf32>
    %401 = arith.addf %395, %400 : vector<40x128xf32>
    %cst_81 = arith.constant 0.000000e+00 : f32
    %402 = vector.broadcast %cst_81 : f32 to vector<2x128xf32>
    %403 = vector.extract_strided_slice %340 {offsets = [2, 0], sizes = [38, 128], strides = [1, 1]} : vector<40x128xf32> to vector<38x128xf32>
    %404 = tpu.concatenate %403, %402 in 0 : vector<38x128xf32>, vector<2x128xf32> -> vector<40x128xf32>
    %405 = vector.broadcast %381 : vector<40x1xf32> to vector<40x128xf32>
    %406 = arith.mulf %405, %404 : vector<40x128xf32>
    %407 = arith.addf %401, %406 : vector<40x128xf32>
    %c47_i32 = arith.constant 47 : i32
    %408 = vector.broadcast %c47_i32 : i32 to vector<1x128xi32>
    %409 = arith.cmpi eq, %3, %408 : vector<1x128xi32>
    %cst_82 = arith.constant 0.0707663745 : f32
    %cst_83 = arith.constant 0.000000e+00 : f32
    %410 = vector.broadcast %cst_82 : f32 to vector<1x128xf32>
    %411 = vector.broadcast %cst_83 : f32 to vector<1x128xf32>
    %412 = arith.select %409, %410, %411 : vector<1x128xi1>, vector<1x128xf32>
    %cst_84 = arith.constant 0.0707663745 : f32
    %413 = vector.broadcast %cst_84 : f32 to vector<1x128xf32>
    %414 = arith.addf %413, %412 : vector<1x128xf32>
    %c47_i32_85 = arith.constant 47 : i32
    %415 = vector.broadcast %c47_i32_85 : i32 to vector<1x128xi32>
    %416 = arith.cmpi eq, %3, %415 : vector<1x128xi32>
    %cst_86 = arith.constant 0.244460404 : f32
    %cst_87 = arith.constant 0.000000e+00 : f32
    %417 = vector.broadcast %cst_86 : f32 to vector<1x128xf32>
    %418 = vector.broadcast %cst_87 : f32 to vector<1x128xf32>
    %419 = arith.select %416, %417, %418 : vector<1x128xi1>, vector<1x128xf32>
    %cst_88 = arith.constant 0.244460404 : f32
    %420 = vector.broadcast %cst_88 : f32 to vector<1x128xf32>
    %421 = arith.addf %420, %419 : vector<1x128xf32>
    %c1_i32_89 = arith.constant 1 : i32
    %422 = vector.broadcast %c1_i32_89 : i32 to vector<1x128xi32>
    %423 = arith.cmpi eq, %3, %422 : vector<1x128xi32>
    %cst_90 = arith.constant 0.0707663745 : f32
    %cst_91 = arith.constant 0.000000e+00 : f32
    %424 = vector.broadcast %cst_90 : f32 to vector<1x128xf32>
    %425 = vector.broadcast %cst_91 : f32 to vector<1x128xf32>
    %426 = arith.select %423, %424, %425 : vector<1x128xi1>, vector<1x128xf32>
    %cst_92 = arith.constant 0.369546473 : f32
    %427 = vector.broadcast %cst_92 : f32 to vector<1x128xf32>
    %428 = arith.addf %427, %426 : vector<1x128xf32>
    %c46_i32 = arith.constant 46 : i32
    %429 = vector.broadcast %c46_i32 : i32 to vector<1x128xi32>
    %430 = arith.cmpi eq, %3, %429 : vector<1x128xi32>
    %cst_93 = arith.constant 0.0707663745 : f32
    %cst_94 = arith.constant 0.000000e+00 : f32
    %431 = vector.broadcast %cst_93 : f32 to vector<1x128xf32>
    %432 = vector.broadcast %cst_94 : f32 to vector<1x128xf32>
    %433 = arith.select %430, %431, %432 : vector<1x128xi1>, vector<1x128xf32>
    %434 = arith.addf %428, %433 : vector<1x128xf32>
    %c0_i32_95 = arith.constant 0 : i32
    %435 = vector.broadcast %c0_i32_95 : i32 to vector<1x128xi32>
    %436 = arith.cmpi eq, %3, %435 : vector<1x128xi32>
    %cst_96 = arith.constant 0.244460404 : f32
    %cst_97 = arith.constant 0.000000e+00 : f32
    %437 = vector.broadcast %cst_96 : f32 to vector<1x128xf32>
    %438 = vector.broadcast %cst_97 : f32 to vector<1x128xf32>
    %439 = arith.select %436, %437, %438 : vector<1x128xi1>, vector<1x128xf32>
    %cst_98 = arith.constant 0.244460404 : f32
    %440 = vector.broadcast %cst_98 : f32 to vector<1x128xf32>
    %441 = arith.addf %440, %439 : vector<1x128xf32>
    %c0_i32_99 = arith.constant 0 : i32
    %442 = vector.broadcast %c0_i32_99 : i32 to vector<1x128xi32>
    %443 = arith.cmpi eq, %3, %442 : vector<1x128xi32>
    %cst_100 = arith.constant 0.0707663745 : f32
    %cst_101 = arith.constant 0.000000e+00 : f32
    %444 = vector.broadcast %cst_100 : f32 to vector<1x128xf32>
    %445 = vector.broadcast %cst_101 : f32 to vector<1x128xf32>
    %446 = arith.select %443, %444, %445 : vector<1x128xi1>, vector<1x128xf32>
    %cst_102 = arith.constant 0.0707663745 : f32
    %447 = vector.broadcast %cst_102 : f32 to vector<1x128xf32>
    %448 = arith.addf %447, %446 : vector<1x128xf32>
    %cst_103 = arith.constant 0.000000e+00 : f32
    %449 = vector.broadcast %cst_103 : f32 to vector<40x2xf32>
    %450 = vector.extract_strided_slice %407 {offsets = [0, 0], sizes = [40, 126], strides = [1, 1]} : vector<40x128xf32> to vector<40x126xf32>
    %451 = tpu.concatenate %449, %450 in 1 : vector<40x2xf32>, vector<40x126xf32> -> vector<40x128xf32>
    %452 = vector.broadcast %414 : vector<1x128xf32> to vector<40x128xf32>
    %453 = arith.mulf %452, %451 : vector<40x128xf32>
    %cst_104 = arith.constant 0.000000e+00 : f32
    %454 = vector.broadcast %cst_104 : f32 to vector<40x1xf32>
    %455 = vector.extract_strided_slice %407 {offsets = [0, 0], sizes = [40, 127], strides = [1, 1]} : vector<40x128xf32> to vector<40x127xf32>
    %456 = tpu.concatenate %454, %455 in 1 : vector<40x1xf32>, vector<40x127xf32> -> vector<40x128xf32>
    %457 = vector.broadcast %421 : vector<1x128xf32> to vector<40x128xf32>
    %458 = arith.mulf %457, %456 : vector<40x128xf32>
    %459 = arith.addf %453, %458 : vector<40x128xf32>
    %460 = vector.broadcast %434 : vector<1x128xf32> to vector<40x128xf32>
    %461 = arith.mulf %460, %407 : vector<40x128xf32>
    %462 = arith.addf %459, %461 : vector<40x128xf32>
    %cst_105 = arith.constant 0.000000e+00 : f32
    %463 = vector.broadcast %cst_105 : f32 to vector<40x1xf32>
    %464 = vector.extract_strided_slice %407 {offsets = [0, 1], sizes = [40, 127], strides = [1, 1]} : vector<40x128xf32> to vector<40x127xf32>
    %465 = tpu.concatenate %464, %463 in 1 : vector<40x127xf32>, vector<40x1xf32> -> vector<40x128xf32>
    %466 = vector.broadcast %441 : vector<1x128xf32> to vector<40x128xf32>
    %467 = arith.mulf %466, %465 : vector<40x128xf32>
    %468 = arith.addf %462, %467 : vector<40x128xf32>
    %cst_106 = arith.constant 0.000000e+00 : f32
    %469 = vector.broadcast %cst_106 : f32 to vector<40x2xf32>
    %470 = vector.extract_strided_slice %407 {offsets = [0, 2], sizes = [40, 126], strides = [1, 1]} : vector<40x128xf32> to vector<40x126xf32>
    %471 = tpu.concatenate %470, %469 in 1 : vector<40x126xf32>, vector<40x2xf32> -> vector<40x128xf32>
    %472 = vector.broadcast %448 : vector<1x128xf32> to vector<40x128xf32>
    %473 = arith.mulf %472, %471 : vector<40x128xf32>
    %474 = arith.addf %468, %473 : vector<40x128xf32>
    %cst_107 = arith.constant 1.000000e-01 : f32
    %475 = vector.broadcast %cst_107 : f32 to vector<40x128xf32>
    %476 = arith.cmpf ogt, %338, %475 : vector<40x128xf32>
    %477 = arith.select %476, %474, %338 : vector<40x128xi1>, vector<40x128xf32>
    %cst_108 = arith.constant 1.000000e-01 : f32
    %478 = vector.broadcast %cst_108 : f32 to vector<40x128xf32>
    %479 = arith.cmpf ogt, %477, %478 : vector<40x128xf32>
    %cst_109 = arith.constant 1.000000e+02 : f32
    %480 = vector.broadcast %cst_109 : f32 to vector<40x128xf32>
    %481 = arith.subf %480, %477 : vector<40x128xf32>
    %482 = arith.select %479, %481, %477 : vector<40x128xi1>, vector<40x128xf32>
    %c0_110 = arith.constant 0 : index
    %c0_111 = arith.constant 0 : index
    %c0_112 = arith.constant 0 : index
    %483 = vector.load %arg2[%c0_110, %c0_111, %c0_112] : memref<1x40x128xf32, #tpu.memory_space<vmem>>, vector<1x40x128xf32>
    %484 = vector.shape_cast %483 : vector<1x40x128xf32> to vector<40x128xf32>
    %485 = vector.shape_cast %482 : vector<40x128xf32> to vector<1x40x128xf32>
    tpu.vector_store %arg2[%c0_110, %c0_111, %c0_112], %485 {strides = array<i32>} : memref<1x40x128xf32, #tpu.memory_space<vmem>>, vector<1x40x128xf32>,
    return
  }
  func.func @transform_0(%arg0: i32) -> (i32, i32, i32) {
    %c0_i32 = arith.constant 0 : i32
    %c0_i32_0 = arith.constant 0 : i32
    %c0_i32_1 = arith.constant 0 : i32
    return %arg0, %c0_i32, %c0_i32_0 : i32, i32, i32
  }
  func.func @transform_1(%arg0: i32) -> (i32, i32, i32) {
    %c0_i32 = arith.constant 0 : i32
    %c0_i32_0 = arith.constant 0 : i32
    %c0_i32_1 = arith.constant 0 : i32
    return %arg0, %c0_i32, %c0_i32_0 : i32, i32, i32
  }
}

</mosaic_0001>

<bundles_post_ra>
// kernel: tpu_custom_call.1
= control target key start
LH: loop header
LB: loop body
LE: loop exit
PB: predicated region body
PF: predicated region fallthrough
CT: control target
= control target key end

     0   :  { %6 = vsyncpa [#allocation3], 0  ;;  %s155_s0 = inlined_call_operand.hbm [shape: f32[16,256], index: 0, kind: input, shape index: {}]   ;;  %s156_s1 = inlined_call_operand.hbm [shape: f32[16,256], index: 1, kind: output, shape index: {}]  }
   0x1   :  { %7 = vsyncpa [#allocation4], 0  ;;  %s111_s6 = smov [#allocation2]   ;;  %s63_s10 = scalar_lea.hbm %s155_s0, 512 }
   0x2   :  { %s13_s7 = sshll.u32 %s111_s6, 4  ;;  %p64_p0 = scmp.ne.s32.totalorder %s155_s0, %s63_s10  ;;  %s14_s7 = int_to_ptr.vmem [resolvable:$true] %s13_s7 }
   0x3   :  { %p67_p1 = scmp.lt.u32.totalorder %s63_s10, %s155_s0 }
   0x5   :  { %p69_p2 = pnand %p67_p1, %p64_p0 }
   0x7   :  { %72 = shalt.err (!%p69_p2)
}
   0x8   :  { %s73_s15 = scalar_lea.vmem %s14_s7, 512  ;;  %p78_p4 = scmp.lt.s32.totalorder %s14_s7, %s14_s7 }
   0x9   :  { %p74_p3 = scmp.ne.s32.totalorder %s14_s7, %s73_s15  ;;  %p79_p5 = scmp.lt.s32.totalorder %s73_s15, %s73_s15 }
   0xb   :  { %p80_p6 = por %p79_p5, %p78_p4 }
   0xd   :  { %p81_p7 = pnand %p80_p6, %p74_p3 }
   0xf   :  { %84 = shalt.err (!%p81_p7)
}
  0x10   :  { %s112_s16 = smov 256   ;;  %s113_s17 = smov 16  }
  0x11   :  { %19 = dma.hbm_to_vmem [thread:$0]  %s155_s0, 512, %s14_s7, [#allocation3], %s112_s16, %s112_s16, %s113_s17  }
  0x12   :  { %107 = dma.done.wait [#allocation3], 512  }
  0x13   :  { %108 = vsyncadd [#allocation3], 4294966784  ;;  %v31_v0 = vlaneseq  ;;  %v23_v2 = vld [vmem:[#allocation2] sm:$0xff]  ;;  %v25_v3 = vld [vmem:[#allocation2 + $0x10] sm:$0xff]  ;;  %s114_s20 = smov [#allocation5]  }
  0x14   :  { %v24_v4 = vld [vmem:[#allocation2 + $0x8] sm:$0xff]  ;;  %s47_s21 = sshll.u32 %s114_s20, 4  ;;  %v27_v5 = vrot.slane %v23_v2, 5  ;;  %v29_v6 = vrot.slane %v25_v3, 5  ;;  %v26_v7 = vld [vmem:[#allocation2 + $0x18] sm:$0xff]  ;;  %s48_s21 = int_to_ptr.vmem [resolvable:$true] %s47_s21 }
  0x15   :  { %v32_v1 = vshrl.u32 %v31_v0, 7  ;;  %v28_v8 = vrot.slane %v24_v4, 5  ;;  %v30_v9 = vrot.slane %v26_v7, 5  ;;  %s85_s0 = scalar_lea.vmem %s48_s21, 512  ;;  %p90_p9 = scmp.lt.s32.totalorder %s48_s21, %s48_s21 }
  0x16   :  { %p86_p8 = scmp.ne.s32.totalorder %s48_s21, %s85_s0  ;;  %p91_p10 = scmp.lt.s32.totalorder %s85_s0, %s85_s0 }
  0x17   :  { %vm33_vm0 = vcmp.lt.s32.totalorder %v32_v1, 3 }
  0x18   :  { %v36_v10 = vsel %vm33_vm0, %v29_v6, %v27_v5  ;;  %v34_v11 = vsel %vm33_vm0, %v27_v5, %v29_v6  ;;  %v37_v12 = vsel %vm33_vm0, %v30_v9, %v28_v8  ;;  %v35_v13 = vsel %vm33_vm0, %v28_v8, %v30_v9  ;;  %p92_p11 = por %p91_p10, %p90_p9 }
  0x19   :  { %38 = vst [vmem:[#allocation5] sm:$0xff] %v36_v10  ;;  %40 = vst [vmem:[#allocation5 + $0x10] sm:$0xff] %v34_v11 }
  0x1a   :  { %39 = vst [vmem:[#allocation5 + $0x8] sm:$0xff] %v37_v12  ;;  %41 = vst [vmem:[#allocation5 + $0x18] sm:$0xff] %v35_v13  ;;  %p93_p12 = pnand %p92_p11, %p86_p8 }
  0x1c   :  { %96 = shalt.err (!%p93_p12)
}
  0x1d   :  { %s97_s24 = scalar_lea.hbm %s156_s1, 512 }
  0x1e   :  { %p98_p13 = scmp.ne.s32.totalorder %s156_s1, %s97_s24  ;;  %p101_p0 = scmp.lt.u32.totalorder %s97_s24, %s156_s1 }
  0x20   :  { %p103_p1 = pnand %p101_p0, %p98_p13 }
  0x22   :  { %106 = shalt.err (!%p103_p1)
}
  0x23   :  { %53 = dma.vmem_to_hbm [thread:$0]  %s48_s21, 512, %s156_s1, [#allocation4], %s112_s16, %s112_s16, %s113_s17  }
  0x24   :  { %109 = dma.done.wait [#allocation4], 512  }
  0x25   :  { %110 = vsyncadd [#allocation4], 4294966784 }
  0x26   :  { %57 = vsyncpa [#allocation3], 1 }
  0x27   :  { %58 = vsyncpa [#allocation4], 1 }

// kernel: tpu_custom_call.1
= control target key start
LH: loop header
LB: loop body
LE: loop exit
PB: predicated region body
PF: predicated region fallthrough
CT: control target
= control target key end

     0   :  { %6 = vsyncpa [#allocation3], 0  ;;  %s161_s0 = inlined_call_operand.hbm [shape: f32[16,256], index: 0, kind: input, shape index: {}]   ;;  %s162_s1 = inlined_call_operand.hbm [shape: f32[16,256], index: 1, kind: output, shape index: {}]  }
   0x1   :  { %7 = vsyncpa [#allocation4], 0  ;;  %s116_s6 = smov [#allocation2]   ;;  %s68_s10 = scalar_lea.hbm %s161_s0, 512 }
   0x2   :  { %s13_s7 = sshll.u32 %s116_s6, 4  ;;  %p69_p0 = scmp.ne.s32.totalorder %s161_s0, %s68_s10  ;;  %s14_s7 = int_to_ptr.vmem [resolvable:$true] %s13_s7 }
   0x3   :  { %p72_p1 = scmp.lt.u32.totalorder %s68_s10, %s161_s0 }
   0x5   :  { %p74_p2 = pnand %p72_p1, %p69_p0 }
   0x7   :  { %77 = shalt.err (!%p74_p2)
}
   0x8   :  { %s78_s15 = scalar_lea.vmem %s14_s7, 512  ;;  %p83_p4 = scmp.lt.s32.totalorder %s14_s7, %s14_s7 }
   0x9   :  { %p79_p3 = scmp.ne.s32.totalorder %s14_s7, %s78_s15  ;;  %p84_p5 = scmp.lt.s32.totalorder %s78_s15, %s78_s15 }
   0xb   :  { %p85_p6 = por %p84_p5, %p83_p4 }
   0xd   :  { %p86_p7 = pnand %p85_p6, %p79_p3 }
   0xf   :  { %89 = shalt.err (!%p86_p7)
}
  0x10   :  { %s117_s16 = smov 256   ;;  %s118_s17 = smov 16  }
  0x11   :  { %19 = dma.hbm_to_vmem [thread:$0]  %s161_s0, 512, %s14_s7, [#allocation3], %s117_s16, %s117_s16, %s118_s17  }
  0x12   :  { %112 = dma.done.wait [#allocation3], 512  }
  0x13   :  { %113 = vsyncadd [#allocation3], 4294966784  ;;  %v24_v0 = vld [vmem:[#allocation2 + $0x8] sm:$0xff]  ;;  %v23_v1 = vld [vmem:[#allocation2] sm:$0xff]  ;;  %s119_s20 = smov 3   ;;  %v35_v4 = vlaneseq  ;;  %s120_s21 = smov [#allocation5]  }
  0x14   :  { %31 = vrot.lane.b32.xlu1 %v24_v0, %s119_s20  ;;  %27 = vrot.lane.b32.xlu0 %v23_v1, %s119_s20  ;;  %v26_v2 = vld [vmem:[#allocation2 + $0x18] sm:$0xff]  ;;  %v25_v3 = vld [vmem:[#allocation2 + $0x10] sm:$0xff]  ;;  %s51_s0 = sshll.u32 %s120_s21, 4  ;;  %s52_s0 = int_to_ptr.vmem [resolvable:$true] %s51_s0 }
  0x15   :  { %v36_v5 = vand.u32 127, %v35_v4  ;;  %s90_s22 = scalar_lea.vmem %s52_s0, 512  ;;  %p95_p9 = scmp.lt.s32.totalorder %s52_s0, %s52_s0 }
  0x16   :  { %p91_p8 = scmp.ne.s32.totalorder %s52_s0, %s90_s22  ;;  %p96_p10 = scmp.lt.s32.totalorder %s90_s22, %s90_s22 }
  0x17   :  { %vm37_vm0 = vcmp.lt.s32.totalorder %v36_v5, 3 }
  0x18   :  { %33 = vrot.lane.b32.xlu1 %v26_v2, %s119_s20  ;;  %29 = vrot.lane.b32.xlu0 %v25_v3, %s119_s20  ;;  %p97_p11 = por %p96_p10, %p95_p9 }
  0x1a   :  { %p98_p12 = pnand %p97_p11, %p91_p8 }
  0x86   :  { %v32_v6 = vpop.permute.xlu1 %31  ;;  %v28_v7 = vpop.permute.xlu0 %27 }
  0x87   :  { %v38_v8 = vsel %vm37_vm0, %v28_v7, %v32_v6  ;;  %v40_v9 = vsel %vm37_vm0, %v32_v6, %v28_v7 }
  0x88   :  { %42 = vst [vmem:[#allocation5] sm:$0xff] %v40_v9  ;;  %43 = vst [vmem:[#allocation5 + $0x8] sm:$0xff] %v38_v8 }
  0x8a   :  { %v34_v10 = vpop.permute.xlu1 %33  ;;  %v30_v11 = vpop.permute.xlu0 %29 }
  0x8b   :  { %v39_v12 = vsel %vm37_vm0, %v30_v11, %v34_v10  ;;  %v41_v13 = vsel %vm37_vm0, %v34_v10, %v30_v11 }
  0x8c   :  { %44 = vst [vmem:[#allocation5 + $0x10] sm:$0xff] %v41_v13  ;;  %45 = vst [vmem:[#allocation5 + $0x18] sm:$0xff] %v39_v12 }
  0x8d   :  { %101 = shalt.err (!%p98_p12)
}
  0x8e   :  { %s102_s25 = scalar_lea.hbm %s162_s1, 512 }
  0x8f   :  { %p103_p13 = scmp.ne.s32.totalorder %s162_s1, %s102_s25  ;;  %p106_p0 = scmp.lt.u32.totalorder %s102_s25, %s162_s1 }
  0x91   :  { %p108_p1 = pnand %p106_p0, %p103_p13 }
  0x93   :  { %111 = shalt.err (!%p108_p1)
}
  0x94   :  { %57 = dma.vmem_to_hbm [thread:$0]  %s52_s0, 512, %s162_s1, [#allocation4], %s117_s16, %s117_s16, %s118_s17  }
  0x95   :  { %114 = dma.done.wait [#allocation4], 512  }
  0x96   :  { %115 = vsyncadd [#allocation4], 4294966784 }
  0x97   :  { %61 = vsyncpa [#allocation3], 1 }
  0x98   :  { %62 = vsyncpa [#allocation4], 1 }

// kernel: tpu_custom_call.1
= control target key start
LH: loop header
LB: loop body
LE: loop exit
PB: predicated region body
PF: predicated region fallthrough
CT: control target
= control target key end

     0   :  { %6 = vsyncpa [#allocation3], 0  ;;  %s4692_s0 = inlined_call_operand.hbm [shape: f32[2,40,128], index: 0, kind: input, shape index: {}]   ;;  %s4693_s1 = inlined_call_operand.hbm [shape: f32[2,40,128], index: 1, kind: output, shape index: {}]  }
   0x1   :  { %8 = vsyncpa [#allocation3 + $0x1], 0 }
   0x2   :  { %9 = vsyncpa [#allocation4], 0 }
   0x3   :  { %11 = vsyncpa [#allocation4 + $0x1], 0  ;;  %s2756_s6 = smov 0   ;;  %s2758_s7 = smov 0  }
   0x4   :  { %s2760_s8 = smov 0   ;;  %s2762_s9 = smov 0  }
   0x5 LB: > { %s2777_s10 = sadd.s32 4294967295, %s2729_s9   ;;  %s2562_s11 = sadd.s32 4294967294, %s2729_s9   ;;  %s2729_s9 = sphi %s2762_s9, %s4931_s9   ;;  %s2725_s8 = sphi %s2760_s8, %s4930_s8   ;;  %s2721_s7 = sphi %s2758_s7, %s4929_s7   ;;  %s2717_s6 = sphi %s2756_s6, %s4928_s6  }
   0x6   : > { %s2781_s12 = sadd.s32 1, %s2729_s9   ;;  %s24_s13 = sadd.s32 1, %s2725_s8 }
   0x7   : > { %s21_s14 = ssub.s32 %s2729_s9, %s2781_s12  ;;  %p31_p0 = scmp.ne.s32.totalorder %s2725_s8, %s2721_s7 }
   0x8   : > { %p22_p1 = scmp.eq.s32.totalorder %s21_s14, 0  ;;  %p32_p2 = scmp.eq.s32.totalorder %s2729_s9, 0 }
   0x9   : > { %p37_p3 = scmp.ne.s32.totalorder %s2721_s7, %s2717_s6  ;;  %p38_p4 = scmp.eq.s32.totalorder %s2777_s10, 0 }
   0xa   : > { %s2793_s15 = scalar_select %p22_p1, %s2725_s8, %s24_s13  }
   0xb   : > { %p33_p5 = por %p32_p2, %p31_p0  ;;  %p2795_p6 = por %p38_p4, %p37_p3 }
   0xc   : > { %p61_p7 = scmp.eq.s32.totalorder %s2777_s10, 1  ;;  %p67_p8 = scmp.eq.s32.totalorder %s2562_s11, 1 }
   0xd   : > { %p2586_p10 = scmp.lt.s32.totalorder %s2729_s9, 2  ;;  %s87_s19 = sand.u32 1, %s2725_s8  }
   0xe   : > { %p2802_p11 = por %p61_p7, %p31_p0  ;;  %p2806_p12 = por %p67_p8, %p37_p3 }
   0xf   : > { %s2571_s20 = smul.u32 640, %s2729_s9  ;;  %p2817_p13 = pnand %p2586_p10, %p33_p5 }
  0x10   : > { %s4773_s17 = scalar_select %p2802_p11, 1, 0 }
  0x11   : > { %s4774_s18 = scalar_select %p2806_p12, 1, 0 }
  0x12   : > { %s2570_s21 = smul.u32 40, %s87_s19  ;;  %s2815_s24 = scalar_lea.hbm %s4692_s0, %s2571_s20 }
  0x13   : > { %s2823_s28 = scalar_lea.sflag [#allocation3], %s87_s19  ;;  %s2633_s29 = scalar_lea.hbm %s2815_s24, 640 }
  0x14   : > { %s91_s26 = scalar_lea.vmem [#allocation2], %s2570_s21  ;;  %p2634_p0 = scmp.ne.s32.totalorder %s2815_s24, %s2633_s29 }
  0x15   : > { %s98_s27 = sshll.u32 %s91_s26, 4  ;;  %p2635_p1 = pneg %p2817_p13  ;;  %s2821_s27 = int_to_ptr.vmem [resolvable:$true] %s98_s27 }
  0x16   : > { %s2638_s3 = scalar_lea.hbm %s4692_s0, 1280  ;;  %p2639_p4 = scmp.lt.u32.totalorder %s2815_s24, %s4692_s0 }
  0x17   : > { %p2636_p2 = pnand %p2635_p1, %p2634_p0  ;;  %p2640_p5 = scmp.lt.u32.totalorder %s2638_s3, %s2633_s29 }
  0x18   : > { %p2642_p8 = scmp.lt.u32.totalorder %s2633_s29, %s2815_s24 }
  0x19   : > { %p2637_p3 = pneg %p2636_p2  ;;  %p2641_p7 = por %p2640_p5, %p2639_p4 }
  0x1b   : > { %p2643_p10 = por %p2642_p8, %p2641_p7 }
  0x1d   : > { %p2644_p9 = pnand %p2643_p10, %p2637_p3 }
  0x1f   : > { %2647 = shalt.err (!%p2644_p9)
}
  0x20   : > { %s2648_s11 = scalar_lea.vmem %s2821_s27, 640  ;;  %s2731_s13 = smov [#allocation2]  }
  0x21   : > { %p2649_p0 = scmp.ne.s32.totalorder %s2821_s27, %s2648_s11  ;;  %s2653_s14 = sshll.u32 %s2731_s13, 4  ;;  %s2654_s14 = int_to_ptr.vmem [resolvable:$false] %s2653_s14 }
  0x22   : > { %s2655_s19 = scalar_lea.vmem %s2654_s14, 1280  ;;  %p2656_p11 = scmp.lt.s32.totalorder %s2821_s27, %s2654_s14 }
  0x23   : > { %p2651_p2 = pnand %p2649_p0, %p2635_p1  ;;  %p2657_p4 = scmp.lt.s32.totalorder %s2655_s19, %s2648_s11 }
  0x25   : > { %p2652_p12 = pneg %p2651_p2  ;;  %p2658_p5 = por %p2657_p4, %p2656_p11 }
  0x27   : > { %p2659_p7 = pnand %p2658_p5, %p2652_p12 }
  0x29   : > { %2662 = shalt.err (!%p2659_p7)
}
  0x2a   : > { %s2732_s20 = smov 128   ;;  %s2733_s21 = smov 8  }
  0x2b   : > { %2581 = dma.hbm_to_vmem [thread:$0]  (!%p2817_p13), %s2815_s24, 640, %s2821_s27, %s2823_s28, %s2732_s20, %s2732_s20, %s2733_s21  }
  0x2c   : > { %p2566_p9 = scmp.ge.s32.totalorder %s2729_s9, 1  ;;  %p106_p1 = scmp.lt.s32.totalorder %s2729_s9, 3 }
  0x2e   : > { %p107_p3 = pnand %p2566_p9, %p106_p1 }
  0x30   : > { %110 = sbr.rel (%p107_p3) target bundleno = 2261 (0x8d5), region = 24 }
  0x37   : > { %s2854_s22 = sand.u32 1, %s2721_s7  }
  0x38   : > { %s2572_s23 = smul.u32 40, %s2854_s22  ;;  %s113_s26 = scalar_lea.sflag [#allocation3], %s2854_s22 }
  0x3a   : > { %s116_s29 = scalar_lea.vmem [#allocation2], %s2572_s23 }
  0x3b   : > { %2708 = dma.done.wait (%p2795_p6), %s113_s26, 640  }
  0x3c   : > { %2710 = vsyncadd (%p2795_p6), %s113_s26, 4294966656  ;;  %v140_v0 = vlaneseq  ;;  %v135_v4 = vld [vmem:[%s116_s29] sm:$0xff]  ;;  %v136_v5 = vld [vmem:[%s116_s29 + $0x8] sm:$0xff]  ;;  %vm196_vm1 = vcmask 1040384   ;;  %v4779_v24 = vmov 0  ;;  %vm222_vm9 = vcmask 1041408  }
  0x3d   : > { %v137_v6 = vld [vmem:[%s116_s29 + $0x10] sm:$0xff]  ;;  %vm171_vm2 = vcmp.gt.f32.partialorder %v135_v4, 0.1  ;;  %vm172_vm3 = vcmp.gt.f32.partialorder %v136_v5, 0.1  ;;  %v176_v7 = vsub.f32 100.0, %v135_v4 }
  0x3e   : > { %v2864_v1 = vshrl.u32 %v140_v0, 7  ;;  %v2866_v2 = vand.u32 127, %v140_v0  ;;  %v177_v8 = vsub.f32 100.0, %v136_v5  ;;  %v138_v9 = vld [vmem:[%s116_s29 + $0x18] sm:$0xff]  ;;  %vm173_vm4 = vcmp.gt.f32.partialorder %v137_v6, 0.1 }
  0x3f   : > { %v178_v10 = vsub.f32 100.0, %v137_v6  ;;  %v139_v11 = vld [vmem:[%s116_s29 + $0x20] sm:$0xff]  ;;  %v181_v12 = vsel %vm171_vm2, %v176_v7, %v135_v4  ;;  %vm174_vm6 = vcmp.gt.f32.partialorder %v138_v9, 0.1  ;;  %v179_v14 = vsub.f32 100.0, %v138_v9  ;;  %s2734_s16 = smov 1  }
  0x40   : > { %4776 = vst [vmem:[#allocation8_spill] sm:$0xff] %v2864_v1  ;;  %4777 = vst [vmem:[#allocation9_spill] sm:$0xff] %v2866_v2  ;;  %v2869_v3 = vadd.s32 32, %v2864_v1  ;;  %vm153_vm0 = vcmp.ge.s32.totalorder %v2866_v2, 48  ;;  %v182_v13 = vsel %vm172_vm3, %v177_v8, %v136_v5  ;;  %vm175_vm7 = vcmp.gt.f32.partialorder %v139_v11, 0.1 }
  0x41   : > { %v186_v15 = vsel %vm153_vm0, -1e+30, %v181_v12  ;;  %v187_v16 = vsel %vm153_vm0, -1e+30, %v182_v13  ;;  %v183_v17 = vsel %vm173_vm4, %v178_v10, %v137_v6  ;;  %v184_v20 = vsel %vm174_vm6, %v179_v14, %v138_v9  ;;  %s2735_s24 = smov 2   ;;  %s2736_s25 = smov 4  }
  0x42   : > { %4778 = vst [vmem:[#allocation10_spill] sm:$0xff] %v2869_v3  ;;  %vm152_vm5 = vcmp.ge.s32.totalorder %v2869_v3, 36  ;;  %v197_v18 = vrot.slane %v186_v15, 7  ;;  %v198_v19 = vrot.slane %v187_v16, 7  ;;  %v188_v21 = vsel %vm153_vm0, -1e+30, %v183_v17 }
  0x43   : > { %v189_v22 = vsel %vm153_vm0, -1e+30, %v184_v20  ;;  %v200_v23 = vrot.slane %v188_v21, 7  ;;  %vm2885_vm8 = vmor %vm152_vm5, %vm153_vm0  ;;  %v180_v25 = vsub.f32 100.0, %v139_v11  ;;  %vm248_vm10 = vcmask 1043456   ;;  %s2737_s27 = smov 124  }
  0x44   : > { %v4780_v24 = vsel %vm2885_vm8, 4294967295, %v4779_v24  ;;  %v199_v26 = vsel %vm196_vm1, %v197_v18, %v198_v19  ;;  %v211_v27 = vsel %vm196_vm1, -1e+30, %v197_v18  ;;  %v202_v28 = vrot.slane %v189_v22, 7  ;;  %s2738_s28 = smov 126   ;;  %s2739_s30 = smov 3  }
  0x45   : > { %4781 = vst [vmem:[#allocation11_spill] sm:$0xff] %v4780_v24  ;;  %v212_v29 = vmax.f32 %v186_v15, %v211_v27  ;;  %v213_v30 = vmax.f32 %v187_v16, %v199_v26  ;;  %v201_v31 = vsel %vm196_vm1, %v198_v19, %v200_v23  ;;  %v185_v32 = vsel %vm175_vm7, %v180_v25, %v139_v11  ;;  %s2740_s2 = smov 125   ;;  %s2741_s3 = smov 127  }
  0x46   : > { %v203_v33 = vsel %vm196_vm1, %v200_v23, %v202_v28  ;;  %v214_v34 = vmax.f32 %v188_v21, %v201_v31  ;;  %v190_v35 = vsel %vm2885_vm8, -1e+30, %v185_v32  ;;  %vm330_vm11 = vcmask 7168   ;;  %s4624_s4 = scalar_lea.vmem [#allocation5], %s2572_s23  ;;  %s2573_s5 = smul.u32 640, %s2777_s10 }
  0x47   : > { %v223_v36 = vrot.slane %v212_v29, 6  ;;  %v224_v37 = vrot.slane %v213_v30, 6  ;;  %v215_v38 = vmax.f32 %v189_v22, %v203_v33  ;;  %v204_v39 = vrot.slane %v190_v35, 7  ;;  %s2489_s11 = sshll.u32 %s4624_s4, 4  ;;  %s2476_s19 = scalar_lea.sflag [#allocation4], %s2854_s22  ;;  %s4647_s11 = int_to_ptr.vmem [resolvable:$true] %s2489_s11 }
  0x48   : > { %v226_v40 = vrot.slane %v214_v34, 6  ;;  %vm361_vm12 = vcmask 15360   ;;  %vm392_vm13 = vcmask 31744   ;;  %vm453_vm14 = vcmask 1014784   ;;  %s4644_s14 = scalar_lea.hbm %s4693_s1, %s2573_s5  ;;  %s2663_s20 = scalar_lea.vmem %s4647_s11, 640 }
  0x49   : > { %v225_v41 = vsel %vm222_vm9, %v223_v36, %v224_v37  ;;  %v237_v42 = vsel %vm222_vm9, -1e+30, %v223_v36  ;;  %v228_v43 = vrot.slane %v215_v38, 6  ;;  %v205_v44 = vsel %vm196_vm1, %v202_v28, %v204_v39  ;;  %p2664_p6 = scmp.ne.s32.totalorder %s4647_s11, %s2663_s20  ;;  %p4925_p11 = scmp.ne.s32.totalorder %s4773_s17, 0 }
  0x4a   : > { %v238_v45 = vmax.f32 %v212_v29, %v237_v42  ;;  %v239_v46 = vmax.f32 %v213_v30, %v225_v41  ;;  %v227_v47 = vsel %vm222_vm9, %v224_v37, %v226_v40  ;;  %v216_v48 = vmax.f32 %v190_v35, %v205_v44  ;;  %s2743_s21 = smov [#allocation5]  }
  0x4b   : > { %v229_v49 = vsel %vm222_vm9, %v226_v40, %v228_v43  ;;  %v240_v50 = vmax.f32 %v214_v34, %v227_v47  ;;  %vm544_vm15 = vcmask 1045504   ;;  %vm666_vm2 = vcmask 1031168   ;;  %p2665_p12 = pnand %p2664_p6, %p4925_p11  ;;  %s2667_s23 = sshll.u32 %s2743_s21, 4  ;;  %s2668_s23 = int_to_ptr.vmem [resolvable:$false] %s2667_s23 }
  0x4c   : > { %v249_v51 = vrot.slane %v238_v45, 4  ;;  %v250_v52 = vrot.slane %v239_v46, 4  ;;  %v241_v53 = vmax.f32 %v215_v38, %v229_v49  ;;  %v230_v54 = vrot.slane %v216_v48, 6  ;;  %s2669_s26 = scalar_lea.vmem %s2668_s23, 1280  ;;  %p2670_p8 = scmp.lt.s32.totalorder %s4647_s11, %s2668_s23 }
  0x4d   : > { %v252_v55 = vrot.slane %v240_v50, 4  ;;  %vm737_vm3 = vcmask 1042432   ;;  %vm763_vm4 = vcmask 1044480   ;;  %vm855_vm5 = vcmask 23552   ;;  %p2666_p13 = pneg %p2665_p12  ;;  %p2671_p10 = scmp.lt.s32.totalorder %s2669_s26, %s2663_s20 }
  0x4e   : > { %v251_v56 = vsel %vm248_vm10, %v249_v51, %v250_v52  ;;  %v263_v57 = vsel %vm248_vm10, -1e+30, %v249_v51  ;;  %v254_v58 = vrot.slane %v241_v53, 4  ;;  %v231_v59 = vsel %vm222_vm9, %v228_v43, %v230_v54 }
  0x4f   : > { %v264_v60 = vmax.f32 %v238_v45, %v263_v57  ;;  %v265_v61 = vmax.f32 %v239_v46, %v251_v56  ;;  %v253_v62 = vsel %vm248_vm10, %v250_v52, %v252_v55  ;;  %v242_v63 = vmax.f32 %v216_v48, %v231_v59  ;;  %p2672_p0 = por %p2671_p10, %p2670_p8 }
  0x50   : > { %v255_v0 = vsel %vm248_vm10, %v252_v55, %v254_v58  ;;  %v266_v4 = vmax.f32 %v240_v50, %v253_v62  ;;  %vm886_vm6 = vcmask 1022976  }
  0x51   : > { %v274_v5 = vrot.slane %v264_v60, 7  ;;  %v275_v6 = vrot.slane %v265_v61, 7  ;;  %v267_v7 = vmax.f32 %v241_v53, %v255_v0  ;;  %v256_v8 = vrot.slane %v242_v63, 4  ;;  %p2673_p2 = pnand %p2672_p0, %p2666_p13 }
  0x52   : > { %v277_v9 = vrot.slane %v266_v4, 7 }
  0x53   : > { %v276_v10 = vsel %vm196_vm1, %v274_v5, %v275_v6  ;;  %v288_v11 = vsel %vm196_vm1, -1e+30, %v274_v5  ;;  %v279_v12 = vrot.slane %v267_v7, 7  ;;  %v257_v13 = vsel %vm248_vm10, %v254_v58, %v256_v8 }
  0x54   : > { %v289_v14 = vmax.f32 %v264_v60, %v288_v11  ;;  %v290_v15 = vmax.f32 %v265_v61, %v276_v10  ;;  %v278_v16 = vsel %vm196_vm1, %v275_v6, %v277_v9  ;;  %v268_v17 = vmax.f32 %v242_v63, %v257_v13 }
  0x55   : > { %v280_v18 = vsel %vm196_vm1, %v277_v9, %v279_v12  ;;  %v291_v19 = vmax.f32 %v266_v4, %v278_v16 }
  0x56   : > { %v299_v20 = vrot.slane %v289_v14, 4  ;;  %v300_v21 = vrot.slane %v290_v15, 4  ;;  %v292_v22 = vmax.f32 %v267_v7, %v280_v18  ;;  %v281_v23 = vrot.slane %v268_v17, 7 }
  0x57   : > { %v302_v25 = vrot.slane %v291_v19, 4 }
  0x58   : > { %v301_v26 = vsel %vm248_vm10, %v299_v20, %v300_v21  ;;  %v304_v27 = vrot.slane %v292_v22, 4  ;;  %v282_v28 = vsel %vm196_vm1, %v279_v12, %v281_v23 }
  0x59   : > { %315 = vrot.lane.b32.xlu0 %v301_v26, %s2734_s16  ;;  %v293_v29 = vmax.f32 %v268_v17, %v282_v28  ;;  %v303_v31 = vsel %vm248_vm10, %v300_v21, %v302_v25 }
  0x5a   : > { %v305_v30 = vsel %vm248_vm10, %v302_v25, %v304_v27 }
  0x5b   : > { %319 = vrot.lane.b32.xlu1 %v305_v30, %s2734_s16  ;;  %v306_v32 = vrot.slane %v293_v29, 4 }
  0x5d   : > { %317 = vrot.lane.b32.xlu0 %v303_v31, %s2734_s16  ;;  %v307_v33 = vsel %vm248_vm10, %v304_v27, %v306_v32  ;;  %v313_v34 = vsel %vm248_vm10, %v306_v32, -1e+30 }
  0x5f   : > { %321 = vrot.lane.b32.xlu1 %v307_v33, %s2734_s16 }
  0x61   : > { %323 = vrot.lane.b32.xlu0 %v313_v34, %s2734_s16 }
  0xcb   : > { %v316_v35 = vpop.permute.xlu0 %315 }
  0xcc   : > { %v331_v36 = vsel %vm330_vm11, -1e+30, %v316_v35 }
  0xcd   : > { %v336_v37 = vmax.f32 %v301_v26, %v331_v36  ;;  %v320_v38 = vpop.permute.xlu1 %319 }
  0xce   : > { %v333_v39 = vsel %vm330_vm11, -1e+30, %v320_v38 }
  0xcf   : > { %v338_v40 = vmax.f32 %v305_v30, %v333_v39  ;;  %346 = vrot.lane.b32.xlu1 %v336_v37, %s2735_s24  ;;  %v318_v41 = vpop.permute.xlu0 %317 }
  0xd0   : > { %v332_v42 = vsel %vm330_vm11, -1e+30, %v318_v41 }
  0xd1   : > { %v337_v43 = vmax.f32 %v303_v31, %v332_v42  ;;  %v322_v44 = vpop.permute.xlu1 %321 }
  0xd2   : > { %v334_v45 = vsel %vm330_vm11, -1e+30, %v322_v44 }
  0xd3   : > { %v339_v46 = vmax.f32 %v307_v33, %v334_v45  ;;  %350 = vrot.lane.b32.xlu1 %v338_v40, %s2735_s24  ;;  %348 = vrot.lane.b32.xlu0 %v337_v43, %s2735_s24  ;;  %v324_v47 = vpop.permute.xlu0 %323 }
  0xd4   : > { %v335_v48 = vsel %vm330_vm11, -1e+30, %v324_v47 }
  0xd5   : > { %v340_v49 = vmax.f32 %v313_v34, %v335_v48 }
  0xd7   : > { %352 = vrot.lane.b32.xlu0 %v339_v46, %s2735_s24  ;;  %354 = vrot.lane.b32.xlu1 %v340_v49, %s2735_s24 }
 0x141   : > { %v347_v50 = vpop.permute.xlu1 %346 }
 0x142   : > { %v362_v51 = vsel %vm361_vm12, -1e+30, %v347_v50 }
 0x143   : > { %v367_v52 = vmax.f32 %v336_v37, %v362_v51 }
 0x145   : > { %v351_v53 = vpop.permute.xlu1 %350  ;;  %377 = vrot.lane.b32.xlu0 %v367_v52, %s2736_s25  ;;  %v349_v54 = vpop.permute.xlu0 %348 }
 0x146   : > { %v364_v55 = vsel %vm361_vm12, -1e+30, %v351_v53  ;;  %v363_v56 = vsel %vm361_vm12, -1e+30, %v349_v54 }
 0x147   : > { %v369_v57 = vmax.f32 %v338_v40, %v364_v55  ;;  %v368_v58 = vmax.f32 %v337_v43, %v363_v56 }
 0x149   : > { %381 = vrot.lane.b32.xlu0 %v369_v57, %s2736_s25  ;;  %v355_v59 = vpop.permute.xlu1 %354  ;;  %379 = vrot.lane.b32.xlu1 %v368_v58, %s2736_s25  ;;  %v353_v60 = vpop.permute.xlu0 %352 }
 0x14a   : > { %v366_v61 = vsel %vm361_vm12, -1e+30, %v355_v59  ;;  %v365_v62 = vsel %vm361_vm12, -1e+30, %v353_v60 }
 0x14b   : > { %v371_v63 = vmax.f32 %v340_v49, %v366_v61  ;;  %v370_v0 = vmax.f32 %v339_v46, %v365_v62 }
 0x14d   : > { %385 = vrot.lane.b32.xlu0 %v371_v63, %s2736_s25  ;;  %383 = vrot.lane.b32.xlu1 %v370_v0, %s2736_s25 }
 0x1b7   : > { %v378_v4 = vpop.permute.xlu0 %377 }
 0x1b8   : > { %v393_v5 = vsel %vm392_vm13, -1e+30, %v378_v4 }
 0x1b9   : > { %v398_v6 = vmax.f32 %v367_v52, %v393_v5 }
 0x1bb   : > { %v380_v7 = vpop.permute.xlu1 %379  ;;  %408 = vrot.lane.b32.xlu1 %v398_v6, %s2734_s16  ;;  %v382_v8 = vpop.permute.xlu0 %381 }
 0x1bc   : > { %v394_v9 = vsel %vm392_vm13, -1e+30, %v380_v7  ;;  %v395_v10 = vsel %vm392_vm13, -1e+30, %v382_v8 }
 0x1bd   : > { %v399_v11 = vmax.f32 %v368_v58, %v394_v9  ;;  %v400_v12 = vmax.f32 %v369_v57, %v395_v10 }
 0x1bf   : > { %410 = vrot.lane.b32.xlu0 %v399_v11, %s2734_s16  ;;  %v384_v13 = vpop.permute.xlu1 %383  ;;  %412 = vrot.lane.b32.xlu1 %v400_v12, %s2734_s16  ;;  %v386_v14 = vpop.permute.xlu0 %385 }
 0x1c0   : > { %v396_v15 = vsel %vm392_vm13, -1e+30, %v384_v13  ;;  %v397_v16 = vsel %vm392_vm13, -1e+30, %v386_v14 }
 0x1c1   : > { %v401_v17 = vmax.f32 %v370_v0, %v396_v15  ;;  %v402_v18 = vmax.f32 %v371_v63, %v397_v16 }
 0x1c3   : > { %414 = vrot.lane.b32.xlu0 %v401_v17, %s2734_s16  ;;  %416 = vrot.lane.b32.xlu1 %v402_v18, %s2734_s16 }
 0x22d   : > { %v409_v19 = vpop.permute.xlu1 %408 }
 0x22e   : > { %v423_v20 = vsel %vm330_vm11, -1e+30, %v409_v19 }
 0x22f   : > { %v428_v21 = vmax.f32 %v398_v6, %v423_v20 }
 0x231   : > { %438 = vrot.lane.b32.xlu0 %v428_v21, %s2737_s27  ;;  %v413_v22 = vpop.permute.xlu1 %412  ;;  %v411_v23 = vpop.permute.xlu0 %410 }
 0x232   : > { %v425_v25 = vsel %vm330_vm11, -1e+30, %v413_v22  ;;  %v424_v26 = vsel %vm330_vm11, -1e+30, %v411_v23 }
 0x233   : > { %v430_v27 = vmax.f32 %v400_v12, %v425_v25  ;;  %v429_v28 = vmax.f32 %v399_v11, %v424_v26 }
 0x235   : > { %442 = vrot.lane.b32.xlu0 %v430_v27, %s2737_s27  ;;  %v417_v29 = vpop.permute.xlu1 %416  ;;  %440 = vrot.lane.b32.xlu1 %v429_v28, %s2737_s27  ;;  %v415_v30 = vpop.permute.xlu0 %414 }
 0x236   : > { %v427_v31 = vsel %vm330_vm11, -1e+30, %v417_v29  ;;  %v426_v32 = vsel %vm330_vm11, -1e+30, %v415_v30 }
 0x237   : > { %v432_v33 = vmax.f32 %v402_v18, %v427_v31  ;;  %v431_v34 = vmax.f32 %v401_v17, %v426_v32 }
 0x239   : > { %446 = vrot.lane.b32.xlu0 %v432_v33, %s2737_s27  ;;  %444 = vrot.lane.b32.xlu1 %v431_v34, %s2737_s27 }
 0x2a3   : > { %v439_v35 = vpop.permute.xlu0 %438 }
 0x2a4   : > { %v454_v36 = vsel %vm453_vm14, %v439_v35, -1e+30 }
 0x2a5   : > { %v459_v37 = vsel %vm153_vm0, 1e+30, %v454_v36 }
 0x2a6   : > { %v469_v38 = vrot.slane %v459_v37, 7 }
 0x2a7   : > { %v441_v39 = vpop.permute.xlu1 %440  ;;  %v443_v40 = vpop.permute.xlu0 %442 }
 0x2a8   : > { %v483_v41 = vsel %vm196_vm1, 1e+30, %v469_v38  ;;  %v455_v42 = vsel %vm453_vm14, %v441_v39, -1e+30  ;;  %v456_v43 = vsel %vm453_vm14, %v443_v40, -1e+30 }
 0x2a9   : > { %v484_v44 = vmin.f32 %v459_v37, %v483_v41  ;;  %v460_v45 = vsel %vm153_vm0, 1e+30, %v455_v42  ;;  %v461_v46 = vsel %vm153_vm0, 1e+30, %v456_v43 }
 0x2aa   : > { %v470_v47 = vrot.slane %v460_v45, 7  ;;  %v472_v48 = vrot.slane %v461_v46, 7 }
 0x2ab   : > { %v494_v49 = vrot.slane %v484_v44, 6  ;;  %v445_v50 = vpop.permute.xlu1 %444  ;;  %v447_v51 = vpop.permute.xlu0 %446 }
 0x2ac   : > { %v471_v52 = vsel %vm196_vm1, %v469_v38, %v470_v47  ;;  %v473_v53 = vsel %vm196_vm1, %v470_v47, %v472_v48  ;;  %v457_v54 = vsel %vm453_vm14, %v445_v50, -1e+30  ;;  %v458_v55 = vsel %vm453_vm14, %v447_v51, -1e+30 }
 0x2ad   : > { %v508_v56 = vsel %vm222_vm9, 1e+30, %v494_v49  ;;  %v485_v57 = vmin.f32 %v460_v45, %v471_v52  ;;  %v486_v58 = vmin.f32 %v461_v46, %v473_v53  ;;  %v462_v59 = vsel %vm153_vm0, 1e+30, %v457_v54 }
 0x2ae   : > { %v509_v60 = vmin.f32 %v484_v44, %v508_v56  ;;  %v474_v61 = vrot.slane %v462_v59, 7  ;;  %v463_v62 = vsel %vm2885_vm8, 1e+30, %v458_v55  ;;  %vm937_vm14 = vcmask 1046528  }
 0x2af   : > { %v495_v63 = vrot.slane %v485_v57, 6  ;;  %v497_v0 = vrot.slane %v486_v58, 6  ;;  %v476_v4 = vrot.slane %v463_v62, 7 }
 0x2b0   : > { %v519_v5 = vrot.slane %v509_v60, 7  ;;  %v475_v6 = vsel %vm196_vm1, %v472_v48, %v474_v61 }
 0x2b1   : > { %v496_v7 = vsel %vm222_vm9, %v494_v49, %v495_v63  ;;  %v498_v8 = vsel %vm222_vm9, %v495_v63, %v497_v0  ;;  %v487_v9 = vmin.f32 %v462_v59, %v475_v6  ;;  %v477_v10 = vsel %vm196_vm1, %v474_v61, %v476_v4 }
 0x2b2   : > { %v510_v11 = vmin.f32 %v485_v57, %v496_v7  ;;  %v511_v12 = vmin.f32 %v486_v58, %v498_v8  ;;  %v488_v13 = vmin.f32 %v463_v62, %v477_v10  ;;  %v533_v14 = vsel %vm196_vm1, 1e+30, %v519_v5 }
 0x2b3   : > { %v499_v15 = vrot.slane %v487_v9, 6  ;;  %v534_v20 = vmin.f32 %v509_v60, %v533_v14 }
 0x2b4   : > { %v520_v16 = vrot.slane %v510_v11, 7  ;;  %v522_v17 = vrot.slane %v511_v12, 7  ;;  %v501_v18 = vrot.slane %v488_v13, 6 }
 0x2b5   : > { %v500_v19 = vsel %vm222_vm9, %v497_v0, %v499_v15  ;;  %v545_v31 = vrot.slane %v534_v20, 2 }
 0x2b6   : > { %v512_v21 = vmin.f32 %v487_v9, %v500_v19  ;;  %v502_v22 = vsel %vm222_vm9, %v499_v15, %v501_v18  ;;  %v521_v23 = vsel %vm196_vm1, %v519_v5, %v520_v16  ;;  %v523_v25 = vsel %vm196_vm1, %v520_v16, %v522_v17 }
 0x2b7   : > { %v513_v26 = vmin.f32 %v488_v13, %v502_v22  ;;  %v535_v27 = vmin.f32 %v510_v11, %v521_v23  ;;  %v536_v28 = vmin.f32 %v511_v12, %v523_v25 }
 0x2b8   : > { %v524_v29 = vrot.slane %v512_v21, 7 }
 0x2b9   : > { %v526_v30 = vrot.slane %v513_v26, 7  ;;  %v546_v32 = vrot.slane %v535_v27, 2  ;;  %v548_v33 = vrot.slane %v536_v28, 2 }
 0x2ba   : > { %v525_v34 = vsel %vm196_vm1, %v522_v17, %v524_v29 }
 0x2bb   : > { %v547_v35 = vsel %vm544_vm15, %v545_v31, %v546_v32  ;;  %v549_v36 = vsel %vm544_vm15, %v546_v32, %v548_v33  ;;  %v537_v37 = vmin.f32 %v512_v21, %v525_v34  ;;  %v527_v38 = vsel %vm196_vm1, %v524_v29, %v526_v30 }
 0x2bc   : > { %561 = vrot.lane.b32.xlu1 %v547_v35, %s2734_s16  ;;  %563 = vrot.lane.b32.xlu0 %v549_v36, %s2734_s16  ;;  %v538_v39 = vmin.f32 %v513_v26, %v527_v38 }
 0x2bd   : > { %v550_v40 = vrot.slane %v537_v37, 2 }
 0x2be   : > { %v552_v41 = vrot.slane %v538_v39, 2 }
 0x2bf   : > { %v551_v42 = vsel %vm544_vm15, %v548_v33, %v550_v40 }
 0x2c0   : > { %565 = vrot.lane.b32.xlu1 %v551_v42, %s2734_s16  ;;  %v553_v43 = vsel %vm544_vm15, %v550_v40, %v552_v41  ;;  %v559_v44 = vsel %vm544_vm15, %v552_v41, 1e+30 }
 0x2c1   : > { %567 = vrot.lane.b32.xlu0 %v553_v43, %s2734_s16 }
 0x2c4   : > { %569 = vrot.lane.b32.xlu1 %v559_v44, %s2734_s16 }
 0x32e   : > { %v562_v45 = vpop.permute.xlu1 %561  ;;  %v564_v46 = vpop.permute.xlu0 %563 }
 0x32f   : > { %v576_v47 = vsel %vm330_vm11, 1e+30, %v562_v45  ;;  %v577_v48 = vsel %vm330_vm11, 1e+30, %v564_v46 }
 0x330   : > { %v581_v49 = vmin.f32 %v547_v35, %v576_v47  ;;  %v582_v50 = vmin.f32 %v549_v36, %v577_v48 }
 0x332   : > { %v566_v51 = vpop.permute.xlu1 %565  ;;  %591 = vrot.lane.b32.xlu0 %v581_v49, %s2735_s24  ;;  %593 = vrot.lane.b32.xlu1 %v582_v50, %s2735_s24 }
 0x333   : > { %v578_v52 = vsel %vm330_vm11, 1e+30, %v566_v51  ;;  %v568_v53 = vpop.permute.xlu0 %567 }
 0x334   : > { %v583_v54 = vmin.f32 %v551_v42, %v578_v52  ;;  %v579_v55 = vsel %vm330_vm11, 1e+30, %v568_v53 }
 0x335   : > { %v584_v56 = vmin.f32 %v553_v43, %v579_v55 }
 0x336   : > { %v570_v57 = vpop.permute.xlu1 %569  ;;  %595 = vrot.lane.b32.xlu0 %v583_v54, %s2735_s24 }
 0x337   : > { %v580_v58 = vsel %vm330_vm11, 1e+30, %v570_v57  ;;  %597 = vrot.lane.b32.xlu1 %v584_v56, %s2735_s24 }
 0x338   : > { %v585_v59 = vmin.f32 %v559_v44, %v580_v58 }
 0x33a   : > { %599 = vrot.lane.b32.xlu0 %v585_v59, %s2735_s24 }
 0x3a4   : > { %v594_v60 = vpop.permute.xlu1 %593  ;;  %v592_v61 = vpop.permute.xlu0 %591 }
 0x3a5   : > { %v607_v62 = vsel %vm361_vm12, 1e+30, %v594_v60  ;;  %v606_v63 = vsel %vm361_vm12, 1e+30, %v592_v61 }
 0x3a6   : > { %v612_v0 = vmin.f32 %v582_v50, %v607_v62  ;;  %v611_v4 = vmin.f32 %v581_v49, %v606_v63 }
 0x3a8   : > { %623 = vrot.lane.b32.xlu0 %v612_v0, %s2734_s16  ;;  %621 = vrot.lane.b32.xlu1 %v611_v4, %s2734_s16  ;;  %v596_v5 = vpop.permute.xlu0 %595 }
 0x3a9   : > { %v598_v6 = vpop.permute.xlu1 %597  ;;  %v608_v7 = vsel %vm361_vm12, 1e+30, %v596_v5 }
 0x3aa   : > { %v609_v8 = vsel %vm361_vm12, 1e+30, %v598_v6  ;;  %v613_v9 = vmin.f32 %v583_v54, %v608_v7 }
 0x3ab   : > { %v614_v10 = vmin.f32 %v584_v56, %v609_v8 }
 0x3ac   : > { %625 = vrot.lane.b32.xlu1 %v613_v9, %s2734_s16  ;;  %v600_v11 = vpop.permute.xlu0 %599 }
 0x3ad   : > { %627 = vrot.lane.b32.xlu0 %v614_v10, %s2734_s16  ;;  %v610_v12 = vsel %vm361_vm12, 1e+30, %v600_v11 }
 0x3ae   : > { %v615_v13 = vmin.f32 %v585_v59, %v610_v12 }
 0x3b0   : > { %629 = vrot.lane.b32.xlu1 %v615_v13, %s2734_s16 }
 0x41a   : > { %v622_v14 = vpop.permute.xlu1 %621  ;;  %v624_v15 = vpop.permute.xlu0 %623 }
 0x41b   : > { %v636_v16 = vsel %vm330_vm11, 1e+30, %v622_v14  ;;  %v637_v17 = vsel %vm330_vm11, 1e+30, %v624_v15 }
 0x41c   : > { %v641_v18 = vmin.f32 %v611_v4, %v636_v16  ;;  %v642_v19 = vmin.f32 %v612_v0, %v637_v17 }
 0x41e   : > { %651 = vrot.lane.b32.xlu0 %v641_v18, %s2738_s28  ;;  %v626_v20 = vpop.permute.xlu1 %625  ;;  %653 = vrot.lane.b32.xlu1 %v642_v19, %s2738_s28 }
 0x41f   : > { %v638_v21 = vsel %vm330_vm11, 1e+30, %v626_v20  ;;  %v628_v22 = vpop.permute.xlu0 %627 }
 0x420   : > { %v643_v23 = vmin.f32 %v613_v9, %v638_v21  ;;  %v639_v25 = vsel %vm330_vm11, 1e+30, %v628_v22 }
 0x421   : > { %v644_v26 = vmin.f32 %v614_v10, %v639_v25 }
 0x422   : > { %655 = vrot.lane.b32.xlu0 %v643_v23, %s2738_s28  ;;  %v630_v27 = vpop.permute.xlu1 %629 }
 0x423   : > { %v640_v28 = vsel %vm330_vm11, 1e+30, %v630_v27  ;;  %657 = vrot.lane.b32.xlu1 %v644_v26, %s2738_s28 }
 0x424   : > { %v645_v29 = vmin.f32 %v615_v13, %v640_v28 }
 0x426   : > { %659 = vrot.lane.b32.xlu0 %v645_v29, %s2738_s28 }
 0x490   : > { %v654_v30 = vpop.permute.xlu1 %653  ;;  %v652_v31 = vpop.permute.xlu0 %651 }
 0x491   : > { %v3022_v32 = vsel %vm666_vm2, %v654_v30, 1e+30  ;;  %v3025_v33 = vsel %vm666_vm2, %v652_v31, 1e+30 }
 0x492   : > { %v678_v34 = vsel %vm153_vm0, -1e+30, %v3022_v32  ;;  %v677_v36 = vsel %vm153_vm0, -1e+30, %v3025_v33  ;;  %vm672_vm7 = vcmp.lt.f32.partialorder %v3025_v33, 0.1 }
 0x493   : > { %v688_v35 = vrot.slane %v678_v34, 7  ;;  %v687_v37 = vrot.slane %v677_v36, 7  ;;  %vm673_vm10 = vcmp.lt.f32.partialorder %v3022_v32, 0.1 }
 0x494   : > { %v656_v38 = vpop.permute.xlu0 %655 }
 0x495   : > { %v658_v39 = vpop.permute.xlu1 %657  ;;  %v3034_v40 = vsel %vm666_vm2, %v656_v38, 1e+30  ;;  %v689_v41 = vsel %vm196_vm1, %v687_v37, %v688_v35  ;;  %v701_v42 = vsel %vm196_vm1, -1e+30, %v687_v37 }
 0x496   : > { %v3039_v43 = vsel %vm666_vm2, %v658_v39, 1e+30  ;;  %v702_v44 = vmax.f32 %v677_v36, %v701_v42  ;;  %v703_v45 = vmax.f32 %v678_v34, %v689_v41  ;;  %v679_v48 = vsel %vm153_vm0, -1e+30, %v3034_v40 }
 0x497   : > { %v680_v46 = vsel %vm153_vm0, -1e+30, %v3039_v43  ;;  %v690_v52 = vrot.slane %v679_v48, 7  ;;  %vm674_vm13 = vcmp.lt.f32.partialorder %v3034_v40, 0.1 }
 0x498   : > { %v692_v47 = vrot.slane %v680_v46, 7  ;;  %v660_v49 = vpop.permute.xlu0 %659  ;;  %v712_v50 = vrot.slane %v702_v44, 6  ;;  %v713_v51 = vrot.slane %v703_v45, 6 }
 0x499   : > { %v3048_v53 = vsel %vm666_vm2, %v660_v49, 1e+30  ;;  %v691_v56 = vsel %vm196_vm1, %v688_v35, %v690_v52 }
 0x49a   : > { %v681_v54 = vsel %vm2885_vm8, -1e+30, %v3048_v53  ;;  %v726_v55 = vsel %vm222_vm9, -1e+30, %v712_v50  ;;  %v693_v57 = vsel %vm196_vm1, %v690_v52, %v692_v47  ;;  %v704_v60 = vmax.f32 %v679_v48, %v691_v56 }
 0x49b   : > { %v694_v58 = vrot.slane %v681_v54, 7  ;;  %v727_v59 = vmax.f32 %v702_v44, %v726_v55  ;;  %v705_v61 = vmax.f32 %v680_v46, %v693_v57  ;;  %v714_v62 = vsel %vm222_vm9, %v712_v50, %v713_v51 }
 0x49c   : > { %v728_v0 = vmax.f32 %v703_v45, %v714_v62  ;;  %v715_v5 = vrot.slane %v704_v60, 6 }
 0x49d   : > { %v695_v63 = vsel %vm196_vm1, %v692_v47, %v694_v58  ;;  %v738_v4 = vrot.slane %v727_v59, 5  ;;  %v717_v6 = vrot.slane %v705_v61, 6 }
 0x49e   : > { %v706_v7 = vmax.f32 %v681_v54, %v695_v63  ;;  %v739_v8 = vrot.slane %v728_v0, 5  ;;  %v716_v9 = vsel %vm222_vm9, %v713_v51, %v715_v5 }
 0x49f   : > { %v752_v11 = vsel %vm737_vm3, -1e+30, %v738_v4  ;;  %v718_v12 = vsel %vm222_vm9, %v715_v5, %v717_v6  ;;  %v729_v13 = vmax.f32 %v704_v60, %v716_v9 }
 0x4a0   : > { %v719_v10 = vrot.slane %v706_v7, 6  ;;  %v740_v14 = vsel %vm737_vm3, %v738_v4, %v739_v8  ;;  %v753_v15 = vmax.f32 %v727_v59, %v752_v11  ;;  %v730_v16 = vmax.f32 %v705_v61, %v718_v12 }
 0x4a1   : > { %v754_v17 = vmax.f32 %v728_v0, %v740_v14  ;;  %v741_v19 = vrot.slane %v729_v13, 5 }
 0x4a2   : > { %v720_v18 = vsel %vm222_vm9, %v717_v6, %v719_v10  ;;  %v764_v20 = vrot.slane %v753_v15, 3  ;;  %v743_v21 = vrot.slane %v730_v16, 5 }
 0x4a3   : > { %v731_v22 = vmax.f32 %v706_v7, %v720_v18  ;;  %v765_v23 = vrot.slane %v754_v17, 3  ;;  %v742_v25 = vsel %vm737_vm3, %v739_v8, %v741_v19 }
 0x4a4   : > { %v744_v26 = vsel %vm737_vm3, %v741_v19, %v743_v21  ;;  %v755_v29 = vmax.f32 %v729_v13, %v742_v25 }
 0x4a5   : > { %v745_v27 = vrot.slane %v731_v22, 5  ;;  %v766_v28 = vsel %vm763_vm4, %v764_v20, %v765_v23  ;;  %v756_v30 = vmax.f32 %v730_v16, %v744_v26 }
 0x4a6   : > { %780 = vrot.lane.b32.xlu1 %v766_v28, %s2734_s16  ;;  %v767_v34 = vrot.slane %v755_v29, 3 }
 0x4a7   : > { %v746_v31 = vsel %vm737_vm3, %v743_v21, %v745_v27  ;;  %v769_v35 = vrot.slane %v756_v30, 3  ;;  %vm675_vm3 = vcmp.lt.f32.partialorder %v3039_v43, 0.1 }
 0x4a8   : > { %v757_v36 = vmax.f32 %v731_v22, %v746_v31  ;;  %v768_v38 = vsel %vm763_vm4, %v765_v23, %v767_v34 }
 0x4a9   : > { %v770_v37 = vsel %vm763_vm4, %v767_v34, %v769_v35  ;;  %782 = vrot.lane.b32.xlu0 %v768_v38, %s2734_s16 }
 0x4aa   : > { %v771_v39 = vrot.slane %v757_v36, 3  ;;  %784 = vrot.lane.b32.xlu1 %v770_v37, %s2734_s16 }
 0x4ac   : > { %v778_v41 = vsel %vm763_vm4, %v771_v39, -1e+30  ;;  %v772_v42 = vsel %vm763_vm4, %v769_v35, %v771_v39  ;;  %vm676_vm4 = vcmp.lt.f32.partialorder %v3048_v53, 0.1 }
 0x4ad   : > { %786 = vrot.lane.b32.xlu0 %v772_v42, %s2734_s16 }
 0x4ae   : > { %788 = vrot.lane.b32.xlu1 %v778_v41, %s2734_s16 }
 0x518   : > { %v781_v44 = vpop.permute.xlu1 %780 }
 0x519   : > { %v795_v45 = vsel %vm330_vm11, -1e+30, %v781_v44 }
 0x51a   : > { %v800_v46 = vmax.f32 %v766_v28, %v795_v45 }
 0x51b   : > { %v783_v48 = vpop.permute.xlu0 %782 }
 0x51c   : > { %v785_v47 = vpop.permute.xlu1 %784  ;;  %810 = vrot.lane.b32.xlu0 %v800_v46, %s2735_s24  ;;  %v796_v50 = vsel %vm330_vm11, -1e+30, %v783_v48 }
 0x51d   : > { %v797_v49 = vsel %vm330_vm11, -1e+30, %v785_v47  ;;  %v801_v52 = vmax.f32 %v768_v38, %v796_v50 }
 0x51e   : > { %v802_v51 = vmax.f32 %v770_v37, %v797_v49 }
 0x51f   : > { %812 = vrot.lane.b32.xlu1 %v801_v52, %s2735_s24  ;;  %v787_v55 = vpop.permute.xlu0 %786 }
 0x520   : > { %v789_v54 = vpop.permute.xlu1 %788  ;;  %814 = vrot.lane.b32.xlu0 %v802_v51, %s2735_s24  ;;  %v798_v57 = vsel %vm330_vm11, -1e+30, %v787_v55 }
 0x521   : > { %v799_v56 = vsel %vm330_vm11, -1e+30, %v789_v54  ;;  %v803_v59 = vmax.f32 %v772_v42, %v798_v57 }
 0x522   : > { %v804_v58 = vmax.f32 %v778_v41, %v799_v56 }
 0x523   : > { %816 = vrot.lane.b32.xlu1 %v803_v59, %s2735_s24 }
 0x524   : > { %818 = vrot.lane.b32.xlu0 %v804_v58, %s2735_s24 }
 0x58e   : > { %v811_v60 = vpop.permute.xlu0 %810 }
 0x58f   : > { %v825_v61 = vsel %vm361_vm12, -1e+30, %v811_v60 }
 0x590   : > { %v830_v62 = vmax.f32 %v800_v46, %v825_v61 }
 0x591   : > { %v813_v63 = vpop.permute.xlu1 %812 }
 0x592   : > { %840 = vrot.lane.b32.xlu1 %v830_v62, %s2739_s30  ;;  %v815_v0 = vpop.permute.xlu0 %814  ;;  %v826_v4 = vsel %vm361_vm12, -1e+30, %v813_v63 }
 0x593   : > { %v827_v5 = vsel %vm361_vm12, -1e+30, %v815_v0  ;;  %v831_v6 = vmax.f32 %v801_v52, %v826_v4 }
 0x594   : > { %v832_v7 = vmax.f32 %v802_v51, %v827_v5 }
 0x595   : > { %842 = vrot.lane.b32.xlu0 %v831_v6, %s2739_s30  ;;  %v817_v8 = vpop.permute.xlu1 %816 }
 0x596   : > { %844 = vrot.lane.b32.xlu1 %v832_v7, %s2739_s30  ;;  %v819_v9 = vpop.permute.xlu0 %818  ;;  %v828_v10 = vsel %vm361_vm12, -1e+30, %v817_v8 }
 0x597   : > { %v829_v11 = vsel %vm361_vm12, -1e+30, %v819_v9  ;;  %v833_v12 = vmax.f32 %v803_v59, %v828_v10 }
 0x598   : > { %v834_v13 = vmax.f32 %v804_v58, %v829_v11 }
 0x599   : > { %846 = vrot.lane.b32.xlu0 %v833_v12, %s2739_s30 }
 0x59a   : > { %848 = vrot.lane.b32.xlu1 %v834_v13, %s2739_s30 }
 0x604   : > { %v841_v14 = vpop.permute.xlu1 %840 }
 0x605   : > { %v856_v15 = vsel %vm855_vm5, -1e+30, %v841_v14 }
 0x606   : > { %v861_v16 = vmax.f32 %v830_v62, %v856_v15 }
 0x607   : > { %v843_v18 = vpop.permute.xlu0 %842 }
 0x608   : > { %871 = vrot.lane.b32.xlu0 %v861_v16, %s2740_s2  ;;  %v845_v17 = vpop.permute.xlu1 %844  ;;  %v857_v20 = vsel %vm855_vm5, -1e+30, %v843_v18 }
 0x609   : > { %v858_v19 = vsel %vm855_vm5, -1e+30, %v845_v17  ;;  %v862_v22 = vmax.f32 %v831_v6, %v857_v20 }
 0x60a   : > { %v863_v21 = vmax.f32 %v832_v7, %v858_v19 }
 0x60b   : > { %873 = vrot.lane.b32.xlu1 %v862_v22, %s2740_s2  ;;  %v847_v25 = vpop.permute.xlu0 %846 }
 0x60c   : > { %875 = vrot.lane.b32.xlu0 %v863_v21, %s2740_s2  ;;  %v849_v23 = vpop.permute.xlu1 %848  ;;  %v859_v27 = vsel %vm855_vm5, -1e+30, %v847_v25 }
 0x60d   : > { %v860_v26 = vsel %vm855_vm5, -1e+30, %v849_v23  ;;  %v864_v29 = vmax.f32 %v833_v12, %v859_v27  ;;  %vm1128_vm5 = vcmask 1039360  }
 0x60e   : > { %v865_v28 = vmax.f32 %v834_v13, %v860_v26 }
 0x60f   : > { %877 = vrot.lane.b32.xlu1 %v864_v29, %s2740_s2 }
 0x610   : > { %879 = vrot.lane.b32.xlu0 %v865_v28, %s2740_s2 }
 0x67a   : > { %v872_v30 = vpop.permute.xlu0 %871 }
 0x67b   : > { %v887_v31 = vsel %vm886_vm6, %v872_v30, -1e+30 }
 0x67c   : > { %v892_v34 = vsel %vm672_vm7, %v887_v31, %v3025_v33 }
 0x67d   : > { %v3101_v35 = vsel %vm153_vm0, 0.0, %v892_v34  ;;  %v874_v38 = vpop.permute.xlu1 %873 }
 0x67e   : > { %v907_v36 = vrot.slane %v3101_v35, 6  ;;  %v922_v37 = vrot.slane %v3101_v35, 7  ;;  %v876_v39 = vpop.permute.xlu0 %875  ;;  %v888_v41 = vsel %vm886_vm6, %v874_v38, -1e+30  ;;  %v953_v5 = vrot.slane %v3101_v35, 2 }
 0x67f   : > { %v889_v42 = vsel %vm886_vm6, %v876_v39, -1e+30  ;;  %v893_v45 = vsel %vm673_vm10, %v888_v41, %v3022_v32  ;;  %v938_v32 = vrot.slane %v3101_v35, 1 }
 0x680   : > { %v921_v33 = vsel %vm222_vm9, 0.0, %v907_v36  ;;  %v936_v44 = vsel %vm196_vm1, 0.0, %v922_v37  ;;  %v894_v46 = vsel %vm674_vm13, %v889_v42, %v3034_v40  ;;  %v3115_v48 = vsel %vm153_vm0, 0.0, %v893_v45 }
 0x681   : > { %v973_v47 = vmax.f32 %v921_v33, %v936_v44  ;;  %v3119_v49 = vsel %vm153_vm0, 0.0, %v894_v46  ;;  %v908_v50 = vrot.slane %v3115_v48, 6  ;;  %v923_v51 = vrot.slane %v3115_v48, 7  ;;  %v878_v60 = vpop.permute.xlu1 %877 }
 0x682   : > { %v939_v52 = vrot.slane %v3115_v48, 1  ;;  %v910_v40 = vrot.slane %v3119_v49, 6  ;;  %v925_v54 = vrot.slane %v3119_v49, 7  ;;  %v880_v61 = vpop.permute.xlu0 %879  ;;  %v941_v4 = vrot.slane %v3119_v49, 1 }
 0x683   : > { %v909_v55 = vsel %vm222_vm9, %v907_v36, %v908_v50  ;;  %v924_v56 = vsel %vm196_vm1, %v922_v37, %v923_v51  ;;  %v3130_v57 = vmin.f32 %v973_v47, %v3101_v35  ;;  %v983_v58 = vmax.f32 %v973_v47, %v3101_v35 }
 0x684   : > { %v940_v59 = vsel %vm937_vm14, %v938_v32, %v939_v52  ;;  %v974_v62 = vmax.f32 %v909_v55, %v924_v56  ;;  %v911_v63 = vsel %vm222_vm9, %v908_v50, %v910_v40  ;;  %v926_v0 = vsel %vm196_vm1, %v923_v51, %v925_v54 }
 0x685   : > { %v3140_v6 = vmin.f32 %v921_v33, %v936_v44  ;;  %v954_v7 = vrot.slane %v3115_v48, 2  ;;  %v975_v8 = vmax.f32 %v911_v63, %v926_v0  ;;  %v890_v9 = vsel %vm886_vm6, %v878_v60, -1e+30 }
 0x686   : > { %v891_v10 = vsel %vm886_vm6, %v880_v61, -1e+30  ;;  %v3149_v12 = vmin.f32 %v909_v55, %v924_v56  ;;  %v3151_v13 = vmin.f32 %v983_v58, %v940_v59  ;;  %v895_v14 = vsel %vm675_vm3, %v890_v9, %v3039_v43 }
 0x687   : > { %v3147_v11 = vmax.f32 %v3140_v6, %v3130_v57  ;;  %v3155_v15 = vmin.f32 %v974_v62, %v3115_v48  ;;  %v942_v16 = vsel %vm937_vm14, %v939_v52, %v941_v4  ;;  %v900_v17 = vsel %vm153_vm0, 0.0, %v895_v14 }
 0x688   : > { %v896_v18 = vsel %vm676_vm4, %v891_v10, %v3048_v53  ;;  %v984_v19 = vmax.f32 %v974_v62, %v3115_v48  ;;  %v912_v20 = vrot.slane %v900_v17, 6  ;;  %v927_v21 = vrot.slane %v900_v17, 7 }
 0x689   : > { %v943_v22 = vrot.slane %v900_v17, 1  ;;  %v956_v23 = vrot.slane %v3119_v49, 2  ;;  %v3164_v25 = vmin.f32 %v975_v8, %v3119_v49  ;;  %v901_v43 = vsel %vm2885_vm8, 0.0, %v896_v18 }
 0x68a   : > { %v993_v26 = vmax.f32 %v983_v58, %v940_v59  ;;  %v985_v27 = vmax.f32 %v975_v8, %v3119_v49  ;;  %v913_v28 = vsel %vm222_vm9, %v910_v40, %v912_v20  ;;  %v928_v53 = vsel %vm196_vm1, %v925_v54, %v927_v21 }
 0x68b   : > { %v914_v29 = vrot.slane %v901_v43, 6  ;;  %v944_v30 = vsel %vm937_vm14, %v941_v4, %v943_v22  ;;  %v976_v31 = vmax.f32 %v913_v28, %v928_v53  ;;  %v929_v34 = vrot.slane %v901_v43, 7 }
 0x68c   : > { %v955_v35 = vsel %vm544_vm15, %v953_v5, %v954_v7  ;;  %v3173_v36 = vmin.f32 %v911_v63, %v926_v0  ;;  %v945_v38 = vrot.slane %v901_v43, 1  ;;  %v3180_v41 = vmax.f32 %v3149_v12, %v3155_v15 }
 0x68d   : > { %v915_v37 = vsel %vm222_vm9, %v912_v20, %v914_v29  ;;  %v3176_v39 = vmax.f32 %v993_v26, %v955_v35  ;;  %v3182_v42 = vmin.f32 %v984_v19, %v942_v16  ;;  %v958_v33 = vrot.slane %v900_v17, 2 }
 0x68e   : > { %v930_v44 = vsel %vm196_vm1, %v927_v21, %v929_v34  ;;  %v3187_v45 = vmax.f32 %v3173_v36, %v3164_v25  ;;  %v3189_v46 = vmin.f32 %v913_v28, %v928_v53  ;;  %v986_v47 = vmax.f32 %v976_v31, %v900_v17 }
 0x68f   : > { %4782 = vst [vmem:[#allocation12_spill] sm:$0xff] %v3176_v39  ;;  %v3191_v48 = vmin.f32 %v985_v27, %v944_v30  ;;  %1959 = vrot.lane.b32.xlu1 %v3176_v39, %s2741_s3  ;;  %v3195_v49 = vmin.f32 %v976_v31, %v900_v17  ;;  %v960_v50 = vrot.slane %v901_v43, 2  ;;  %v977_v51 = vmax.f32 %v915_v37, %v930_v44 }
 0x690   : > { %v957_v52 = vsel %vm544_vm15, %v954_v7, %v956_v23  ;;  %v946_v32 = vsel %vm937_vm14, %v943_v22, %v945_v38  ;;  %v952_v40 = vsel %vm937_vm14, %v945_v38, 0.0  ;;  %v994_v54 = vmax.f32 %v984_v19, %v942_v16 }
 0x691   : > { %v995_v55 = vmax.f32 %v985_v27, %v944_v30  ;;  %v3200_v56 = vmin.f32 %v977_v51, %v901_v43  ;;  %v987_v58 = vmax.f32 %v977_v51, %v901_v43  ;;  %v959_v59 = vsel %vm544_vm15, %v956_v23, %v958_v33 }
 0x692   : > { %v998_v60 = vmin.f32 %v993_v26, %v955_v35  ;;  %v3203_v61 = vmax.f32 %v994_v54, %v957_v52  ;;  %v1023_v63 = vmax.f32 %v3147_v11, %v3151_v13  ;;  %v996_v0 = vmax.f32 %v986_v47, %v946_v32 }
 0x693   : > { %v3205_v62 = vmax.f32 %v995_v55, %v959_v59  ;;  %v972_v4 = vmin.f32 %v915_v37, %v930_v44  ;;  %v997_v5 = vmax.f32 %v987_v58, %v952_v40  ;;  %v961_v7 = vsel %vm544_vm15, %v958_v33, %v960_v50 }
 0x694   : > { %4783 = vst [vmem:[#allocation13_spill] sm:$0xff] %v3203_v61  ;;  %v1016_v8 = vmax.f32 %v3189_v46, %v3195_v49  ;;  %v967_v9 = vsel %vm544_vm15, %v960_v50, 0.0  ;;  %v991_v10 = vmin.f32 %v986_v47, %v946_v32  ;;  %1961 = vrot.lane.b32.xlu0 %v3203_v61, %s2741_s3  ;;  %v3217_v14 = vmax.f32 %v996_v0, %v961_v7 }
 0x695   : > { %4784 = vst [vmem:[#allocation14_spill] sm:$0xff] %v3205_v62  ;;  %1963 = vrot.lane.b32.xlu1 %v3205_v62, %s2741_s3  ;;  %v992_v16 = vmin.f32 %v987_v58, %v952_v40  ;;  %v3219_v17 = vmax.f32 %v997_v5, %v967_v9  ;;  %v1017_v18 = vmax.f32 %v972_v4, %v3200_v56 }
 0x696   : > { %4785 = vst [vmem:[#allocation15_spill] sm:$0xff] %v3217_v14  ;;  %v1000_v19 = vmin.f32 %v995_v55, %v959_v59  ;;  %v3222_v20 = vmax.f32 %v1023_v63, %v998_v60  ;;  %v1025_v21 = vmax.f32 %v3187_v45, %v3191_v48  ;;  %v999_v22 = vmin.f32 %v994_v54, %v957_v52 }
 0x697   : > { %4786 = vst [vmem:[#allocation16_spill] sm:$0xff] %v3219_v17  ;;  %v1024_v23 = vmax.f32 %v3180_v41, %v3182_v42  ;;  %v1002_v43 = vmin.f32 %v997_v5, %v967_v9  ;;  %v1027_v26 = vmax.f32 %v1017_v18, %v992_v16  ;;  %v1001_v53 = vmin.f32 %v996_v0, %v961_v7 }
 0x698   : > { %1965 = vrot.lane.b32.xlu0 %v3217_v14, %s2741_s3  ;;  %v3232_v27 = vmax.f32 %v1025_v21, %v1000_v19  ;;  %v1026_v29 = vmax.f32 %v1016_v8, %v991_v10  ;;  %v1018_v34 = vmin.f32 %v3147_v11, %v3151_v13  ;;  %v1008_v35 = vmin.f32 %v3140_v6, %v3130_v57 }
 0x699   : > { %1584 = vrot.lane.b32.xlu1 %v3222_v20, %s2735_s24  ;;  %v3234_v28 = vmax.f32 %v1024_v23, %v999_v22  ;;  %v3242_v31 = vmax.f32 %v1027_v26, %v1002_v43  ;;  %v1028_v37 = vmin.f32 %v1023_v63, %v998_v60  ;;  %v1019_v33 = vmin.f32 %v3180_v41, %v3182_v42 }
 0x69a   : > { %v3240_v30 = vmax.f32 %v1026_v29, %v1001_v53  ;;  %v1043_v38 = vmax.f32 %v1008_v35, %v1018_v34  ;;  %v1020_v44 = vmin.f32 %v3187_v45, %v3191_v48  ;;  %v1009_v11 = vmin.f32 %v3149_v12, %v3155_v15 }
 0x69b   : > { %v1010_v57 = vmin.f32 %v3173_v36, %v3164_v25  ;;  %v1022_v6 = vmin.f32 %v1017_v18, %v992_v16  ;;  %v1029_v13 = vmin.f32 %v1024_v23, %v999_v22  ;;  %v1030_v47 = vmin.f32 %v1025_v21, %v1000_v19 }
 0x69c   : > { %1586 = vrot.lane.b32.xlu0 %v3234_v28, %s2735_s24  ;;  %v3288_v50 = vmax.f32 %v1043_v38, %v1028_v37  ;;  %v1044_v41 = vmax.f32 %v1009_v11, %v1019_v33  ;;  %v1021_v45 = vmin.f32 %v1016_v8, %v991_v10  ;;  %v1012_v48 = vmin.f32 %v972_v4, %v3200_v56 }
 0x69d   : > { %1588 = vrot.lane.b32.xlu1 %v3232_v27, %s2735_s24  ;;  %v1045_v42 = vmax.f32 %v1010_v57, %v1020_v44  ;;  %v1011_v12 = vmin.f32 %v3189_v46, %v3195_v49  ;;  %v1032_v15 = vmin.f32 %v1027_v26, %v1002_v43  ;;  %v1031_v52 = vmin.f32 %v1026_v29, %v1001_v53 }
 0x69e   : > { %v1047_v25 = vmax.f32 %v1012_v48, %v1022_v6  ;;  %v3297_v36 = vmax.f32 %v1044_v41, %v1029_v13  ;;  %v1048_v40 = vmin.f32 %v1043_v38, %v1028_v37  ;;  %v1038_v54 = vmin.f32 %v1008_v35, %v1018_v34 }
 0x69f   : > { %v3299_v51 = vmax.f32 %v1045_v42, %v1030_v47  ;;  %v1046_v32 = vmax.f32 %v1011_v12, %v1021_v45  ;;  %v1049_v56 = vmin.f32 %v1044_v41, %v1029_v13  ;;  %v1050_v58 = vmin.f32 %v1045_v42, %v1030_v47 }
 0x6a0   : > { %1590 = vrot.lane.b32.xlu0 %v3240_v30, %s2735_s24  ;;  %v3307_v49 = vmax.f32 %v1047_v25, %v1032_v15  ;;  %v3341_v55 = vmin.f32 %v1038_v54, %v1048_v40  ;;  %v1039_v59 = vmin.f32 %v1009_v11, %v1019_v33  ;;  %v1040_v60 = vmin.f32 %v1010_v57, %v1020_v44 }
 0x6a1   : > { %1592 = vrot.lane.b32.xlu1 %v3242_v31, %s2735_s24  ;;  %v3305_v46 = vmax.f32 %v1046_v32, %v1031_v52  ;;  %v1051_v4 = vmin.f32 %v1046_v32, %v1031_v52  ;;  %v1052_v5 = vmin.f32 %v1047_v25, %v1032_v15  ;;  %v1042_v7 = vmin.f32 %v1012_v48, %v1022_v6 }
 0x6a2   : > { %v3347_v63 = vmin.f32 %v1039_v59, %v1049_v56  ;;  %v3349_v0 = vmin.f32 %v1040_v60, %v1050_v58  ;;  %v1041_v8 = vmin.f32 %v1011_v12, %v1021_v45  ;;  %v3405_v26 = vmax.f32 %v1038_v54, %v1048_v40 }
 0x6a3   : > { %v3357_v10 = vmin.f32 %v1042_v7, %v1052_v5  ;;  %v3415_v34 = vmax.f32 %v1039_v59, %v1049_v56  ;;  %v3417_v35 = vmax.f32 %v1040_v60, %v1050_v58  ;;  %v3445_v13 = vmax.f32 %v1042_v7, %v1052_v5 }
 0x6a4   : > { %1604 = vrot.lane.b32.xlu0 %v3222_v20, %s2734_s16  ;;  %4787 = vst [vmem:[#allocation17_spill] sm:$0xff] %v3349_v0  ;;  %v3355_v9 = vmin.f32 %v1041_v8, %v1051_v4  ;;  %4789 = vst [vmem:[#allocation19_spill] sm:$0xff] %v3405_v26  ;;  %v3435_v11 = vmax.f32 %v1041_v8, %v1051_v4 }
 0x6a5   : > { %1606 = vrot.lane.b32.xlu1 %v3234_v28, %s2734_s16  ;;  %4790 = vst [vmem:[#allocation20_spill] sm:$0xff] %v3415_v34  ;;  %4791 = vst [vmem:[#allocation21_spill] sm:$0xff] %v3417_v35 }
 0x6a6   : > { %4788 = vst [vmem:[#allocation18_spill] sm:$0xff] %v3355_v9  ;;  %4792 = vst [vmem:[#allocation22_spill] sm:$0xff] %v3435_v11 }
 0x6a7   : > { %4793 = vst [vmem:[#allocation23_spill] sm:$0xff] %v3445_v13 }
 0x6a8   : > { %1608 = vrot.lane.b32.xlu0 %v3232_v27, %s2734_s16 }
 0x6a9   : > { %1610 = vrot.lane.b32.xlu1 %v3240_v30, %s2734_s16 }
 0x6ac   : > { %1612 = vrot.lane.b32.xlu0 %v3242_v31, %s2734_s16 }
 0x6ad   : > { %1624 = vrot.lane.b32.xlu1 %v3222_v20, %s2741_s3 }
 0x6b0   : > { %1626 = vrot.lane.b32.xlu0 %v3234_v28, %s2741_s3 }
 0x6b1   : > { %1628 = vrot.lane.b32.xlu1 %v3232_v27, %s2741_s3 }
 0x6b4   : > { %1630 = vrot.lane.b32.xlu0 %v3240_v30, %s2741_s3 }
 0x6b5   : > { %1632 = vrot.lane.b32.xlu1 %v3242_v31, %s2741_s3 }
 0x6b8   : > { %1644 = vrot.lane.b32.xlu0 %v3222_v20, %s2738_s28 }
 0x6b9   : > { %1646 = vrot.lane.b32.xlu1 %v3234_v28, %s2738_s28 }
 0x6bc   : > { %1648 = vrot.lane.b32.xlu0 %v3232_v27, %s2738_s28 }
 0x6bd   : > { %1650 = vrot.lane.b32.xlu1 %v3240_v30, %s2738_s28 }
 0x6c0   : > { %1652 = vrot.lane.b32.xlu0 %v3242_v31, %s2738_s28 }
 0x6c1   : > { %1359 = vrot.lane.b32.xlu1 %v3288_v50, %s2735_s24 }
 0x6c4   : > { %1361 = vrot.lane.b32.xlu0 %v3297_v36, %s2735_s24 }
 0x6c5   : > { %1363 = vrot.lane.b32.xlu1 %v3299_v51, %s2735_s24 }
 0x6c8   : > { %1365 = vrot.lane.b32.xlu0 %v3305_v46, %s2735_s24 }
 0x6c9   : > { %1367 = vrot.lane.b32.xlu1 %v3307_v49, %s2735_s24 }
 0x6cc   : > { %1379 = vrot.lane.b32.xlu0 %v3288_v50, %s2734_s16 }
 0x6cd   : > { %1381 = vrot.lane.b32.xlu1 %v3297_v36, %s2734_s16 }
 0x6d0   : > { %1383 = vrot.lane.b32.xlu0 %v3299_v51, %s2734_s16 }
 0x6d1   : > { %1385 = vrot.lane.b32.xlu1 %v3305_v46, %s2734_s16 }
 0x6d4   : > { %1387 = vrot.lane.b32.xlu0 %v3307_v49, %s2734_s16 }
 0x6d5   : > { %1399 = vrot.lane.b32.xlu1 %v3288_v50, %s2741_s3 }
 0x6d8   : > { %1401 = vrot.lane.b32.xlu0 %v3297_v36, %s2741_s3 }
 0x6d9   : > { %1403 = vrot.lane.b32.xlu1 %v3299_v51, %s2741_s3 }
 0x6dc   : > { %1405 = vrot.lane.b32.xlu0 %v3305_v46, %s2741_s3 }
 0x6dd   : > { %1407 = vrot.lane.b32.xlu1 %v3307_v49, %s2741_s3 }
 0x6e0   : > { %1419 = vrot.lane.b32.xlu0 %v3288_v50, %s2738_s28 }
 0x6e1   : > { %1421 = vrot.lane.b32.xlu1 %v3297_v36, %s2738_s28 }
 0x6e4   : > { %1423 = vrot.lane.b32.xlu0 %v3299_v51, %s2738_s28 }
 0x6e5   : > { %1425 = vrot.lane.b32.xlu1 %v3305_v46, %s2738_s28 }
 0x6e8   : > { %1427 = vrot.lane.b32.xlu0 %v3307_v49, %s2738_s28 }
 0x6e9   : > { %1073 = vrot.lane.b32.xlu1 %v3341_v55, %s2735_s24 }
 0x6ec   : > { %1075 = vrot.lane.b32.xlu0 %v3347_v63, %s2735_s24 }
 0x6ed   : > { %1077 = vrot.lane.b32.xlu1 %v3349_v0, %s2735_s24 }
 0x6f0   : > { %1079 = vrot.lane.b32.xlu0 %v3355_v9, %s2735_s24 }
 0x6f1   : > { %1081 = vrot.lane.b32.xlu1 %v3357_v10, %s2735_s24 }
 0x6f4   : > { %1093 = vrot.lane.b32.xlu0 %v3341_v55, %s2734_s16 }
 0x6f5   : > { %1095 = vrot.lane.b32.xlu1 %v3347_v63, %s2734_s16 }
 0x6f8   : > { %1097 = vrot.lane.b32.xlu0 %v3349_v0, %s2734_s16 }
 0x6f9   : > { %1099 = vrot.lane.b32.xlu1 %v3355_v9, %s2734_s16 }
 0x6fc   : > { %1101 = vrot.lane.b32.xlu0 %v3357_v10, %s2734_s16 }
 0x6fd   : > { %1113 = vrot.lane.b32.xlu1 %v3341_v55, %s2741_s3 }
 0x700   : > { %1115 = vrot.lane.b32.xlu0 %v3347_v63, %s2741_s3 }
 0x701   : > { %1117 = vrot.lane.b32.xlu1 %v3349_v0, %s2741_s3  ;;  %v3379_v16 = vpop.permute.xlu1 %1959 }
 0x704   : > { %1119 = vrot.lane.b32.xlu0 %v3355_v9, %s2741_s3 }
 0x705   : > { %1121 = vrot.lane.b32.xlu1 %v3357_v10, %s2741_s3 }
 0x706   : > { %v3387_v19 = vpop.permute.xlu0 %1961 }
 0x707   : > { %v3385_v18 = vpop.permute.xlu1 %1963 }
 0x708   : > { %1134 = vrot.lane.b32.xlu0 %v3341_v55, %s2738_s28 }
 0x709   : > { %1136 = vrot.lane.b32.xlu1 %v3347_v63, %s2738_s28 }
 0x70a   : > { %v3395_v22 = vpop.permute.xlu0 %1965 }
 0x70b   : > { %v3393_v21 = vpop.permute.xlu1 %1584 }
 0x70c   : > { %1138 = vrot.lane.b32.xlu0 %v3349_v0, %s2738_s28 }
 0x70d   : > { %1140 = vrot.lane.b32.xlu1 %v3355_v9, %s2738_s28 }
 0x70e   : > { %v3403_v43 = vpop.permute.xlu0 %1586 }
 0x70f   : > { %v3401_v23 = vpop.permute.xlu1 %1588 }
 0x710   : > { %1142 = vrot.lane.b32.xlu0 %v3357_v10, %s2738_s28 }
 0x711   : > { %1214 = vrot.lane.b32.xlu1 %v3405_v26, %s2735_s24 }
 0x712   : > { %v3413_v29 = vpop.permute.xlu0 %1590 }
 0x713   : > { %v3411_v53 = vpop.permute.xlu1 %1592 }
 0x714   : > { %1216 = vrot.lane.b32.xlu0 %v3415_v34, %s2735_s24 }
 0x715   : > { %1218 = vrot.lane.b32.xlu1 %v3417_v35, %s2735_s24 }
 0x716   : > { %v3425_v38 = vpop.permute.xlu0 %1604 }
 0x717   : > { %v3423_v37 = vpop.permute.xlu1 %1606 }
 0x718   : > { %1254 = vrot.lane.b32.xlu0 %v3405_v26, %s2741_s3 }
 0x719   : > { %1256 = vrot.lane.b32.xlu1 %v3415_v34, %s2741_s3 }
 0x71a   : > { %v3433_v44 = vpop.permute.xlu0 %1608 }
 0x71b   : > { %v3431_v33 = vpop.permute.xlu1 %1610 }
 0x71c   : > { %1258 = vrot.lane.b32.xlu0 %v3417_v35, %s2741_s3 }
 0x71d   : > { %1260 = vrot.lane.b32.xlu1 %v3435_v11, %s2741_s3 }
 0x71e   : > { %v3443_v6 = vpop.permute.xlu0 %1612 }
 0x71f   : > { %v3441_v57 = vpop.permute.xlu1 %1624 }
 0x720   : > { %1262 = vrot.lane.b32.xlu0 %v3445_v13, %s2741_s3 }
 0x721   : > { %1274 = vrot.lane.b32.xlu1 %v3405_v26, %s2738_s28 }
 0x722   : > { %v3453_v41 = vpop.permute.xlu0 %1626 }
 0x723   : > { %v3451_v47 = vpop.permute.xlu1 %1628 }
 0x724   : > { %1276 = vrot.lane.b32.xlu0 %v3415_v34, %s2738_s28 }
 0x725   : > { %1278 = vrot.lane.b32.xlu1 %v3417_v35, %s2738_s28 }
 0x726   : > { %v3461_v45 = vpop.permute.xlu0 %1630 }
 0x727   : > { %v3459_v42 = vpop.permute.xlu1 %1632 }
 0x728   : > { %1280 = vrot.lane.b32.xlu0 %v3435_v11, %s2738_s28 }
 0x729   : > { %1282 = vrot.lane.b32.xlu1 %v3445_v13, %s2738_s28 }
 0x72a   : > { %v3469_v12 = vpop.permute.xlu0 %1644 }
 0x72b   : > { %v3467_v48 = vpop.permute.xlu1 %1646 }
 0x72c   : > { %1234 = vrot.lane.b32.xlu0 %v3405_v26, %s2734_s16 }
 0x72d   : > { %1236 = vrot.lane.b32.xlu1 %v3415_v34, %s2734_s16 }
 0x72e   : > { %v3477_v25 = vpop.permute.xlu0 %1648 }
 0x72f   : > { %v3475_v15 = vpop.permute.xlu1 %1650 }
 0x730   : > { %1238 = vrot.lane.b32.xlu0 %v3417_v35, %s2734_s16 }
 0x731   : > { %1240 = vrot.lane.b32.xlu1 %v3435_v11, %s2734_s16 }
 0x732   : > { %v3483_v32 = vpop.permute.xlu0 %1652 }
 0x733   : > { %v1360_v52 = vpop.permute.xlu1 %1359  ;;  %4794 = vst [vmem:[#allocation24_spill] sm:$0xff] %v3483_v32 }
 0x734   : > { %1242 = vrot.lane.b32.xlu0 %v3445_v13, %s2734_s16  ;;  %v1374_v4 = vsel %vm361_vm12, 0.0, %v1360_v52 }
 0x735   : > { %1220 = vrot.lane.b32.xlu1 %v3435_v11, %s2735_s24 }
 0x736   : > { %v1362_v54 = vpop.permute.xlu0 %1361 }
 0x737   : > { %v1364_v40 = vpop.permute.xlu1 %1363  ;;  %v1375_v5 = vsel %vm361_vm12, 0.0, %v1362_v54 }
 0x738   : > { %1222 = vrot.lane.b32.xlu0 %v3445_v13, %s2735_s24 }
 0x739   : > { %1967 = vrot.lane.b32.xlu1 %v3219_v17, %s2741_s3 }
 0x73a   : > { %v1366_v58 = vpop.permute.xlu0 %1365 }
 0x73b   : > { %v1368_v56 = vpop.permute.xlu1 %1367 }
 0x73c   : > { %1979 = vrot.lane.b32.xlu0 %v3176_v39, %s2738_s28 }
 0x73d   : > { %1981 = vrot.lane.b32.xlu1 %v3203_v61, %s2738_s28 }
 0x73e   : > { %v1380_v60 = vpop.permute.xlu0 %1379 }
 0x73f   : > { %v1382_v59 = vpop.permute.xlu1 %1381  ;;  %v1394_v8 = vsel %vm330_vm11, 0.0, %v1380_v60  ;;  %v1377_v60 = vsel %vm361_vm12, 0.0, %v1366_v58 }
 0x740   : > { %v1395_v7 = vsel %vm330_vm11, 0.0, %v1382_v59  ;;  %v3505_v2 = vmin.f32 %v1374_v4, %v1394_v8  ;;  %v3507_v13 = vmax.f32 %v1374_v4, %v1394_v8  ;;  %1983 = vrot.lane.b32.xlu0 %v3205_v62, %s2738_s28  ;;  %v1376_v59 = vsel %vm361_vm12, 0.0, %v1364_v40 }
 0x741   : > { %v3501_v24 = vmin.f32 %v1375_v5, %v1395_v7  ;;  %v3503_v3 = vmax.f32 %v1375_v5, %v1395_v7  ;;  %1985 = vrot.lane.b32.xlu1 %v3217_v14, %s2738_s28 }
 0x742   : > { %v1384_v54 = vpop.permute.xlu0 %1383 }
 0x743   : > { %v1386_v52 = vpop.permute.xlu1 %1385  ;;  %v1396_v5 = vsel %vm330_vm11, 0.0, %v1384_v54 }
 0x744   : > { %v1397_v11 = vsel %vm330_vm11, 0.0, %v1386_v52  ;;  %v3521_v8 = vmin.f32 %v1376_v59, %v1396_v5  ;;  %v3523_v35 = vmax.f32 %v1376_v59, %v1396_v5  ;;  %1987 = vrot.lane.b32.xlu0 %v3219_v17, %s2738_s28  ;;  %v1378_v52 = vsel %vm361_vm12, 0.0, %v1368_v56 }
 0x745   : > { %v3517_v7 = vmin.f32 %v1377_v60, %v1397_v11  ;;  %v3519_v4 = vmax.f32 %v1377_v60, %v1397_v11  ;;  %1939 = vrot.lane.b32.xlu1 %v3176_v39, %s2734_s16 }
 0x746   : > { %v1388_v58 = vpop.permute.xlu0 %1387 }
 0x747   : > { %v1400_v40 = vpop.permute.xlu1 %1399  ;;  %v1398_v11 = vsel %vm330_vm11, 0.0, %v1388_v58 }
 0x748   : > { %v1414_v54 = vsel %vm1128_vm5, %v1400_v40, 0.0  ;;  %v3534_v5 = vmin.f32 %v1378_v52, %v1398_v11  ;;  %v3536_v34 = vmax.f32 %v1378_v52, %v1398_v11  ;;  %1941 = vrot.lane.b32.xlu0 %v3203_v61, %s2734_s16 }
 0x749   : > { %v1449_v60 = vmin.f32 %v3288_v50, %v1414_v54  ;;  %v1454_v59 = vmax.f32 %v3288_v50, %v1414_v54  ;;  %1943 = vrot.lane.b32.xlu1 %v3205_v62, %s2734_s16 }
 0x74a   : > { %v1402_v50 = vpop.permute.xlu0 %1401 }
 0x74b   : > { %v3543_v56 = vmax.f32 %v3505_v2, %v1449_v60  ;;  %v3546_v40 = vmin.f32 %v3507_v13, %v1454_v59  ;;  %v1479_v58 = vmax.f32 %v3507_v13, %v1454_v59  ;;  %v1404_v26 = vpop.permute.xlu1 %1403  ;;  %v1459_v54 = vmin.f32 %v3505_v2, %v1449_v60 }
 0x74c   : > { %v1416_v52 = vsel %vm1128_vm5, %v1404_v26, 0.0  ;;  %v1415_v11 = vsel %vm1128_vm5, %v1402_v50, 0.0  ;;  %1945 = vrot.lane.b32.xlu0 %v3217_v14, %s2734_s16 }
 0x74d   : > { %4795 = vst [vmem:[#allocation25_spill] sm:$0xff] %v3546_v40  ;;  %v1451_v1 = vmin.f32 %v3299_v51, %v1416_v52  ;;  %v1456_v0 = vmax.f32 %v3299_v51, %v1416_v52  ;;  %v1450_v9 = vmin.f32 %v3297_v36, %v1415_v11  ;;  %v1455_v32 = vmax.f32 %v3297_v36, %v1415_v11 }
 0x74e   : > { %1947 = vrot.lane.b32.xlu1 %v3219_v17, %s2734_s16  ;;  %v1406_v59 = vpop.permute.xlu0 %1405 }
 0x74f   : > { %v3561_v2 = vmax.f32 %v3521_v8, %v1451_v1  ;;  %v3564_v26 = vmin.f32 %v3523_v35, %v1456_v0  ;;  %v1481_v13 = vmax.f32 %v3523_v35, %v1456_v0  ;;  %v3568_v51 = vmax.f32 %v3501_v24, %v1450_v9  ;;  %v1408_v60 = vpop.permute.xlu1 %1407 }
 0x750   : > { %v3571_v36 = vmin.f32 %v3503_v3, %v1455_v32  ;;  %v1480_v50 = vmax.f32 %v3503_v3, %v1455_v32  ;;  %v1418_v52 = vsel %vm1128_vm5, %v1408_v60, 0.0  ;;  %v1417_v11 = vsel %vm1128_vm5, %v1406_v59, 0.0  ;;  %1919 = vrot.lane.b32.xlu0 %v3176_v39, %s2735_s24 }
 0x751   : > { %4796 = vst [vmem:[#allocation26_spill] sm:$0xff] %v3561_v2  ;;  %4797 = vst [vmem:[#allocation27_spill] sm:$0xff] %v3564_v26  ;;  %v1453_v40 = vmin.f32 %v3307_v49, %v1418_v52  ;;  %v1458_v26 = vmax.f32 %v3307_v49, %v1418_v52  ;;  %v1452_v0 = vmin.f32 %v3305_v46, %v1417_v11  ;;  %v4824_v2 = vld [vmem:[#allocation24_spill] sm:$0xff] }
 0x752   : > { %v1457_v35 = vmax.f32 %v3305_v46, %v1417_v11  ;;  %1921 = vrot.lane.b32.xlu1 %v3203_v61, %s2735_s24  ;;  %v1460_v3 = vmin.f32 %v3501_v24, %v1450_v9  ;;  %v1461_v32 = vmin.f32 %v3521_v8, %v1451_v1  ;;  %v1420_v11 = vpop.permute.xlu0 %1419 }
 0x753   : > { %v3587_v60 = vmax.f32 %v3534_v5, %v1453_v40  ;;  %v3590_v59 = vmin.f32 %v3536_v34, %v1458_v26  ;;  %v1483_v49 = vmax.f32 %v3536_v34, %v1458_v26  ;;  %v3594_v46 = vmax.f32 %v3517_v7, %v1452_v0  ;;  %v1422_v52 = vpop.permute.xlu1 %1421 }
 0x754   : > { %v3597_v39 = vmin.f32 %v3519_v4, %v1457_v35  ;;  %v1482_v24 = vmax.f32 %v3519_v4, %v1457_v35  ;;  %v1435_v1 = vsel %vm666_vm2, %v1422_v52, 0.0  ;;  %v1434_v9 = vsel %vm666_vm2, %v1420_v11, 0.0  ;;  %1923 = vrot.lane.b32.xlu0 %v3205_v62, %s2735_s24 }
 0x755   : > { %4798 = vst [vmem:[#allocation28_spill] sm:$0xff] %v3587_v60  ;;  %4799 = vst [vmem:[#allocation29_spill] sm:$0xff] %v3590_v59  ;;  %v1470_v8 = vmax.f32 %v1460_v3, %v1435_v1  ;;  %v1469_v61 = vmax.f32 %v1459_v54, %v1434_v9  ;;  %v1462_v34 = vmin.f32 %v3517_v7, %v1452_v0  ;;  %v3685_v7 = vsel %vm1128_vm5, %v3387_v19, 0.0 }
 0x756   : > { %4800 = vst [vmem:[#allocation30_spill] sm:$0xff] %v3594_v46  ;;  %4801 = vst [vmem:[#allocation31_spill] sm:$0xff] %v3597_v39  ;;  %v1463_v26 = vmin.f32 %v3534_v5, %v1453_v40  ;;  %1925 = vrot.lane.b32.xlu1 %v3217_v14, %s2735_s24  ;;  %v1424_v35 = vpop.permute.xlu0 %1423  ;;  %v1623_v19 = vsel %vm330_vm11, 0.0, %v3443_v6  ;;  %v3709_v14 = vsel %vm1128_vm5, %v3441_v57, 0.0 }
 0x757   : > { %v3608_v59 = vmin.f32 %v1480_v50, %v1470_v8  ;;  %v3610_v39 = vmin.f32 %v1479_v58, %v1469_v61  ;;  %v1426_v4 = vpop.permute.xlu1 %1425  ;;  %v1436_v54 = vsel %vm666_vm2, %v1424_v35, 0.0  ;;  %v1600_v35 = vsel %vm361_vm12, 0.0, %v3403_v43  ;;  %4808 = vst [vmem:[#allocation38_spill] sm:$0xff] %v3685_v7 }
 0x758   : > { %v1437_v52 = vsel %vm666_vm2, %v1426_v4, 0.0  ;;  %1927 = vrot.lane.b32.xlu0 %v3219_v17, %s2735_s24  ;;  %v1471_v58 = vmax.f32 %v1461_v32, %v1436_v54  ;;  %v1622_v4 = vsel %vm330_vm11, 0.0, %v3431_v33  ;;  %v1602_v43 = vsel %vm361_vm12, 0.0, %v3413_v29 }
 0x759   : > { %4802 = vst [vmem:[#allocation32_spill] sm:$0xff] %v3610_v39  ;;  %v1472_v61 = vmax.f32 %v1462_v34, %v1437_v52  ;;  %v3681_v33 = vsel %vm1128_vm5, %v3385_v18, 0.0  ;;  %v1603_v29 = vsel %vm361_vm12, 0.0, %v3411_v53  ;;  %v1663_v7 = vsel %vm666_vm2, %v4824_v2, 0.0 }
 0x75a   : > { %v1428_v0 = vpop.permute.xlu0 %1427  ;;  %v3628_v1 = vmin.f32 %v1481_v13, %v1471_v58  ;;  %4807 = vst [vmem:[#allocation37_spill] sm:$0xff] %v3681_v33 }
 0x75b   : > { %v3624_v50 = vpop.permute.xlu1 %1073  ;;  %v3626_v11 = vmin.f32 %v1482_v24, %v1472_v61  ;;  %v1438_v9 = vsel %vm666_vm2, %v1428_v0, 0.0  ;;  %v1620_v0 = vsel %vm330_vm11, 0.0, %v3423_v37  ;;  %v1621_v37 = vsel %vm330_vm11, 0.0, %v3433_v44 }
 0x75c   : > { %4804 = vst [vmem:[#allocation34_spill] sm:$0xff] %v3628_v1  ;;  %v1473_v8 = vmax.f32 %v1463_v26, %v1438_v9  ;;  %v1599_v26 = vsel %vm361_vm12, 0.0, %v3393_v21  ;;  %v1670_v54 = vmax.f32 %v1600_v35, %v1620_v0  ;;  %v3677_v21 = vsel %vm1128_vm5, %v3379_v16, 0.0 }
 0x75d   : > { %4803 = vst [vmem:[#allocation33_spill] sm:$0xff] %v3626_v11  ;;  %4806 = vst [vmem:[#allocation36_spill] sm:$0xff] %v3677_v21  ;;  %v1672_v44 = vmax.f32 %v1602_v43, %v1622_v4  ;;  %v3696_v3 = vmin.f32 %v1600_v35, %v1620_v0 }
 0x75e   : > { %v3639_v52 = vmin.f32 %v1483_v49, %v1473_v8  ;;  %v3643_v13 = vpop.permute.xlu0 %1075  ;;  %v1619_v8 = vsel %vm330_vm11, 0.0, %v3425_v38  ;;  %v1601_v38 = vsel %vm361_vm12, 0.0, %v3401_v23  ;;  %v3689_v23 = vsel %vm1128_vm5, %v3395_v22, 0.0 }
 0x75f   : > { %v3641_v24 = vpop.permute.xlu1 %1077  ;;  %v1669_v32 = vmax.f32 %v1599_v26, %v1619_v8  ;;  %v1671_v5 = vmax.f32 %v1601_v38, %v1621_v37  ;;  %4809 = vst [vmem:[#allocation39_spill] sm:$0xff] %v3689_v23  ;;  %v3694_v16 = vmin.f32 %v1670_v54, %v3234_v28  ;;  %4811 = vst [vmem:[#allocation41_spill] sm:$0xff] %v3696_v3 }
 0x760   : > { %4805 = vst [vmem:[#allocation35_spill] sm:$0xff] %v3639_v52  ;;  %v3698_v18 = vmin.f32 %v1599_v26, %v1619_v8  ;;  %v3717_v0 = vmin.f32 %v1672_v44, %v3240_v30  ;;  %v3723_v6 = vmax.f32 %v1670_v54, %v3234_v28  ;;  %v3733_v23 = vmin.f32 %v1602_v43, %v1622_v4 }
 0x761   : > { %4810 = vst [vmem:[#allocation40_spill] sm:$0xff] %v3694_v16  ;;  %v3701_v17 = vmin.f32 %v1669_v32, %v3222_v20  ;;  %v3712_v53 = vmax.f32 %v1669_v32, %v3222_v20  ;;  %v3720_v8 = vmin.f32 %v1671_v5, %v3232_v27  ;;  %v3729_v20 = vmax.f32 %v3696_v3, %v3694_v16 }
 0x762   : > { %v3649_v58 = vpop.permute.xlu0 %1079  ;;  %4812 = vst [vmem:[#allocation42_spill] sm:$0xff] %v3698_v18  ;;  %4814 = vst [vmem:[#allocation44_spill] sm:$0xff] %v3717_v0  ;;  %v1673_v32 = vmax.f32 %v1603_v29, %v1623_v19  ;;  %v3735_v21 = vmin.f32 %v1601_v38, %v1621_v37  ;;  %v3758_v38 = vmax.f32 %v3733_v23, %v3717_v0 }
 0x763   : > { %v1082_v61 = vpop.permute.xlu1 %1081  ;;  %4813 = vst [vmem:[#allocation43_spill] sm:$0xff] %v3701_v17  ;;  %4815 = vst [vmem:[#allocation45_spill] sm:$0xff] %v3720_v8  ;;  %v3739_v28 = vmin.f32 %v3712_v53, %v3709_v14  ;;  %v3747_v52 = vmax.f32 %v3698_v18, %v3701_v17 }
 0x764   : > { %v1092_v35 = vsel %vm361_vm12, 0.0, %v1082_v61  ;;  %4816 = vst [vmem:[#allocation46_spill] sm:$0xff] %v3733_v23  ;;  %4817 = vst [vmem:[#allocation47_spill] sm:$0xff] %v3735_v21  ;;  %v3776_v37 = vmax.f32 %v3735_v21, %v3720_v8 }
 0x765   : > { %v3780_v43 = vmin.f32 %v3747_v52, %v3739_v28 }
 0x766   : > { %v3655_v49 = vpop.permute.xlu0 %1093 }
 0x767   : > { %v3653_v9 = vpop.permute.xlu1 %1095  ;;  %4820 = vst [vmem:[#allocation50_spill] sm:$0xff] %v3780_v43 }
 0x76a   : > { %v3669_v40 = vpop.permute.xlu0 %1097 }
 0x76b   : > { %v3667_v34 = vpop.permute.xlu1 %1099 }
 0x76e   : > { %v1102_v22 = vpop.permute.xlu0 %1101 }
 0x76f   : > { %v3705_v62 = vpop.permute.xlu1 %1113  ;;  %v1112_v26 = vsel %vm330_vm11, 0.0, %v1102_v22  ;;  %v3764_v22 = vsel %vm1128_vm5, %v3451_v47, 0.0 }
 0x770   : > { %v1158_v33 = vmin.f32 %v1092_v35, %v1112_v26  ;;  %v1163_v61 = vmax.f32 %v1092_v35, %v1112_v26  ;;  %v1689_v35 = vmax.f32 %v3712_v53, %v3709_v14  ;;  %v3751_v26 = vmin.f32 %v1603_v29, %v1623_v19 }
 0x771   : > { %v3767_v14 = vmin.f32 %v1673_v32, %v3242_v31  ;;  %v3770_v29 = vmax.f32 %v1671_v5, %v3232_v27  ;;  %v1640_v19 = vsel %vm1128_vm5, %v3453_v41, 0.0  ;;  %v3793_v5 = vsel %vm1128_vm5, %v3459_v42, 0.0 }
 0x772   : > { %v3743_v57 = vpop.permute.xlu0 %1115  ;;  %4818 = vst [vmem:[#allocation48_spill] sm:$0xff] %v3751_v26  ;;  %v1168_v4 = vmin.f32 %v1163_v61, %v3357_v10  ;;  %v1173_v23 = vmax.f32 %v1163_v61, %v3357_v10  ;;  %v3800_v47 = vmin.f32 %v3723_v6, %v1640_v19  ;;  %v1109_v10 = vsel %vm330_vm11, 0.0, %v3653_v9 }
 0x773   : > { %v3741_v54 = vpop.permute.xlu1 %1117  ;;  %4819 = vst [vmem:[#allocation49_spill] sm:$0xff] %v3767_v14  ;;  %v3789_v41 = vmin.f32 %v3770_v29, %v3764_v22  ;;  %v1108_v61 = vsel %vm330_vm11, 0.0, %v3655_v49  ;;  %v3810_v42 = vmax.f32 %v3751_v26, %v3767_v14  ;;  %v1088_v49 = vsel %vm361_vm12, 0.0, %v3624_v50 }
 0x774   : > { %v1198_v53 = vmax.f32 %v1158_v33, %v1168_v4  ;;  %v3796_v33 = vmax.f32 %v1673_v32, %v3242_v31  ;;  %v1089_v32 = vsel %vm361_vm12, 0.0, %v3643_v13  ;;  %v1690_v26 = vmax.f32 %v3723_v6, %v1640_v19 }
 0x775   : > { %v3828_v31 = vsel %vm1128_vm5, %v3461_v45, 0.0  ;;  %v3832_v21 = vmin.f32 %v3776_v37, %v3789_v41  ;;  %v3838_v13 = vmin.f32 %v3729_v20, %v3800_v47  ;;  %v1660_v6 = vsel %vm666_vm2, %v3467_v48, 0.0 }
 0x776   : > { %v3785_v27 = vpop.permute.xlu0 %1119  ;;  %v3819_v9 = vmin.f32 %v3796_v33, %v3793_v5  ;;  %v1659_v19 = vsel %vm666_vm2, %v3469_v12, 0.0  ;;  %v3862_v45 = vsel %vm330_vm11, 0.0, %v3669_v40  ;;  %v1090_v40 = vsel %vm361_vm12, 0.0, %v3641_v24 }
 0x777   : > { %v1122_v0 = vpop.permute.xlu1 %1121  ;;  %4821 = vst [vmem:[#allocation51_spill] sm:$0xff] %v3832_v21  ;;  %4822 = vst [vmem:[#allocation52_spill] sm:$0xff] %v3838_v13  ;;  %v3864_v13 = vmin.f32 %v1690_v26, %v1660_v6  ;;  %v3870_v46 = vmin.f32 %v1689_v35, %v1659_v19  ;;  %v1661_v26 = vsel %vm666_vm2, %v3477_v25, 0.0  ;;  %v1155_v6 = vmin.f32 %v1089_v32, %v1109_v10 }
 0x778   : > { %v1133_v4 = vsel %vm1128_vm5, %v1122_v0, 0.0  ;;  %v3815_v0 = vmax.f32 %v1672_v44, %v3240_v30  ;;  %v1160_v30 = vmax.f32 %v1089_v32, %v1109_v10  ;;  %v1159_v44 = vmax.f32 %v1088_v49, %v1108_v61 }
 0x779   : > { %v1178_v43 = vmin.f32 %v1173_v23, %v1133_v4  ;;  %v3852_v50 = vmin.f32 %v3810_v42, %v3819_v9  ;;  %v1154_v1 = vmin.f32 %v1088_v49, %v1108_v61  ;;  %v1129_v35 = vsel %vm1128_vm5, %v3705_v62, 0.0  ;;  %v4825_v49 = vld [vmem:[#allocation18_spill] sm:$0xff]  ;;  %v4826_v62 = vld [vmem:[#allocation17_spill] sm:$0xff] }
 0x77a   : > { %v1135_v14 = vpop.permute.xlu0 %1134  ;;  %v3856_v21 = vmin.f32 %v3815_v0, %v3828_v31  ;;  %v1692_v48 = vmax.f32 %v3815_v0, %v3828_v31  ;;  %v1164_v11 = vmin.f32 %v1159_v44, %v3341_v55  ;;  %v1662_v31 = vsel %vm666_vm2, %v3475_v15, 0.0 }
 0x77b   : > { %v1203_v60 = vmax.f32 %v1198_v53, %v1178_v43  ;;  %v1137_v8 = vpop.permute.xlu1 %1136  ;;  %v1111_v53 = vsel %vm330_vm11, 0.0, %v3667_v34  ;;  %4823 = vst [vmem:[#allocation53_spill] sm:$0xff] %v3852_v50  ;;  %v1091_v34 = vsel %vm361_vm12, 0.0, %v3649_v58  ;;  %v1165_v50 = vmin.f32 %v1160_v30, %v3347_v63 }
 0x77c   : > { %v1162_v0 = vmax.f32 %v1091_v34, %v1111_v53  ;;  %v1161_v58 = vmax.f32 %v1090_v40, %v3862_v45  ;;  %v1169_v19 = vmax.f32 %v1159_v44, %v3341_v55  ;;  %v1183_v15 = vmax.f32 %v1173_v23, %v1133_v4 }
 0x77d   : > { %v1195_v18 = vmax.f32 %v1155_v6, %v1165_v50  ;;  %v1194_v16 = vmax.f32 %v1154_v1, %v1164_v11  ;;  %v1170_v25 = vmax.f32 %v1160_v30, %v3347_v63  ;;  %v1157_v61 = vmin.f32 %v1091_v34, %v1111_v53 }
 0x77e   : > { %v1139_v12 = vpop.permute.xlu0 %1138  ;;  %v1167_v32 = vmin.f32 %v1162_v0, %v4825_v49  ;;  %v1130_v2 = vsel %vm1128_vm5, %v3743_v57, 0.0  ;;  %v1166_v39 = vmin.f32 %v1161_v58, %v4826_v62  ;;  %v1174_v55 = vmin.f32 %v1169_v19, %v1129_v35 }
 0x77f   : > { %v1141_v43 = vpop.permute.xlu1 %1140  ;;  %v1171_v23 = vmax.f32 %v1161_v58, %v4826_v62  ;;  %v1172_v4 = vmax.f32 %v1162_v0, %v4825_v49  ;;  %v1132_v11 = vsel %vm1128_vm5, %v3785_v27, 0.0  ;;  %v1150_v63 = vsel %vm666_vm2, %v1137_v8, 0.0 }
 0x780   : > { %v1131_v57 = vsel %vm1128_vm5, %v3741_v54, 0.0  ;;  %v1175_v53 = vmin.f32 %v1170_v25, %v1130_v2  ;;  %v1180_v34 = vmax.f32 %v1170_v25, %v1130_v2  ;;  %v1149_v6 = vsel %vm666_vm2, %v1135_v14, 0.0 }
 0x781   : > { %v1179_v58 = vmax.f32 %v1169_v19, %v1129_v35  ;;  %v1152_v0 = vsel %vm666_vm2, %v1141_v43, 0.0  ;;  %v1177_v8 = vmin.f32 %v1172_v4, %v1132_v11  ;;  %v1176_v49 = vmin.f32 %v1171_v23, %v1131_v57 }
 0x782   : > { %v1143_v24 = vpop.permute.xlu0 %1142  ;;  %v1181_v54 = vmax.f32 %v1171_v23, %v1131_v57  ;;  %v1697_v2 = vmin.f32 %v1692_v48, %v1662_v31  ;;  %v1197_v14 = vmax.f32 %v1157_v61, %v1167_v32  ;;  %v1200_v35 = vmax.f32 %v1195_v18, %v1175_v53 }
 0x783   : > { %v3884_v17 = vpop.permute.xlu1 %1214  ;;  %v1153_v10 = vsel %vm666_vm2, %v1143_v24, 0.0  ;;  %v1184_v62 = vmin.f32 %v1179_v58, %v1149_v6  ;;  %v3921_v18 = vmin.f32 %v3758_v38, %v3856_v21  ;;  %v1189_v32 = vmax.f32 %v1179_v58, %v1149_v6  ;;  %v4836_v6 = vld [vmem:[#allocation8_spill] sm:$0xff] }
 0x784   : > { %v1188_v3 = vmin.f32 %v1183_v15, %v1153_v10  ;;  %v1193_v1 = vmax.f32 %v1183_v15, %v1153_v10  ;;  %v1151_v15 = vsel %vm666_vm2, %v1139_v12, 0.0  ;;  %v1156_v10 = vmin.f32 %v1090_v40, %v3862_v45 }
 0x785   : > { %v1718_v12 = vmax.f32 %v3810_v42, %v3819_v9  ;;  %v4829_v45 = vmax.f32 %v3796_v33, %v3793_v5  ;;  %v1202_v23 = vmax.f32 %v1197_v14, %v1177_v8  ;;  %v4830_v42 = vmax.f32 %v3729_v20, %v3800_v47 }
 0x786   : > { %v1208_v30 = vmax.f32 %v1203_v60, %v1188_v3  ;;  %v3899_v50 = vpop.permute.xlu0 %1216  ;;  %v1182_v60 = vmax.f32 %v1172_v4, %v1132_v11  ;;  %v1185_v3 = vmin.f32 %v1180_v34, %v1150_v63  ;;  %v1199_v4 = vmax.f32 %v1194_v16, %v1174_v55 }
 0x787   : > { %v3897_v44 = vpop.permute.xlu1 %1218  ;;  %v1186_v11 = vmin.f32 %v1181_v54, %v1151_v15  ;;  %v1698_v40 = vmin.f32 %v4829_v45, %v1663_v7  ;;  %v3929_v9 = vmin.f32 %v4830_v42, %v3864_v13  ;;  %v4831_v7 = vmax.f32 %v3747_v52, %v3739_v28  ;;  %v4841_v42 = vld [vmem:[#allocation21_spill] sm:$0xff] }
 0x788   : > { %v3905_v24 = vmin.f32 %v1208_v30, %v1193_v1  ;;  %v3907_v27 = vmax.f32 %v1208_v30, %v1193_v1  ;;  %v1187_v19 = vmin.f32 %v1182_v60, %v1152_v0  ;;  %v4828_v1 = vmax.f32 %v3770_v29, %v3764_v22 }
 0x789   : > { %v1205_v48 = vmax.f32 %v1200_v35, %v1185_v3  ;;  %v1717_v22 = vmax.f32 %v3758_v38, %v3856_v21  ;;  %v3935_v5 = vmin.f32 %v4831_v7, %v3870_v46  ;;  %v1190_v33 = vmax.f32 %v1180_v34, %v1150_v63 }
 0x78a   : > { %4827 = vst [vmem:[#allocation24_spill] sm:$0xff] %v3907_v27  ;;  %v1255_v25 = vpop.permute.xlu0 %1254  ;;  %v1696_v30 = vmin.f32 %v4828_v1, %v1661_v26  ;;  %v1196_v27 = vmax.f32 %v1156_v10, %v1166_v39  ;;  %v1204_v39 = vmax.f32 %v1199_v4, %v1184_v62  ;;  %v1207_v31 = vmax.f32 %v1202_v23, %v1187_v19 }
 0x78b   : > { %v1257_v43 = vpop.permute.xlu1 %1256  ;;  %v3937_v61 = vmin.f32 %v1717_v22, %v1697_v2  ;;  %v4833_v21 = vmax.f32 %v3776_v37, %v3789_v41  ;;  %v3944_v47 = vmin.f32 %v1718_v12, %v1698_v40  ;;  %v3946_v13 = vmin.f32 %v1205_v48, %v1190_v33  ;;  %v4839_v22 = vld [vmem:[#allocation20_spill] sm:$0xff] }
 0x78c   : > { %v1201_v29 = vmax.f32 %v1196_v27, %v1176_v49  ;;  %v3948_v55 = vmax.f32 %v1205_v48, %v1190_v33  ;;  %v1192_v46 = vmax.f32 %v1182_v60, %v1152_v0  ;;  %v3950_v52 = vmin.f32 %v1204_v39, %v1189_v32 }
 0x78d   : > { %4832 = vst [vmem:[#allocation18_spill] sm:$0xff] %v3937_v61  ;;  %v3942_v38 = vmin.f32 %v4833_v21, %v1696_v30  ;;  %4835 = vst [vmem:[#allocation54_spill] sm:$0xff] %v3944_v47  ;;  %v3952_v28 = vmax.f32 %v1204_v39, %v1189_v32  ;;  %v1191_v63 = vmax.f32 %v1181_v54, %v1151_v15  ;;  %v3956_v57 = vsel %vm361_vm12, 0.0, %v3884_v17  ;;  %v4842_v32 = vld [vmem:[#allocation25_spill] sm:$0xff] }
 0x78e   : > { %v1259_v16 = vpop.permute.xlu0 %1258  ;;  %v1206_v20 = vmax.f32 %v1201_v29, %v1186_v11  ;;  %v3958_v41 = vmin.f32 %v1207_v31, %v1192_v46  ;;  %v3960_v53 = vmax.f32 %v1207_v31, %v1192_v46  ;;  %vm2134_vm6 = vcmp.eq.s32.totalorder %v4836_v6, 1 }
 0x78f   : > { %v1261_v26 = vpop.permute.xlu1 %1260  ;;  %4834 = vst [vmem:[#allocation17_spill] sm:$0xff] %v3942_v38  ;;  %v1269_v27 = vsel %vm1128_vm5, %v1255_v25, 0.0  ;;  %v3971_v17 = vsel %vm361_vm12, 0.0, %v3897_v44  ;;  %v3975_v60 = vsel %vm361_vm12, 0.0, %v3899_v50  ;;  %v4763_v15 = vmov 0.0   ;;  %v4837_v44 = vld [vmem:[#allocation19_spill] sm:$0xff] }
 0x790   : > { %v3963_v58 = vmin.f32 %v1206_v20, %v1191_v63  ;;  %v3965_v0 = vmax.f32 %v1206_v20, %v1191_v63  ;;  %v2139_v10 = vsel %vm2134_vm6, 0.070766374, %v4763_v15  ;;  %v1270_v49 = vsel %vm1128_vm5, %v1257_v43, 0.0 }
 0x791   : > { %v1272_v54 = vsel %vm1128_vm5, %v1261_v26, 0.0  ;;  %v1271_v62 = vsel %vm1128_vm5, %v1259_v16, 0.0  ;;  %vm2164_vm7 = vcmp.eq.s32.totalorder %v4836_v6, 0  ;;  %v3989_v4 = vadd.f32 0.36954647, %v2139_v10 }
 0x792   : > { %v1263_v37 = vpop.permute.xlu0 %1262  ;;  %v2169_v19 = vsel %vm2164_vm7, 0.2444604, %v4763_v15  ;;  %v2179_v21 = vsel %vm2164_vm7, 0.070766374, %v4763_v15  ;;  %v4847_v15 = vld [vmem:[#allocation29_spill] sm:$0xff] }
 0x793   : > { %v1275_v34 = vpop.permute.xlu1 %1274  ;;  %v1273_v1 = vsel %vm1128_vm5, %v1263_v37, 0.0  ;;  %4838 = vst [vmem:[#allocation8_spill] sm:$0xff] %v3989_v4  ;;  %v3993_v16 = vadd.f32 0.2444604, %v2169_v19 }
 0x794   : > { %v1289_v8 = vsel %vm666_vm2, %v1275_v34, 0.0 }
 0x795   : > { %v1294_v3 = vmin.f32 %v1269_v27, %v1289_v8  ;;  %v1299_v2 = vmax.f32 %v1269_v27, %v1289_v8  ;;  %4840 = vst [vmem:[#allocation19_spill] sm:$0xff] %v3993_v16 }
 0x796   : > { %v1277_v25 = vpop.permute.xlu0 %1276 }
 0x797   : > { %v1309_v14 = vmax.f32 %v4837_v44, %v1294_v3  ;;  %v1279_v35 = vpop.permute.xlu1 %1278  ;;  %v1290_v50 = vsel %vm666_vm2, %v1277_v25, 0.0  ;;  %v1304_v40 = vmin.f32 %v4837_v44, %v1294_v3  ;;  %v4843_v25 = vld [vmem:[#allocation22_spill] sm:$0xff] }
 0x798   : > { %v1291_v43 = vsel %vm666_vm2, %v1279_v35, 0.0  ;;  %v1295_v30 = vmin.f32 %v1270_v49, %v1290_v50  ;;  %v1300_v45 = vmax.f32 %v1270_v49, %v1290_v50  ;;  %v4844_v35 = vld [vmem:[#allocation23_spill] sm:$0xff] }
 0x799   : > { %v1334_v11 = vmax.f32 %v1309_v14, %v1299_v2  ;;  %v1296_v12 = vmin.f32 %v1271_v62, %v1291_v43  ;;  %v1329_v23 = vmin.f32 %v1309_v14, %v1299_v2  ;;  %v1301_v48 = vmax.f32 %v1271_v62, %v1291_v43 }
 0x79a   : > { %v1310_v29 = vmax.f32 %v4839_v22, %v1295_v30  ;;  %v1281_v39 = vpop.permute.xlu0 %1280  ;;  %v1305_v26 = vmin.f32 %v4839_v22, %v1295_v30  ;;  %v4845_v30 = vld [vmem:[#allocation27_spill] sm:$0xff] }
 0x79b   : > { %v1311_v7 = vmax.f32 %v4841_v42, %v1296_v12  ;;  %v1283_v33 = vpop.permute.xlu1 %1282  ;;  %v1292_v31 = vsel %vm666_vm2, %v1281_v39, 0.0  ;;  %v4002_v20 = vmin.f32 %v1334_v11, %v4842_v32  ;;  %v4006_v34 = vmax.f32 %v1334_v11, %v4842_v32 }
 0x79c   : > { %v1335_v46 = vmax.f32 %v1310_v29, %v1300_v45  ;;  %v1293_v63 = vsel %vm666_vm2, %v1283_v33, 0.0  ;;  %v1297_v37 = vmin.f32 %v1272_v54, %v1292_v31  ;;  %v1330_v8 = vmin.f32 %v1310_v29, %v1300_v45 }
 0x79d   : > { %v1336_v27 = vmax.f32 %v1311_v7, %v1301_v48  ;;  %v1298_v3 = vmin.f32 %v1273_v1, %v1293_v63  ;;  %v4008_v10 = vmin.f32 %v1311_v7, %v1301_v48  ;;  %v1303_v49 = vmax.f32 %v1273_v1, %v1293_v63 }
 0x79e   : > { %v1302_v62 = vmax.f32 %v1272_v54, %v1292_v31  ;;  %v1312_v6 = vmax.f32 %v4843_v25, %v1297_v37  ;;  %v1235_v2 = vpop.permute.xlu0 %1234  ;;  %v1510_v44 = vmin.f32 %v1335_v46, %v3571_v36  ;;  %v1515_v14 = vmax.f32 %v1335_v46, %v3571_v36  ;;  %v4846_v46 = vld [vmem:[#allocation31_spill] sm:$0xff] }
 0x79f   : > { %v1313_v50 = vmax.f32 %v4844_v35, %v1298_v3  ;;  %v1237_v19 = vpop.permute.xlu1 %1236  ;;  %v1249_v43 = vsel %vm330_vm11, 0.0, %v1235_v2  ;;  %v4016_v11 = vmin.f32 %v1336_v27, %v4845_v30  ;;  %v4020_v54 = vmax.f32 %v1336_v27, %v4845_v30 }
 0x7a0   : > { %v1337_v45 = vmax.f32 %v1312_v6, %v1302_v62  ;;  %v1250_v48 = vsel %vm330_vm11, 0.0, %v1237_v19  ;;  %v1314_v1 = vmin.f32 %v1249_v43, %v1304_v40  ;;  %v4024_v36 = vmin.f32 %v1312_v6, %v1302_v62 }
 0x7a1   : > { %v1338_v22 = vmax.f32 %v1313_v50, %v1303_v49  ;;  %v1315_v29 = vmin.f32 %v1250_v48, %v1305_v26  ;;  %v1320_v39 = vmax.f32 %v1250_v48, %v1305_v26  ;;  %v4022_v7 = vmin.f32 %v1313_v50, %v1303_v49 }
 0x7a2   : > { %v1319_v33 = vmax.f32 %v1249_v43, %v1304_v40  ;;  %v1324_v31 = vmax.f32 %v3956_v57, %v1314_v1  ;;  %v1239_v32 = vpop.permute.xlu0 %1238  ;;  %v4028_v63 = vmin.f32 %v1337_v45, %v4846_v46  ;;  %v4031_v2 = vmax.f32 %v1337_v45, %v4846_v46 }
 0x7a3   : > { %v1325_v27 = vmax.f32 %v3975_v60, %v1315_v29  ;;  %v1340_v19 = vmin.f32 %v1320_v39, %v1330_v8  ;;  %v1241_v30 = vpop.permute.xlu1 %1240  ;;  %v4035_v26 = vmin.f32 %v1338_v22, %v4847_v15  ;;  %v4038_v49 = vmax.f32 %v1338_v22, %v4847_v15 }
 0x7a4   : > { %v1339_v40 = vmin.f32 %v1319_v33, %v1329_v23  ;;  %v4041_v57 = vsel %vm330_vm11, 0.0, %v1241_v30  ;;  %v1345_v62 = vmax.f32 %v1320_v39, %v1330_v8  ;;  %v4044_v50 = vmin.f32 %v4843_v25, %v1297_v37 }
 0x7a5   : > { %v1350_v6 = vmax.f32 %v1325_v27, %v1340_v19  ;;  %v4047_v43 = vsel %vm330_vm11, 0.0, %v1239_v32  ;;  %v1344_v60 = vmax.f32 %v1319_v33, %v1329_v23  ;;  %v1306_v48 = vmin.f32 %v4841_v42, %v1296_v12 }
 0x7a6   : > { %v1349_v45 = vmax.f32 %v1324_v31, %v1339_v40  ;;  %v4051_v1 = vmin.f32 %v4844_v35, %v1298_v3  ;;  %v4055_v29 = vmax.f32 %v4041_v57, %v4044_v50  ;;  %v4057_v8 = vadd.f32 0.070766374, %v2179_v21 }
 0x7a7   : > { %v1500_v15 = vmin.f32 %v1350_v6, %v1345_v62  ;;  %v1505_v22 = vmax.f32 %v1350_v6, %v1345_v62  ;;  %v1316_v39 = vmin.f32 %v4047_v43, %v1306_v48  ;;  %v4061_v23 = vmax.f32 %v4047_v43, %v1306_v48  ;;  %v1221_v33 = vpop.permute.xlu1 %1220 }
 0x7a8   : > { %4848 = vst [vmem:[#allocation20_spill] sm:$0xff] %v4057_v8  ;;  %v1499_v37 = vmin.f32 %v1349_v45, %v1344_v60  ;;  %v1504_v25 = vmax.f32 %v1349_v45, %v1344_v60 }
 0x7a9   : > { %v1530_v12 = vmin.f32 %v3946_v13, %v1500_v15  ;;  %v1535_v42 = vmax.f32 %v3946_v13, %v1500_v15  ;;  %v1555_v3 = vmin.f32 %v3948_v55, %v1505_v22  ;;  %v1560_v35 = vmax.f32 %v3948_v55, %v1505_v22 }
 0x7aa   : > { %v1529_v31 = vmin.f32 %v3950_v52, %v1499_v37  ;;  %v1534_v21 = vmax.f32 %v3950_v52, %v1499_v37  ;;  %v1554_v32 = vmin.f32 %v3952_v28, %v1504_v25  ;;  %v1559_v46 = vmax.f32 %v3952_v28, %v1504_v25 }
 0x7ab   : > { %v1540_v27 = vmin.f32 %v1530_v12, %v1510_v44  ;;  %v1545_v19 = vmax.f32 %v1530_v12, %v1510_v44  ;;  %v1565_v30 = vmin.f32 %v1560_v35, %v1515_v14  ;;  %v1570_v40 = vmax.f32 %v1560_v35, %v1515_v14  ;;  %v4851_v44 = vld [vmem:[#allocation32_spill] sm:$0xff]  ;;  %v1243_v35 = vpop.permute.xlu0 %1242 }
 0x7ac   : > { %v1725_v62 = vmin.f32 %v1555_v3, %v1535_v42  ;;  %v1730_v6 = vmax.f32 %v1555_v3, %v1535_v42  ;;  %v1539_v13 = vmin.f32 %v1529_v31, %v4002_v20  ;;  %v1544_v43 = vmax.f32 %v1529_v31, %v4002_v20 }
 0x7ad   : > { %v4849_v55 = vmin.f32 %v3568_v51, %v3608_v59  ;;  %v4850_v52 = vmax.f32 %v3568_v51, %v3608_v59  ;;  %v1735_v48 = vmin.f32 %v1565_v30, %v1545_v19  ;;  %v1740_v28 = vmax.f32 %v1565_v30, %v1545_v19  ;;  %v1968_v51 = vpop.permute.xlu1 %1967 }
 0x7ae   : > { %v4852_v15 = vmin.f32 %v3543_v56, %v4851_v44  ;;  %v1564_v22 = vmin.f32 %v1559_v46, %v4006_v34  ;;  %v1569_v37 = vmax.f32 %v1559_v46, %v4006_v34  ;;  %v1724_v25 = vmin.f32 %v1554_v32, %v1534_v21 }
 0x7af   : > { %v1550_v60 = vmax.f32 %v1540_v27, %v4849_v55  ;;  %v1575_v45 = vmin.f32 %v1570_v40, %v4850_v52  ;;  %v1755_v42 = vmin.f32 %v1725_v62, %v1735_v48  ;;  %v4086_v3 = vmax.f32 %v1725_v62, %v1735_v48 }
 0x7b0   : > { %v1549_v14 = vmax.f32 %v1539_v13, %v4852_v15  ;;  %v4088_v59 = vmin.f32 %v1730_v6, %v1740_v28  ;;  %v4090_v31 = vmax.f32 %v1730_v6, %v1740_v28  ;;  %v4853_v27 = vmax.f32 %v3543_v56, %v4851_v44 }
 0x7b1   : > { %v1745_v20 = vmin.f32 %v1575_v45, %v1550_v60  ;;  %v4084_v12 = vmax.f32 %v1575_v45, %v1550_v60  ;;  %v1729_v30 = vmax.f32 %v1554_v32, %v1534_v21  ;;  %v1734_v46 = vmin.f32 %v1564_v22, %v1544_v43  ;;  %v4854_v32 = vld [vmem:[#allocation41_spill] sm:$0xff] }
 0x7b2   : > { %v1574_v19 = vmin.f32 %v1569_v37, %v4853_v27  ;;  %v1739_v13 = vmax.f32 %v1564_v22, %v1544_v43  ;;  %v1317_v21 = vmin.f32 %v4041_v57, %v4044_v50  ;;  %v4855_v43 = vld [vmem:[#allocation40_spill] sm:$0xff]  ;;  %v1342_v15 = vmin.f32 %v4055_v29, %v4024_v36  ;;  %v1223_v50 = vpop.permute.xlu0 %1222  ;;  %v4873_v27 = vld [vmem:[#allocation45_spill] sm:$0xff] }
 0x7b3   : > { %v1765_v40 = vmin.f32 %v1755_v42, %v1745_v20  ;;  %v4095_v34 = vmax.f32 %v1755_v42, %v1745_v20  ;;  %v4099_v62 = vmin.f32 %v4090_v31, %v4084_v12  ;;  %v1754_v52 = vmin.f32 %v1724_v25, %v1734_v46  ;;  %v1982_v20 = vpop.permute.xlu1 %1981 }
 0x7b4   : > { %v1744_v60 = vmin.f32 %v1574_v19, %v1549_v14  ;;  %v4103_v6 = vmax.f32 %v1574_v19, %v1549_v14  ;;  %v4105_v45 = vmax.f32 %v1724_v25, %v1734_v46  ;;  %v4107_v56 = vmin.f32 %v1729_v30, %v1739_v13  ;;  %v4858_v46 = vld [vmem:[#allocation43_spill] sm:$0xff] }
 0x7b5   : > { %v4856_v48 = vmin.f32 %v4854_v32, %v4855_v43  ;;  %v4116_v44 = vmax.f32 %v1729_v30, %v1739_v13  ;;  %v1326_v14 = vmax.f32 %v3971_v17, %v1316_v39  ;;  %v1347_v25 = vmax.f32 %v4055_v29, %v4024_v36 }
 0x7b6   : > { %v1764_v22 = vmin.f32 %v1754_v52, %v1744_v60  ;;  %v4121_v37 = vmax.f32 %v1754_v52, %v1744_v60  ;;  %v1341_v57 = vmin.f32 %v4061_v23, %v4008_v10  ;;  %v1232_v17 = vsel %vm361_vm12, 0.0, %v1221_v33 }
 0x7b7   : > { %v4114_v28 = vmax.f32 %v1765_v40, %v4856_v48  ;;  %v4129_v42 = vmin.f32 %v4116_v44, %v4103_v6  ;;  %v1253_v39 = vsel %vm330_vm11, 0.0, %v1243_v35  ;;  %v1346_v19 = vmax.f32 %v4061_v23, %v4008_v10  ;;  %v4857_v40 = vld [vmem:[#allocation42_spill] sm:$0xff] }
 0x7b8   : > { %v1351_v36 = vmax.f32 %v1326_v14, %v1341_v57  ;;  %v1327_v29 = vmax.f32 %v1232_v17, %v1317_v21  ;;  %v1318_v30 = vmin.f32 %v1253_v39, %v4051_v1  ;;  %v4859_v13 = vmin.f32 %v4857_v40, %v4858_v46  ;;  %v1980_v40 = vpop.permute.xlu0 %1979 }
 0x7b9   : > { %v1323_v52 = vmax.f32 %v1253_v39, %v4051_v1  ;;  %v1233_v32 = vsel %vm361_vm12, 0.0, %v1223_v50  ;;  %v4146_v33 = vsel %vm666_vm2, %v1982_v20, 0.0  ;;  %v4151_v14 = vsel %vm1128_vm5, %v1968_v51, 0.0 }
 0x7ba   : > { %v4141_v60 = vmax.f32 %v1764_v22, %v4859_v13  ;;  %v1501_v35 = vmin.f32 %v1351_v36, %v1346_v19  ;;  %v1506_v43 = vmax.f32 %v1351_v36, %v1346_v19  ;;  %v1352_v48 = vmax.f32 %v1327_v29, %v1342_v15  ;;  %v4860_v22 = vld [vmem:[#allocation38_spill] sm:$0xff] }
 0x7bb   : > { %v1328_v10 = vmax.f32 %v1233_v32, %v1318_v30  ;;  %v1343_v23 = vmin.f32 %v1323_v52, %v4022_v7  ;;  %v1348_v21 = vmax.f32 %v1323_v52, %v4022_v7  ;;  %v4155_v57 = vmin.f32 %v4860_v22, %v4146_v33  ;;  %v4862_v52 = vld [vmem:[#allocation34_spill] sm:$0xff] }
 0x7bc   : > { %v1531_v1 = vmin.f32 %v3963_v58, %v1501_v35  ;;  %v1536_v50 = vmax.f32 %v3963_v58, %v1501_v35  ;;  %v1556_v20 = vmin.f32 %v3965_v0, %v1506_v43  ;;  %v1561_v15 = vmax.f32 %v3965_v0, %v1506_v43 }
 0x7bd   : > { %v1502_v17 = vmin.f32 %v1352_v48, %v1347_v25  ;;  %v1507_v39 = vmax.f32 %v1352_v48, %v1347_v25  ;;  %v1353_v19 = vmax.f32 %v1328_v10, %v1343_v23  ;;  %v4861_v25 = vld [vmem:[#allocation26_spill] sm:$0xff] }
 0x7be   : > { %v1541_v51 = vmin.f32 %v1531_v1, %v4016_v11  ;;  %v1546_v36 = vmax.f32 %v1531_v1, %v4016_v11  ;;  %v1566_v29 = vmin.f32 %v1561_v15, %v4020_v54  ;;  %v1571_v30 = vmax.f32 %v1561_v15, %v4020_v54 }
 0x7bf   : > { %v1726_v58 = vmin.f32 %v1556_v20, %v1536_v50  ;;  %v1731_v46 = vmax.f32 %v1556_v20, %v1536_v50  ;;  %v1532_v13 = vmin.f32 %v3958_v41, %v1502_v17  ;;  %v1537_v0 = vmax.f32 %v3958_v41, %v1502_v17 }
 0x7c0   : > { %v4863_v32 = vmin.f32 %v4861_v25, %v4862_v52  ;;  %v4864_v43 = vmax.f32 %v4861_v25, %v4862_v52  ;;  %v1736_v11 = vmin.f32 %v1566_v29, %v1546_v36  ;;  %v1741_v10 = vmax.f32 %v1566_v29, %v1546_v36  ;;  %v4865_v36 = vld [vmem:[#allocation30_spill] sm:$0xff]  ;;  %v4866_v29 = vld [vmem:[#allocation33_spill] sm:$0xff] }
 0x7c1   : > { %v1542_v23 = vmin.f32 %v1532_v13, %v4028_v63  ;;  %v1547_v54 = vmax.f32 %v1532_v13, %v4028_v63  ;;  %v1557_v1 = vmin.f32 %v3960_v53, %v1507_v39  ;;  %v1562_v50 = vmax.f32 %v3960_v53, %v1507_v39  ;;  %v4869_v39 = vld [vmem:[#allocation13_spill] sm:$0xff] }
 0x7c2   : > { %v1551_v35 = vmax.f32 %v1541_v51, %v4863_v32  ;;  %v1576_v48 = vmin.f32 %v1571_v30, %v4864_v43  ;;  %v1756_v15 = vmin.f32 %v1726_v58, %v1736_v11  ;;  %v4181_v17 = vmax.f32 %v1726_v58, %v1736_v11  ;;  %v1986_v51 = vpop.permute.xlu1 %1985 }
 0x7c3   : > { %v4183_v32 = vmin.f32 %v1731_v46, %v1741_v10  ;;  %v4185_v30 = vmax.f32 %v1731_v46, %v1741_v10  ;;  %v4867_v25 = vmin.f32 %v4865_v36, %v4866_v29  ;;  %v1567_v63 = vmin.f32 %v1562_v50, %v4031_v2 }
 0x7c4   : > { %v1746_v20 = vmin.f32 %v1576_v48, %v1551_v35  ;;  %v4179_v41 = vmax.f32 %v1576_v48, %v1551_v35  ;;  %v1572_v53 = vmax.f32 %v1562_v50, %v4031_v2  ;;  %v2015_v58 = vmax.f32 %v4869_v39, %v4155_v57  ;;  %v1984_v35 = vpop.permute.xlu0 %1983  ;;  %v4872_v50 = vld [vmem:[#allocation47_spill] sm:$0xff] }
 0x7c5   : > { %v1552_v52 = vmax.f32 %v1542_v23, %v4867_v25  ;;  %v1727_v11 = vmin.f32 %v1557_v1, %v1537_v0  ;;  %v1737_v10 = vmin.f32 %v1567_v63, %v1547_v54  ;;  %v4871_v23 = vmax.f32 %v4865_v36, %v4866_v29 }
 0x7c6   : > { %v1766_v13 = vmin.f32 %v1756_v15, %v1746_v20  ;;  %v4191_v43 = vmax.f32 %v1756_v15, %v1746_v20  ;;  %v4198_v48 = vmin.f32 %v4185_v30, %v4179_v41  ;;  %v1732_v15 = vmax.f32 %v1557_v1, %v1537_v0  ;;  %v1940_v36 = vpop.permute.xlu1 %1939  ;;  %v4875_v1 = vld [vmem:[#allocation24_spill] sm:$0xff] }
 0x7c7   : > { %v1577_v20 = vmin.f32 %v1572_v53, %v4871_v23  ;;  %v1742_v25 = vmax.f32 %v1567_v63, %v1547_v54  ;;  %v1503_v2 = vmin.f32 %v1353_v19, %v1348_v21  ;;  %v4874_v55 = vmin.f32 %v4872_v50, %v4873_v27 }
 0x7c8   : > { %4868 = vst [vmem:[#allocation21_spill] sm:$0xff] %v4191_v43  ;;  %4870 = vst [vmem:[#allocation25_spill] sm:$0xff] %v4198_v48  ;;  %v1757_v8 = vmin.f32 %v1727_v11, %v1737_v10  ;;  %v4210_v16 = vmax.f32 %v1727_v11, %v1737_v10  ;;  %v1508_v47 = vmax.f32 %v1353_v19, %v1348_v21  ;;  %v1994_v23 = vsel %vm666_vm2, %v1980_v40, 0.0  ;;  %v4881_v19 = vld [vmem:[#allocation46_spill] sm:$0xff] }
 0x7c9   : > { %v4208_v7 = vmax.f32 %v1766_v13, %v4874_v55  ;;  %v1747_v4 = vmin.f32 %v1577_v20, %v1552_v52  ;;  %v4212_v46 = vmax.f32 %v1577_v20, %v1552_v52  ;;  %v4214_v38 = vmin.f32 %v1732_v15, %v1742_v25  ;;  %v1988_v52 = vpop.permute.xlu0 %1987  ;;  %v4877_v20 = vld [vmem:[#allocation28_spill] sm:$0xff] }
 0x7ca   : > { %v4216_v48 = vmax.f32 %v1732_v15, %v1742_v25  ;;  %v1533_v0 = vmin.f32 %v3905_v24, %v1503_v2  ;;  %v1538_v54 = vmax.f32 %v3905_v24, %v1503_v2  ;;  %v1558_v27 = vmin.f32 %v4875_v1, %v1508_v47  ;;  %v4878_v15 = vld [vmem:[#allocation35_spill] sm:$0xff] }
 0x7cb   : > { %v1563_v55 = vmax.f32 %v4875_v1, %v1508_v47  ;;  %v1767_v29 = vmin.f32 %v1757_v8, %v1747_v4  ;;  %v4222_v63 = vmax.f32 %v1757_v8, %v1747_v4  ;;  %v4876_v4 = vmax.f32 %v4860_v22, %v4146_v33 }
 0x7cc   : > { %v4226_v21 = vmin.f32 %v4216_v48, %v4212_v46  ;;  %v1543_v13 = vmin.f32 %v1533_v0, %v4035_v26  ;;  %v1548_v53 = vmax.f32 %v1533_v0, %v4035_v26  ;;  %v1728_v47 = vmin.f32 %v1558_v27, %v1538_v54 }
 0x7cd   : > { %v1568_v24 = vmin.f32 %v1563_v55, %v4038_v49  ;;  %v1573_v11 = vmax.f32 %v1563_v55, %v4038_v49  ;;  %v1733_v10 = vmax.f32 %v1558_v27, %v1538_v54  ;;  %v2040_v8 = vmin.f32 %v2015_v58, %v4876_v4  ;;  %v4882_v49 = vld [vmem:[#allocation44_spill] sm:$0xff]  ;;  %v1944_v58 = vpop.permute.xlu1 %1943 }
 0x7ce   : > { %v4879_v25 = vmin.f32 %v4877_v20, %v4878_v15  ;;  %v4880_v50 = vmax.f32 %v4877_v20, %v4878_v15  ;;  %v4883_v55 = vmin.f32 %v4881_v19, %v4882_v49  ;;  %v4884_v27 = vld [vmem:[#allocation36_spill] sm:$0xff]  ;;  %v1997_v22 = vsel %vm666_vm2, %v1986_v51, 0.0 }
 0x7cf   : > { %v1738_v0 = vmin.f32 %v1568_v24, %v1548_v53  ;;  %v1743_v1 = vmax.f32 %v1568_v24, %v1548_v53  ;;  %v1999_v33 = vmin.f32 %v4884_v27, %v1994_v23  ;;  %v1996_v40 = vsel %vm666_vm2, %v1984_v35, 0.0  ;;  %v4888_v19 = vld [vmem:[#allocation12_spill] sm:$0xff]  ;;  %v4889_v24 = vld [vmem:[#allocation39_spill] sm:$0xff] }
 0x7d0   : > { %v1553_v2 = vmax.f32 %v1543_v13, %v4879_v25  ;;  %v1578_v26 = vmin.f32 %v1573_v11, %v4880_v50  ;;  %v4247_v54 = vmax.f32 %v1767_v29, %v4883_v55  ;;  %v2002_v15 = vmin.f32 %v4889_v24, %v1997_v22  ;;  %v1942_v50 = vpop.permute.xlu0 %1941  ;;  %v4891_v55 = vld [vmem:[#allocation37_spill] sm:$0xff] }
 0x7d1   : > { %v1758_v25 = vmin.f32 %v1728_v47, %v1738_v0  ;;  %v4254_v20 = vmax.f32 %v1728_v47, %v1738_v0  ;;  %v4256_v11 = vmin.f32 %v1733_v10, %v1743_v1  ;;  %v4258_v53 = vmax.f32 %v1733_v10, %v1743_v1  ;;  %v4893_v0 = vld [vmem:[#allocation15_spill] sm:$0xff] }
 0x7d2   : > { %v1748_v4 = vmin.f32 %v1578_v26, %v1553_v2  ;;  %v4252_v13 = vmax.f32 %v1578_v26, %v1553_v2  ;;  %v2014_v29 = vmax.f32 %v4888_v19, %v1999_v33  ;;  %v2004_v35 = vmax.f32 %v4884_v27, %v1994_v23  ;;  %v4895_v27 = vld [vmem:[#allocation48_spill] sm:$0xff] }
 0x7d3   : > { %4886 = vst [vmem:[#allocation23_spill] sm:$0xff] %v4254_v20  ;;  %4887 = vst [vmem:[#allocation27_spill] sm:$0xff] %v4256_v11  ;;  %v2001_v2 = vmin.f32 %v4891_v55, %v1996_v40  ;;  %v2007_v26 = vmax.f32 %v4889_v24, %v1997_v22  ;;  %v2017_v1 = vmax.f32 %v4893_v0, %v2002_v15  ;;  %v1954_v23 = vsel %vm330_vm11, 0.0, %v1940_v36  ;;  %v1948_v24 = vpop.permute.xlu1 %1947 }
 0x7d4   : > { %4885 = vst [vmem:[#allocation22_spill] sm:$0xff] %v4252_v13  ;;  %v1768_v49 = vmin.f32 %v1758_v25, %v1748_v4  ;;  %v4262_v51 = vmax.f32 %v1758_v25, %v1748_v4  ;;  %v4268_v47 = vmin.f32 %v4258_v53, %v4252_v13  ;;  %v2039_v11 = vmin.f32 %v2014_v29, %v2004_v35  ;;  %v4894_v4 = vld [vmem:[#allocation14_spill] sm:$0xff] }
 0x7d5   : > { %v2006_v20 = vmax.f32 %v4891_v55, %v1996_v40  ;;  %v2016_v25 = vmax.f32 %v4894_v4, %v2001_v2  ;;  %v1998_v10 = vsel %vm666_vm2, %v1988_v52, 0.0  ;;  %v1956_v22 = vsel %vm330_vm11, 0.0, %v1944_v58  ;;  %v4898_v52 = vld [vmem:[#allocation16_spill] sm:$0xff] }
 0x7d6   : > { %4890 = vst [vmem:[#allocation31_spill] sm:$0xff] %v4262_v51  ;;  %4892 = vst [vmem:[#allocation29_spill] sm:$0xff] %v4268_v47  ;;  %v4896_v51 = vld [vmem:[#allocation49_spill] sm:$0xff]  ;;  %v2009_v47 = vmin.f32 %v4888_v19, %v1999_v33  ;;  %v2042_v13 = vmin.f32 %v2017_v1, %v2007_v26  ;;  %v2003_v40 = vmin.f32 %v4151_v14, %v1998_v10  ;;  %v1946_v33 = vpop.permute.xlu0 %1945 }
 0x7d7   : > { %v4897_v43 = vmin.f32 %v4895_v27, %v4896_v51  ;;  %v2041_v29 = vmin.f32 %v2016_v25, %v2006_v20  ;;  %v2011_v35 = vmin.f32 %v4894_v4, %v2001_v2  ;;  %v2008_v36 = vmax.f32 %v4151_v14, %v1998_v10 }
 0x7d8   : > { %v2024_v55 = vmax.f32 %v1954_v23, %v2009_v47  ;;  %v4291_v19 = vmin.f32 %v1954_v23, %v2009_v47  ;;  %v2018_v58 = vmax.f32 %v4898_v52, %v2003_v40  ;;  %v1958_v20 = vsel %vm330_vm11, 0.0, %v1948_v24  ;;  %v1922_v23 = vpop.permute.xlu1 %1921 }
 0x7d9   : > { %v4280_v61 = vmax.f32 %v1768_v49, %v4897_v43  ;;  %v2010_v43 = vmin.f32 %v4869_v39, %v4155_v57  ;;  %v1955_v49 = vsel %vm330_vm11, 0.0, %v1942_v50  ;;  %v2026_v51 = vmax.f32 %v1956_v22, %v2011_v35 }
 0x7da   : > { %v4295_v26 = vmin.f32 %v2024_v55, %v2039_v11  ;;  %v4297_v1 = vmin.f32 %v1956_v22, %v2011_v35  ;;  %v2013_v14 = vmin.f32 %v4898_v52, %v2003_v40  ;;  %v2043_v10 = vmin.f32 %v2018_v58, %v2008_v36  ;;  %v4900_v35 = vld [vmem:[#allocation52_spill] sm:$0xff] }
 0x7db   : > { %v2025_v2 = vmax.f32 %v1955_v49, %v2010_v43  ;;  %v2020_v4 = vmin.f32 %v1955_v49, %v2010_v43  ;;  %v2012_v57 = vmin.f32 %v4893_v0, %v2002_v15  ;;  %v1957_v39 = vsel %vm330_vm11, 0.0, %v1946_v33 }
 0x7dc   : > { %v4302_v50 = vmin.f32 %v2026_v51, %v2041_v29  ;;  %v2028_v25 = vmax.f32 %v1958_v20, %v2013_v14  ;;  %v4899_v11 = vmax.f32 %v4090_v31, %v4084_v12  ;;  %v4308_v22 = vmin.f32 %v1958_v20, %v2013_v14  ;;  %v1920_v51 = vpop.permute.xlu0 %1919 }
 0x7dd   : > { %v2045_v47 = vmin.f32 %v2025_v2, %v2040_v8  ;;  %v2027_v24 = vmax.f32 %v1957_v39, %v2012_v57  ;;  %v1805_v40 = vmin.f32 %v4088_v59, %v4086_v3  ;;  %v1810_v15 = vmax.f32 %v4088_v59, %v4086_v3 }
 0x7de   : > { %v1800_v27 = vmin.f32 %v4899_v11, %v4114_v28  ;;  %v4314_v0 = vmin.f32 %v1957_v39, %v2012_v57  ;;  %v1815_v8 = vmin.f32 %v4099_v62, %v4095_v34  ;;  %v1820_v29 = vmax.f32 %v4099_v62, %v4095_v34 }
 0x7df   : > { %v4321_v31 = vmin.f32 %v2028_v25, %v2043_v10  ;;  %v1935_v55 = vsel %vm361_vm12, 0.0, %v1922_v23  ;;  %v4901_v3 = vmax.f32 %v4116_v44, %v4103_v6  ;;  %v4329_v52 = vmin.f32 %v2027_v24, %v2042_v13  ;;  %v4902_v13 = vld [vmem:[#allocation50_spill] sm:$0xff] }
 0x7e0   : > { %v1825_v12 = vmin.f32 %v1800_v27, %v4900_v35  ;;  %v1830_v28 = vmax.f32 %v1800_v27, %v4900_v35  ;;  %v1835_v36 = vmin.f32 %v1805_v40, %v1815_v8  ;;  %v1840_v43 = vmax.f32 %v1805_v40, %v1815_v8 }
 0x7e1   : > { %v1799_v59 = vmin.f32 %v4901_v3, %v4141_v60  ;;  %v1850_v49 = vmin.f32 %v1810_v15, %v1820_v29  ;;  %v1855_v33 = vmax.f32 %v1810_v15, %v1820_v29  ;;  %v2030_v34 = vmin.f32 %v1935_v55, %v2020_v4 }
 0x7e2   : > { %v1804_v62 = vmin.f32 %v4107_v56, %v4105_v45  ;;  %v1809_v58 = vmax.f32 %v4107_v56, %v4105_v45  ;;  %v1845_v20 = vmax.f32 %v1835_v36, %v1825_v12  ;;  %v2035_v6 = vmax.f32 %v1935_v55, %v2020_v4 }
 0x7e3   : > { %v1860_v2 = vmin.f32 %v1855_v33, %v1830_v28  ;;  %v1865_v14 = vmin.f32 %v1850_v49, %v1840_v43  ;;  %v1870_v10 = vmax.f32 %v1850_v49, %v1840_v43  ;;  %v1814_v44 = vmin.f32 %v4129_v42, %v4121_v37 }
 0x7e4   : > { %v1819_v60 = vmax.f32 %v4129_v42, %v4121_v37  ;;  %v1824_v57 = vmin.f32 %v1799_v59, %v4902_v13  ;;  %v1829_v23 = vmax.f32 %v1799_v59, %v4902_v13  ;;  %v1934_v45 = vsel %vm361_vm12, 0.0, %v1920_v51  ;;  %v1926_v13 = vpop.permute.xlu1 %1925 }
 0x7e5   : > { %v1875_v39 = vmin.f32 %v1860_v2, %v1845_v20  ;;  %v1880_v25 = vmax.f32 %v1860_v2, %v1845_v20  ;;  %v1834_v56 = vmin.f32 %v1804_v62, %v1814_v44  ;;  %v1839_v11 = vmax.f32 %v1804_v62, %v1814_v44 }
 0x7e6   : > { %v1849_v27 = vmin.f32 %v1809_v58, %v1819_v60  ;;  %v1854_v24 = vmax.f32 %v1809_v58, %v1819_v60  ;;  %v2050_v28 = vmin.f32 %v2035_v6, %v2045_v47  ;;  %v2029_v43 = vmin.f32 %v1934_v45, %v4291_v19 }
 0x7e7   : > { %v1885_v40 = vmin.f32 %v1865_v14, %v1875_v39  ;;  %v1890_v4 = vmax.f32 %v1865_v14, %v1875_v39  ;;  %v1900_v15 = vmin.f32 %v1870_v10, %v1880_v25  ;;  %v1905_v8 = vmax.f32 %v1870_v10, %v1880_v25 }
 0x7e8   : > { %v1844_v29 = vmax.f32 %v1834_v56, %v1824_v57  ;;  %v1859_v35 = vmin.f32 %v1854_v24, %v1829_v23  ;;  %v1864_v12 = vmin.f32 %v1849_v27, %v1839_v11  ;;  %v1869_v37 = vmax.f32 %v1849_v27, %v1839_v11 }
 0x7e9   : > { %v1895_v42 = vmax.f32 %v1885_v40, %v3929_v9  ;;  %v2055_v55 = vmin.f32 %v1900_v15, %v1890_v4  ;;  %v2060_v3 = vmax.f32 %v1900_v15, %v1890_v4  ;;  %v4903_v49 = vmax.f32 %v4216_v48, %v4212_v46 }
 0x7ea   : > { %v1874_v59 = vmin.f32 %v1859_v35, %v1844_v29  ;;  %v1879_v36 = vmax.f32 %v1859_v35, %v1844_v29  ;;  %v1807_v58 = vmin.f32 %v4214_v38, %v4210_v16  ;;  %v1812_v51 = vmax.f32 %v4214_v38, %v4210_v16 }
 0x7eb   : > { %v1802_v33 = vmin.f32 %v4903_v49, %v4247_v54  ;;  %v1910_v62 = vmin.f32 %v1905_v8, %v1895_v42  ;;  %v1817_v9 = vmin.f32 %v4226_v21, %v4222_v63  ;;  %v2034_v44 = vmax.f32 %v1934_v45, %v4291_v19 }
 0x7ec   : > { %v1884_v47 = vmin.f32 %v1864_v12, %v1874_v59  ;;  %v1889_v20 = vmax.f32 %v1864_v12, %v1874_v59  ;;  %v1899_v2 = vmin.f32 %v1869_v37, %v1879_v36  ;;  %v1904_v14 = vmax.f32 %v1869_v37, %v1879_v36 }
 0x7ed   : > { %v2065_v10 = vmin.f32 %v1910_v62, %v2030_v34  ;;  %v2070_v6 = vmax.f32 %v1910_v62, %v2030_v34  ;;  %v1822_v48 = vmax.f32 %v4226_v21, %v4222_v63  ;;  %v1827_v38 = vmin.f32 %v1802_v33, %v3921_v18 }
 0x7ee   : > { %v1894_v46 = vmax.f32 %v1884_v47, %v3935_v5  ;;  %v2054_v54 = vmin.f32 %v1899_v2, %v1889_v20  ;;  %v2059_v60 = vmax.f32 %v1899_v2, %v1889_v20  ;;  %v1832_v39 = vmax.f32 %v1802_v33, %v3921_v18  ;;  %v4905_v33 = vld [vmem:[#allocation9_spill] sm:$0xff]  ;;  %v1924_v47 = vpop.permute.xlu0 %1923  ;;  %v4906_v2 = vld [vmem:[#allocation18_spill] sm:$0xff] }
 0x7ef   : > { %v2075_v16 = vmax.f32 %v2055_v55, %v2065_v10  ;;  %v2080_v57 = vmin.f32 %v2060_v3, %v2070_v6  ;;  %v1837_v25 = vmin.f32 %v1807_v58, %v1817_v9  ;;  %v1842_v56 = vmax.f32 %v1807_v58, %v1817_v9 }
 0x7f0   : > { %v1909_v23 = vmin.f32 %v1904_v14, %v1894_v46  ;;  %v1852_v34 = vmin.f32 %v1812_v51, %v1822_v48  ;;  %v1857_v11 = vmax.f32 %v1812_v51, %v1822_v48  ;;  %v1937_v63 = vsel %vm361_vm12, 0.0, %v1926_v13  ;;  %v4908_v48 = vld [vmem:[#allocation25_spill] sm:$0xff] }
 0x7f1   : > { %v2085_v19 = vmin.f32 %v2080_v57, %v2075_v16  ;;  %v2090_v45 = vmax.f32 %v2080_v57, %v2075_v16  ;;  %v1847_v27 = vmax.f32 %v1837_v25, %v1827_v38  ;;  %v2049_v15 = vmin.f32 %v2034_v44, %v4295_v26  ;;  %v4907_v44 = vld [vmem:[#allocation21_spill] sm:$0xff]  ;;  %v4910_v16 = vld [vmem:[#allocation22_spill] sm:$0xff] }
 0x7f2   : > { %v2064_v5 = vmin.f32 %v1909_v23, %v2029_v43  ;;  %v2069_v21 = vmax.f32 %v1909_v23, %v2029_v43  ;;  %v1862_v24 = vmin.f32 %v1857_v11, %v1832_v39  ;;  %v1867_v40 = vmin.f32 %v1852_v34, %v1842_v56 }
 0x7f3   : > { %v2095_v4 = vmin.f32 %v2090_v45, %v2050_v28  ;;  %v1872_v8 = vmax.f32 %v1852_v34, %v1842_v56  ;;  %v2037_v18 = vmax.f32 %v1937_v63, %v4314_v0  ;;  %v2032_v55 = vmin.f32 %v1937_v63, %v4314_v0 }
 0x7f4   : > { %v2074_v29 = vmax.f32 %v2054_v54, %v2064_v5  ;;  %v2079_v35 = vmin.f32 %v2059_v60, %v2069_v21  ;;  %v1877_v12 = vmin.f32 %v1862_v24, %v1847_v27  ;;  %v1882_v37 = vmax.f32 %v1862_v24, %v1847_v27 }
 0x7f5   : > { %v4363_v42 = vmax.f32 %v2085_v19, %v2095_v4  ;;  %v4904_v3 = vmax.f32 %v4185_v30, %v4179_v41  ;;  %v1806_v28 = vmin.f32 %v4183_v32, %v4181_v17  ;;  %v1811_v0 = vmax.f32 %v4183_v32, %v4181_v17  ;;  %v4909_v32 = vld [vmem:[#allocation51_spill] sm:$0xff] }
 0x7f6   : > { %v2084_v26 = vmin.f32 %v2079_v35, %v2074_v29  ;;  %v2089_v36 = vmax.f32 %v2079_v35, %v2074_v29  ;;  %v1887_v43 = vmin.f32 %v1867_v40, %v1877_v12  ;;  %v1892_v49 = vmax.f32 %v1867_v40, %v1877_v12  ;;  %v4912_v29 = vld [vmem:[#allocation23_spill] sm:$0xff] }
 0x7f7   : > { %v1801_v59 = vmin.f32 %v4904_v3, %v4208_v7  ;;  %v4375_v62 = vsel %vm153_vm0, 0.0, %v4363_v42  ;;  %v1902_v58 = vmin.f32 %v1872_v8, %v1882_v37  ;;  %v1907_v51 = vmax.f32 %v1872_v8, %v1882_v37  ;;  %v4913_v35 = vld [vmem:[#allocation27_spill] sm:$0xff] }
 0x7f8   : > { %v2195_v41 = vrot.slane %v4375_v62, 6  ;;  %v2215_v7 = vrot.slane %v4375_v62, 7  ;;  %v2250_v30 = vrot.slane %v4375_v62, 1  ;;  %v2052_v9 = vmin.f32 %v2037_v18, %v4329_v52 }
 0x7f9   : > { %v2094_v20 = vmin.f32 %v2089_v36, %v2049_v15  ;;  %v1897_v14 = vmax.f32 %v1887_v43, %v4906_v2  ;;  %v2057_v10 = vmin.f32 %v1902_v58, %v1892_v49  ;;  %v2062_v6 = vmax.f32 %v1902_v58, %v1892_v49  ;;  %v4914_v36 = vld [vmem:[#allocation31_spill] sm:$0xff]  ;;  %v4915_v43 = vld [vmem:[#allocation29_spill] sm:$0xff] }
 0x7fa   : > { %v1816_v46 = vmin.f32 %v4908_v48, %v4907_v44  ;;  %v1821_v17 = vmax.f32 %v4908_v48, %v4907_v44  ;;  %v1826_v54 = vmin.f32 %v1801_v59, %v4909_v32  ;;  %v1831_v60 = vmax.f32 %v1801_v59, %v4909_v32 }
 0x7fb   : > { %v4390_v13 = vmax.f32 %v2084_v26, %v2094_v20  ;;  %v1912_v38 = vmin.f32 %v1907_v51, %v1897_v14  ;;  %v1936_v52 = vsel %vm361_vm12, 0.0, %v1924_v47  ;;  %v4911_v57 = vmax.f32 %v4258_v53, %v4910_v16  ;;  %v4916_v14 = vld [vmem:[#allocation53_spill] sm:$0xff] }
 0x7fc   : > { %v1836_v25 = vmin.f32 %v1806_v28, %v1816_v46  ;;  %v1841_v23 = vmax.f32 %v1806_v28, %v1816_v46  ;;  %v1851_v56 = vmin.f32 %v1811_v0, %v1821_v17  ;;  %v1856_v34 = vmax.f32 %v1811_v0, %v1821_v17  ;;  %v4917_v46 = vld [vmem:[#allocation17_spill] sm:$0xff] }
 0x7fd   : > { %v1803_v39 = vmin.f32 %v4911_v57, %v4280_v61  ;;  %v2275_v11 = vrot.slane %v4375_v62, 2  ;;  %v4401_v19 = vsel %vm153_vm0, 0.0, %v4390_v13  ;;  %v2067_v45 = vmin.f32 %v1912_v38, %v2032_v55 }
 0x7fe   : > { %v2072_v27 = vmax.f32 %v1912_v38, %v2032_v55  ;;  %v2194_v63 = vrot.slane %v4401_v19, 6  ;;  %v2214_v5 = vrot.slane %v4401_v19, 7  ;;  %v2249_v53 = vrot.slane %v4401_v19, 1 }
 0x7ff   : > { %v2031_v61 = vmin.f32 %v1936_v52, %v4297_v1  ;;  %v2077_v21 = vmax.f32 %v2057_v10, %v2067_v45  ;;  %v1846_v40 = vmax.f32 %v1836_v25, %v1826_v54  ;;  %v1861_v4 = vmin.f32 %v1856_v34, %v1831_v60 }
 0x800   : > { %v2082_v24 = vmin.f32 %v2062_v6, %v2072_v27  ;;  %v2274_v15 = vrot.slane %v4401_v19, 2  ;;  %v1866_v8 = vmin.f32 %v1851_v56, %v1841_v23  ;;  %v1871_v18 = vmax.f32 %v1851_v56, %v1841_v23 }
 0x801   : > { %v1808_v12 = vmin.f32 %v4913_v35, %v4912_v29  ;;  %v1876_v3 = vmin.f32 %v1861_v4, %v1846_v40  ;;  %v1881_v59 = vmax.f32 %v1861_v4, %v1846_v40  ;;  %v2036_v28 = vmax.f32 %v1936_v52, %v4297_v1  ;;  %v1928_v1 = vpop.permute.xlu0 %1927 }
 0x802   : > { %v2087_v37 = vmin.f32 %v2082_v24, %v2077_v21  ;;  %v2092_v55 = vmax.f32 %v2082_v24, %v2077_v21  ;;  %v1813_v26 = vmax.f32 %v4913_v35, %v4912_v29  ;;  %v1818_v49 = vmin.f32 %v4915_v43, %v4914_v36 }
 0x803   : > { %v1823_v58 = vmax.f32 %v4915_v43, %v4914_v36  ;;  %v1886_v0 = vmin.f32 %v1866_v8, %v1876_v3  ;;  %v1891_v47 = vmax.f32 %v1866_v8, %v1876_v3  ;;  %v1901_v20 = vmin.f32 %v1871_v18, %v1881_v59 }
 0x804   : > { %v2097_v51 = vmin.f32 %v2092_v55, %v2052_v9  ;;  %v1906_v2 = vmax.f32 %v1871_v18, %v1881_v59  ;;  %v1828_v10 = vmin.f32 %v1803_v39, %v4916_v14  ;;  %v1833_v6 = vmax.f32 %v1803_v39, %v4916_v14 }
 0x805   : > { %v1838_v44 = vmin.f32 %v1808_v12, %v1818_v49  ;;  %v1896_v17 = vmax.f32 %v1886_v0, %v4917_v46  ;;  %v2056_v32 = vmin.f32 %v1901_v20, %v1891_v47  ;;  %v2061_v54 = vmax.f32 %v1901_v20, %v1891_v47  ;;  %v4920_v20 = vld [vmem:[#allocation54_spill] sm:$0xff] }
 0x806   : > { %v4419_v48 = vmax.f32 %v2087_v37, %v2097_v51  ;;  %v1843_v60 = vmax.f32 %v1808_v12, %v1818_v49  ;;  %v1853_v52 = vmin.f32 %v1813_v26, %v1823_v58  ;;  %v1858_v9 = vmax.f32 %v1813_v26, %v1823_v58 }
 0x807   : > { %v1848_v38 = vmax.f32 %v1838_v44, %v1828_v10  ;;  %v1911_v57 = vmin.f32 %v1906_v2, %v1896_v17  ;;  %v2051_v39 = vmin.f32 %v2036_v28, %v4302_v50  ;;  %v1938_v25 = vsel %vm361_vm12, 0.0, %v1928_v1  ;;  %v4921_v1 = vld [vmem:[#allocation19_spill] sm:$0xff] }
 0x808   : > { %v4425_v16 = vsel %vm153_vm0, 0.0, %v4419_v48  ;;  %v2208_v45 = vsel %vm222_vm9, 0.0, %v2194_v63  ;;  %v1863_v24 = vmin.f32 %v1858_v9, %v1833_v6  ;;  %v1868_v40 = vmin.f32 %v1853_v52, %v1843_v60 }
 0x809   : > { %v2199_v23 = vrot.slane %v4425_v16, 6  ;;  %v2219_v56 = vrot.slane %v4425_v16, 7  ;;  %v2254_v34 = vrot.slane %v4425_v16, 1  ;;  %v2066_v27 = vmin.f32 %v1911_v57, %v2031_v61 }
 0x80a   : > { %v2071_v21 = vmax.f32 %v1911_v57, %v2031_v61  ;;  %v2279_v4 = vrot.slane %v4425_v16, 2  ;;  %v1873_v8 = vmax.f32 %v1853_v52, %v1843_v60  ;;  %v2033_v50 = vmin.f32 %v1938_v25, %v4308_v22 }
 0x80b   : > { %v2038_v18 = vmax.f32 %v1938_v25, %v4308_v22  ;;  %v2076_v29 = vmax.f32 %v2056_v32, %v2066_v27  ;;  %v1878_v12 = vmin.f32 %v1863_v24, %v1848_v38  ;;  %v1883_v37 = vmax.f32 %v1863_v24, %v1848_v38  ;;  %v4918_v22 = vld [vmem:[#allocation10_spill] sm:$0xff]  ;;  %v4922_v38 = vld [vmem:[#allocation20_spill] sm:$0xff] }
 0x80c   : > { %v2081_v35 = vmin.f32 %v2061_v54, %v2071_v21  ;;  %v2209_v3 = vmul.f32 0.070766374, %v2208_v45  ;;  %v2228_v61 = vsel %vm196_vm1, 0.0, %v2214_v5  ;;  %v2251_v59 = vsel %vm937_vm14, %v2249_v53, %v2250_v30 }
 0x80d   : > { %v2053_v55 = vmin.f32 %v2038_v18, %v4321_v31  ;;  %v1888_v36 = vmin.f32 %v1868_v40, %v1878_v12  ;;  %v1893_v43 = vmax.f32 %v1868_v40, %v1878_v12  ;;  %vm2113_vm10 = vcmp.eq.s32.totalorder %v4918_v22, 35  ;;  %v4919_v31 = vld [vmem:[#allocation8_spill] sm:$0xff] }
 0x80e   : > { %v2086_v28 = vmin.f32 %v2081_v35, %v2076_v29  ;;  %v2091_v26 = vmax.f32 %v2081_v35, %v2076_v29  ;;  %v1903_v49 = vmin.f32 %v1873_v8, %v1883_v37  ;;  %v1908_v58 = vmax.f32 %v1873_v8, %v1883_v37 }
 0x80f   : > { %v2229_v51 = vmul.f32 0.2444604, %v2228_v61  ;;  %v2239_v0 = vmul.f32 %v4919_v31, %v4401_v19  ;;  %v1898_v2 = vmax.f32 %v1888_v36, %v4920_v20  ;;  %v2276_v53 = vsel %vm544_vm15, %v2274_v15, %v2275_v11 }
 0x810   : > { %v2096_v47 = vmin.f32 %v2091_v26, %v2051_v39  ;;  %v2196_v14 = vsel %vm222_vm9, %v2194_v63, %v2195_v41  ;;  %v2058_v10 = vmin.f32 %v1903_v49, %v1893_v43  ;;  %v2063_v6 = vmax.f32 %v1903_v49, %v1893_v43 }
 0x811   : > { %v2234_v44 = vadd.f32 %v2229_v51, %v2209_v3  ;;  %v2264_v46 = vmul.f32 %v2251_v59, %v4921_v1  ;;  %v1913_v32 = vmin.f32 %v1908_v58, %v1898_v2  ;;  %v2210_v54 = vmul.f32 0.070766374, %v2196_v14 }
 0x812   : > { %v4460_v17 = vmax.f32 %v2086_v28, %v2096_v47  ;;  %v2216_v15 = vsel %vm196_vm1, %v2214_v5, %v2215_v7  ;;  %v2289_v52 = vmul.f32 %v2276_v53, %v4922_v38  ;;  %v2240_v63 = vmul.f32 0.36954647, %v4375_v62 }
 0x813   : > { %v2244_v60 = vadd.f32 %v2239_v0, %v2234_v44  ;;  %v2230_v9 = vmul.f32 0.2444604, %v2216_v15  ;;  %v2068_v39 = vmin.f32 %v1913_v32, %v2033_v50  ;;  %v2073_v25 = vmax.f32 %v1913_v32, %v2033_v50 }
 0x814   : > { %v2106_v57 = vsel %vm153_vm0, 0.0, %v4460_v17  ;;  %v2242_v45 = vmul.f32 0.36954647, %v4425_v16  ;;  %vm2153_vm0 = vcmp.eq.s32.totalorder %v4918_v22, 34  ;;  %vm2445_vm13 = vcmp.gt.f32.partialorder %v4390_v13, 0.1 }
 0x815   : > { %v2197_v27 = vrot.slane %v2106_v57, 6  ;;  %v2217_v21 = vrot.slane %v2106_v57, 7  ;;  %v2252_v24 = vrot.slane %v2106_v57, 1  ;;  %v2277_v19 = vrot.slane %v2106_v57, 2 }
 0x816   : > { %v2078_v40 = vmax.f32 %v2058_v10, %v2068_v39  ;;  %v2083_v5 = vmin.f32 %v2063_v6, %v2073_v25  ;;  %v2269_v8 = vadd.f32 %v2264_v46, %v2244_v60  ;;  %v2235_v18 = vadd.f32 %v2230_v9, %v2210_v54 }
 0x817   : > { %v2253_v29 = vsel %vm937_vm14, %v2250_v30, %v2252_v24  ;;  %v2278_v35 = vsel %vm544_vm15, %v2275_v11, %v2277_v19  ;;  %v2198_v50 = vsel %vm222_vm9, %v2195_v41, %v2197_v27  ;;  %v2218_v12 = vsel %vm196_vm1, %v2215_v7, %v2217_v21 }
 0x818   : > { %v2088_v37 = vmin.f32 %v2083_v5, %v2078_v40  ;;  %v2093_v3 = vmax.f32 %v2083_v5, %v2078_v40  ;;  %v4485_v61 = vadd.f32 %v2289_v52, %v2269_v8  ;;  %v2245_v59 = vadd.f32 %v2240_v63, %v2235_v18 }
 0x819   : > { %v2265_v28 = vmul.f32 0.2444604, %v2253_v29  ;;  %v2211_v26 = vmul.f32 0.070766374, %v2198_v50  ;;  %v2255_v30 = vsel %vm937_vm14, %v2252_v24, %v2254_v34  ;;  %v4923_v11 = vmov 0.0  }
 0x81a   : > { %v2118_v36 = vsel %vm2113_vm10, 0.070766374, %v4923_v11  ;;  %v2098_v41 = vmin.f32 %v2093_v3, %v2053_v55  ;;  %2320 = vrot.lane.b32.xlu1 %v4485_v61, %s2735_s24  ;;  %v2290_v62 = vmul.f32 0.070766374, %v2278_v35  ;;  %v2231_v7 = vmul.f32 0.2444604, %v2218_v12 }
 0x81b   : > { %v2241_v43 = vmul.f32 0.36954647, %v2106_v57  ;;  %v2270_v49 = vadd.f32 %v2265_v28, %v2245_v59  ;;  %v2280_v58 = vsel %vm544_vm15, %v2277_v19, %v2279_v4  ;;  %v2200_v51 = vsel %vm222_vm9, %v2197_v27, %v2199_v23 }
 0x81c   : > { %v2220_v31 = vsel %vm196_vm1, %v2217_v21, %v2219_v56  ;;  %v4504_v55 = vmax.f32 %v2088_v37, %v2098_v41  ;;  %v2236_v0 = vadd.f32 %v2231_v7, %v2211_v26  ;;  %v2266_v47 = vmul.f32 0.2444604, %v2255_v30 }
 0x81d   : > { %v2212_v20 = vmul.f32 0.070766374, %v2200_v51  ;;  %v4506_v2 = vadd.f32 %v2290_v62, %v2270_v49  ;;  %v2291_v53 = vmul.f32 0.070766374, %v2280_v58  ;;  %v2232_v14 = vmul.f32 0.2444604, %v2220_v31 }
 0x81e   : > { %v2128_v10 = vsel %vm2113_vm10, 0.2444604, %v4923_v11  ;;  %v2108_v44 = vsel %vm2885_vm8, 0.0, %v4504_v55  ;;  %v2246_v1 = vadd.f32 %v2241_v43, %v2236_v0  ;;  %v2123_v46 = vadd.f32 0.070766374, %v2118_v36 }
 0x81f   : > { %v2201_v32 = vrot.slane %v2108_v44, 6  ;;  %v2221_v54 = vrot.slane %v2108_v44, 7  ;;  %v2256_v15 = vrot.slane %v2108_v44, 1  ;;  %v2281_v60 = vrot.slane %v2108_v44, 2  ;;  %2322 = vrot.lane.b32.xlu0 %v4506_v2, %s2735_s24 }
 0x820   : > { %v2271_v38 = vadd.f32 %v2266_v47, %v2246_v1  ;;  %v2237_v52 = vadd.f32 %v2232_v14, %v2212_v20  ;;  %v2133_v9 = vadd.f32 0.2444604, %v2128_v10  ;;  %v2158_v63 = vsel %vm2153_vm0, 0.070766374, %v4923_v11 }
 0x821   : > { %v2257_v57 = vsel %vm937_vm14, %v2254_v34, %v2256_v15  ;;  %v2282_v22 = vsel %vm544_vm15, %v2279_v4, %v2281_v60  ;;  %v2202_v39 = vsel %vm222_vm9, %v2199_v23, %v2201_v32  ;;  %v2163_v24 = vadd.f32 0.36954647, %v2158_v63 }
 0x822   : > { %v4527_v25 = vadd.f32 %v2291_v53, %v2271_v38  ;;  %v2247_v27 = vadd.f32 %v2242_v45, %v2237_v52  ;;  %v2267_v21 = vmul.f32 0.2444604, %v2257_v57  ;;  %v2213_v19 = vmul.f32 %v2202_v39, %v2123_v46 }
 0x823   : > { %v2222_v40 = vsel %vm196_vm1, %v2219_v56, %v2221_v54  ;;  %v2292_v5 = vmul.f32 0.070766374, %v2282_v22  ;;  %v2263_v8 = vsel %vm937_vm14, %v2256_v15, 0.0  ;;  %v2243_v29 = vmul.f32 %v2163_v24, %v2108_v44 }
 0x824   : > { %2324 = vrot.lane.b32.xlu1 %v4527_v25, %s2735_s24  ;;  %v2272_v34 = vadd.f32 %v2267_v21, %v2247_v27  ;;  %v2233_v4 = vmul.f32 %v2222_v40, %v2133_v9  ;;  %v2288_v45 = vsel %vm544_vm15, %v2281_v60, 0.0  ;;  %v2268_v35 = vmul.f32 0.2444604, %v2263_v8 }
 0x825   : > { %v2293_v50 = vmul.f32 0.070766374, %v2288_v45  ;;  %vm2304_vm1 = vcmp.eq.s32.totalorder %v4905_v33, 1  ;;  %vm2299_vm8 = vcmp.eq.s32.totalorder %v4905_v33, 47  ;;  %vm2307_vm9 = vcmp.eq.s32.totalorder %v4905_v33, 46 }
 0x826   : > { %v4535_v18 = vadd.f32 %v2292_v5, %v2272_v34  ;;  %v2238_v23 = vadd.f32 %v2233_v4, %v2213_v19  ;;  %v2302_v41 = vsel %vm2299_vm8, 0.2444604, %v4923_v11  ;;  %v2305_v7 = vsel %vm2304_vm1, 0.070766374, %v4923_v11 }
 0x827   : > { %v2300_v43 = vsel %vm2299_vm8, 0.070766374, %v4923_v11  ;;  %v2303_v49 = vadd.f32 0.2444604, %v2302_v41  ;;  %vm2310_vm15 = vcmp.eq.s32.totalorder %v4905_v33, 0 }
 0x828   : > { %2326 = vrot.lane.b32.xlu0 %v4535_v18, %s2735_s24  ;;  %v2248_v16 = vadd.f32 %v2243_v29, %v2238_v23  ;;  %v2306_v31 = vadd.f32 0.36954647, %v2305_v7  ;;  %v2301_v0 = vadd.f32 0.070766374, %v2300_v43  ;;  %v2308_v20 = vsel %vm2307_vm9, 0.070766374, %v4923_v11 }
 0x829   : > { %v2311_v14 = vsel %vm2310_vm15, 0.2444604, %v4923_v11  ;;  %v2313_v52 = vsel %vm2310_vm15, 0.070766374, %v4923_v11  ;;  %vm2446_vm14 = vcmp.gt.f32.partialorder %v4363_v42, 0.1 }
 0x82a   : > { %v2273_v56 = vadd.f32 %v2268_v35, %v2248_v16  ;;  %v2309_v1 = vadd.f32 %v2308_v20, %v2306_v31  ;;  %v2312_v54 = vadd.f32 0.2444604, %v2311_v14  ;;  %v4600_v11 = vadd.f32 0.070766374, %v2313_v52 }
 0x82c   : > { %2345 = vrot.lane.b32.xlu0 %v4485_v61, %s2734_s16  ;;  %v4542_v12 = vadd.f32 %v2293_v50, %v2273_v56  ;;  %v2375_v24 = vmul.f32 %v2309_v1, %v4485_v61  ;;  %v2376_v8 = vmul.f32 %v2309_v1, %v4506_v2 }
 0x82e   : > { %2328 = vrot.lane.b32.xlu1 %v4542_v12, %s2735_s24 }
 0x830   : > { %2349 = vrot.lane.b32.xlu0 %v4527_v25, %s2734_s16 }
 0x832   : > { %2347 = vrot.lane.b32.xlu1 %v4506_v2, %s2734_s16 }
 0x834   : > { %2353 = vrot.lane.b32.xlu0 %v4542_v12, %s2734_s16 }
 0x836   : > { %2351 = vrot.lane.b32.xlu1 %v4535_v18, %s2734_s16 }
 0x838   : > { %2387 = vrot.lane.b32.xlu0 %v4506_v2, %s2741_s3 }
 0x83a   : > { %2385 = vrot.lane.b32.xlu1 %v4485_v61, %s2741_s3 }
 0x83c   : > { %2391 = vrot.lane.b32.xlu0 %v4535_v18, %s2741_s3 }
 0x83e   : > { %2389 = vrot.lane.b32.xlu1 %v4527_v25, %s2741_s3 }
 0x840   : > { %2415 = vrot.lane.b32.xlu0 %v4485_v61, %s2738_s28 }
 0x842   : > { %2393 = vrot.lane.b32.xlu1 %v4542_v12, %s2741_s3 }
 0x844   : > { %2419 = vrot.lane.b32.xlu0 %v4527_v25, %s2738_s28 }
 0x846   : > { %2417 = vrot.lane.b32.xlu1 %v4506_v2, %s2738_s28 }
 0x848   : > { %2423 = vrot.lane.b32.xlu0 %v4542_v12, %s2738_s28 }
 0x84a   : > { %2421 = vrot.lane.b32.xlu1 %v4535_v18, %s2738_s28 }
 0x88c   : > { %v2321_v37 = vpop.permute.xlu1 %2320 }
 0x88d   : > { %v2335_v53 = vsel %vm361_vm12, 0.0, %v2321_v37 }
 0x88e   : > { %v2340_v46 = vmul.f32 %v2335_v53, %v2301_v0 }
 0x891   : > { %v2323_v3 = vpop.permute.xlu0 %2322 }
 0x892   : > { %v2336_v9 = vsel %vm361_vm12, 0.0, %v2323_v3 }
 0x893   : > { %v2341_v5 = vmul.f32 %v2336_v9, %v2301_v0 }
 0x896   : > { %v2325_v59 = vpop.permute.xlu1 %2324 }
 0x897   : > { %v2337_v60 = vsel %vm361_vm12, 0.0, %v2325_v59 }
 0x898   : > { %v2342_v19 = vmul.f32 %v2337_v60, %v2301_v0 }
 0x89a   : > { %v2327_v28 = vpop.permute.xlu0 %2326 }
 0x89b   : > { %v2338_v29 = vsel %vm361_vm12, 0.0, %v2327_v28  ;;  %v2378_v28 = vmul.f32 %v2309_v1, %v4535_v18 }
 0x89c   : > { %v2343_v41 = vmul.f32 %v2338_v29, %v2301_v0 }
 0x89e   : > { %v2346_v26 = vpop.permute.xlu0 %2345 }
 0x89f   : > { %v2360_v51 = vsel %vm330_vm11, 0.0, %v2346_v26  ;;  %v2377_v26 = vmul.f32 %v2309_v1, %v4527_v25 }
 0x8a0   : > { %v2329_v30 = vpop.permute.xlu1 %2328  ;;  %v2365_v10 = vmul.f32 %v2360_v51, %v2303_v49 }
 0x8a1   : > { %v2339_v27 = vsel %vm361_vm12, 0.0, %v2329_v30  ;;  %vm2447_vm12 = vcmp.gt.f32.partialorder %v4460_v17, 0.1 }
 0x8a2   : > { %v2350_v36 = vpop.permute.xlu0 %2349  ;;  %v2370_v63 = vadd.f32 %v2365_v10, %v2340_v46  ;;  %v2344_v45 = vmul.f32 %v2339_v27, %v2301_v0 }
 0x8a3   : > { %v2362_v44 = vsel %vm330_vm11, 0.0, %v2350_v36 }
 0x8a4   : > { %v2348_v62 = vpop.permute.xlu1 %2347  ;;  %v2367_v57 = vmul.f32 %v2362_v44, %v2303_v49  ;;  %v2380_v61 = vadd.f32 %v2375_v24, %v2370_v63 }
 0x8a5   : > { %v2361_v32 = vsel %vm330_vm11, 0.0, %v2348_v62 }
 0x8a6   : > { %v2354_v58 = vpop.permute.xlu0 %2353  ;;  %v2366_v21 = vmul.f32 %v2361_v32, %v2303_v49  ;;  %v2372_v16 = vadd.f32 %v2367_v57, %v2342_v19 }
 0x8a7   : > { %v2364_v22 = vsel %vm330_vm11, 0.0, %v2354_v58 }
 0x8a8   : > { %v2352_v47 = vpop.permute.xlu1 %2351  ;;  %v2369_v4 = vmul.f32 %v2364_v22, %v2303_v49  ;;  %v2371_v56 = vadd.f32 %v2366_v21, %v2341_v5  ;;  %v2382_v58 = vadd.f32 %v2377_v26, %v2372_v16 }
 0x8a9   : > { %v2363_v40 = vsel %vm330_vm11, 0.0, %v2352_v47 }
 0x8aa   : > { %v2388_v6 = vpop.permute.xlu0 %2387  ;;  %v2368_v50 = vmul.f32 %v2363_v40, %v2303_v49  ;;  %v2374_v62 = vadd.f32 %v2369_v4, %v2344_v45  ;;  %v2379_v49 = vmul.f32 %v2309_v1, %v4542_v12  ;;  %v2381_v20 = vadd.f32 %v2376_v8, %v2371_v56 }
 0x8ab   : > { %v2401_v37 = vsel %vm1128_vm5, %v2388_v6, 0.0 }
 0x8ac   : > { %v2386_v15 = vpop.permute.xlu1 %2385  ;;  %v2406_v43 = vmul.f32 %v2401_v37, %v2312_v54  ;;  %v2373_v47 = vadd.f32 %v2368_v50, %v2343_v41  ;;  %v2384_v44 = vadd.f32 %v2379_v49, %v2374_v62 }
 0x8ad   : > { %v2400_v38 = vsel %vm1128_vm5, %v2386_v15, 0.0 }
 0x8ae   : > { %v2392_v39 = vpop.permute.xlu0 %2391  ;;  %v2405_v34 = vmul.f32 %v2400_v38, %v2312_v54  ;;  %v2411_v46 = vadd.f32 %v2406_v43, %v2381_v20  ;;  %v2383_v52 = vadd.f32 %v2378_v28, %v2373_v47 }
 0x8af   : > { %v2403_v25 = vsel %vm1128_vm5, %v2392_v39, 0.0 }
 0x8b0   : > { %v2390_v33 = vpop.permute.xlu1 %2389  ;;  %v2410_v59 = vadd.f32 %v2405_v34, %v2380_v61  ;;  %v2408_v32 = vmul.f32 %v2403_v25, %v2312_v54 }
 0x8b1   : > { %v2402_v23 = vsel %vm1128_vm5, %v2390_v33, 0.0 }
 0x8b2   : > { %v2416_v35 = vpop.permute.xlu0 %2415  ;;  %v2407_v30 = vmul.f32 %v2402_v23, %v2312_v54  ;;  %v2413_v24 = vadd.f32 %v2408_v32, %v2383_v52 }
 0x8b3   : > { %v2430_v3 = vsel %vm666_vm2, %v2416_v35, 0.0 }
 0x8b4   : > { %v2394_v36 = vpop.permute.xlu1 %2393  ;;  %v2435_v2 = vmul.f32 %v2430_v3, %v4600_v11  ;;  %v2412_v14 = vadd.f32 %v2407_v30, %v2382_v58 }
 0x8b5   : > { %v2404_v7 = vsel %vm1128_vm5, %v2394_v36, 0.0  ;;  %vm2449_vm5 = vcmp.gt.f32.partialorder %v4504_v55, 0.1 }
 0x8b6   : > { %v2440_v51 = vadd.f32 %v2435_v2, %v2410_v59  ;;  %v2420_v31 = vpop.permute.xlu0 %2419  ;;  %v2409_v10 = vmul.f32 %v2404_v7, %v2312_v54 }
 0x8b7   : > { %v2432_v53 = vsel %vm666_vm2, %v2420_v31, 0.0 }
 0x8b8   : > { %v2450_v18 = vsel %vm2445_vm13, %v2440_v51, %v4390_v13  ;;  %v2418_v0 = vpop.permute.xlu1 %2417  ;;  %v2437_v6 = vmul.f32 %v2432_v53, %v4600_v11  ;;  %v2414_v63 = vadd.f32 %v2409_v10, %v2384_v44 }
 0x8b9   : > { %vm2455_vm11 = vcmp.gt.f32.partialorder %v2450_v18, 0.1  ;;  %v2460_v12 = vsub.f32 100.0, %v2450_v18  ;;  %v2431_v1 = vsel %vm666_vm2, %v2418_v0, 0.0 }
 0x8ba   : > { %v2436_v15 = vmul.f32 %v2431_v1, %v4600_v11  ;;  %v2442_v60 = vadd.f32 %v2437_v6, %v2412_v14  ;;  %v2424_v38 = vpop.permute.xlu0 %2423 }
 0x8bb   : > { %v2465_v9 = vsel %vm2455_vm11, %v2460_v12, %v2450_v18  ;;  %v2434_v13 = vsel %vm666_vm2, %v2424_v38, 0.0 }
 0x8bc   : > { %2470 = vst [vmem:[%s4624_s4] sm:$0xff] %v2465_v9  ;;  %v2441_v57 = vadd.f32 %v2436_v15, %v2411_v46  ;;  %v2452_v54 = vsel %vm2447_vm12, %v2442_v60, %v4460_v17  ;;  %v2422_v22 = vpop.permute.xlu1 %2421  ;;  %v2439_v39 = vmul.f32 %v2434_v13, %v4600_v11 }
 0x8bd   : > { %vm2457_vm3 = vcmp.gt.f32.partialorder %v2452_v54, 0.1  ;;  %v2462_v27 = vsub.f32 100.0, %v2452_v54  ;;  %v2433_v21 = vsel %vm666_vm2, %v2422_v22, 0.0  ;;  %vm2448_vm2 = vcmp.gt.f32.partialorder %v4419_v48, 0.1 }
 0x8be   : > { %v2451_v19 = vsel %vm2446_vm14, %v2441_v57, %v4363_v42  ;;  %v2438_v40 = vmul.f32 %v2433_v21, %v4600_v11  ;;  %v2444_v34 = vadd.f32 %v2439_v39, %v2414_v63 }
 0x8bf   : > { %vm2456_vm4 = vcmp.gt.f32.partialorder %v2451_v19, 0.1  ;;  %v2461_v17 = vsub.f32 100.0, %v2451_v19  ;;  %v2467_v33 = vsel %vm2457_vm3, %v2462_v27, %v2452_v54 }
 0x8c0   : > { %2472 = vst [vmem:[%s4624_s4 + $0x10] sm:$0xff] %v2467_v33  ;;  %v2443_v5 = vadd.f32 %v2438_v40, %v2413_v24  ;;  %v2454_v4 = vsel %vm2449_vm5, %v2444_v34, %v4504_v55 }
 0x8c1   : > { %v2466_v8 = vsel %vm2456_vm4, %v2461_v17, %v2451_v19  ;;  %vm2459_vm6 = vcmp.gt.f32.partialorder %v2454_v4, 0.1  ;;  %v2464_v42 = vsub.f32 100.0, %v2454_v4 }
 0x8c2   : > { %2471 = vst [vmem:[%s4624_s4 + $0x8] sm:$0xff] %v2466_v8  ;;  %v2453_v11 = vsel %vm2448_vm2, %v2443_v5, %v4419_v48 }
 0x8c3   : > { %vm2458_vm7 = vcmp.gt.f32.partialorder %v2453_v11, 0.1  ;;  %v2463_v23 = vsub.f32 100.0, %v2453_v11  ;;  %v2469_v29 = vsel %vm2459_vm6, %v2464_v42, %v2454_v4 }
 0x8c4   : > { %2474 = vst [vmem:[%s4624_s4 + $0x20] sm:$0xff] %v2469_v29 }
 0x8c5   : > { %v2468_v55 = vsel %vm2458_vm7, %v2463_v23, %v2453_v11 }
 0x8c6   : > { %2473 = vst [vmem:[%s4624_s4 + $0x18] sm:$0xff] %v2468_v55 }
 0x8c7   : > { %2676 = shalt.err (!%p2673_p2)
}
 0x8c8   : > { %s2677_s29 = scalar_lea.hbm %s4644_s14, 640  ;;  %s2681_s25 = scalar_lea.hbm %s4693_s1, 1280 }
 0x8c9   : > { %p2678_p4 = scmp.ne.s32.totalorder %s4644_s14, %s2677_s29  ;;  %p2682_p9 = scmp.lt.u32.totalorder %s4644_s14, %s4693_s1 }
 0x8ca   : > { %p2683_p1 = scmp.lt.u32.totalorder %s2681_s25, %s2677_s29  ;;  %p2685_p6 = scmp.lt.u32.totalorder %s2677_s29, %s4644_s14 }
 0x8cb   : > { %p2679_p5 = pnand %p2678_p4, %p4925_p11 }
 0x8cc   : > { %p2684_p3 = por %p2683_p1, %p2682_p9 }
 0x8cd   : > { %p2680_p7 = pneg %p2679_p5 }
 0x8ce   : > { %p2686_p12 = por %p2685_p6, %p2684_p3 }
 0x8d0   : > { %p2687_p13 = pnand %p2686_p12, %p2680_p7 }
 0x8d2   : > { %2690 = shalt.err (!%p2687_p13)
}
 0x8d3   : > { %s2744_s30 = smov 128   ;;  %s2745_s2 = smov 8  }
 0x8d4   : > { %2576 = dma.vmem_to_hbm [thread:$0]  (%p4925_p11), %s4647_s11, 640, %s4644_s14, %s2476_s19, %s2744_s30, %s2744_s30, %s2745_s2  }
 0x8d5 PF: > { %s2504_s3 = sand.u32 1, %s2717_s6   ;;  %p4926_p8 = scmp.ne.s32.totalorder %s4774_s18, 0 }
 0x8d6   : > { %p4927_p10 = scmp.ge.s32.totalorder %s2729_s9, 2  ;;  %s2505_s4 = scalar_lea.sflag [#allocation4], %s2504_s3 }
 0x8d8   : > { %p2583_p0 = pnand %p4927_p10, %p4926_p8 }
 0x8da   : > { %2712 = dma.done.wait (!%p2583_p0), %s2505_s4, 640  }
 0x8db   : > { %2714 = vsyncadd (!%p2583_p0), %s2505_s4, 4294966656  ;;  %p14_p2 = scmp.ge.s32.totalorder %s2781_s12, 4   ;;  %s4928_s6 = smov %s2721_s7 }
 0x8dc   : > { %s4929_s7 = smov %s2725_s8  ;;  %s4930_s8 = smov %s2793_s15 }
 0x8dd   : > { %s4931_s9 = smov %s2781_s12  ;;  %16 = sbr.rel (!%p14_p2) target bundleno = 5 (0x5), region = 69 }
 0x8e4   :  { %2510 = vsyncpa [#allocation3], 1 }
 0x8e5   :  { %2512 = vsyncpa [#allocation3 + $0x1], 1 }
 0x8e6   :  { %2513 = vsyncpa [#allocation4], 1 }
 0x8e7   :  { %2515 = vsyncpa [#allocation4 + $0x1], 1 }

</bundles_post_ra>
